<compile_context>
chip_gen: v6e
topology: v6e:2x2x1
jax: 0.10.0
libtpu: 0.0.40
codegen_flags: <defaults>
</compile_context>

<pallas_src>
import numpy as np
import jax
import jax.numpy as jnp
from jax import lax
from jax.experimental import pallas as pl
from jax.experimental.pallas import tpu as pltpu


def _round_up(x, m):
    return -(-x // m) * m


# ---------------------------------------------------------------------------
# Pallas kernel: multi-hot build + fused MLP + wide term + sigmoid
# ---------------------------------------------------------------------------
def wd_kernel(idx_ref, temb_ref, b1_ref, lint_ref, w2_ref, b2_ref,
              w3t_ref, bout_ref, out_ref):
    bm, F = idx_ref.shape
    vocab_pad = temb_ref.shape[0]

    # Multi-hot matrix C[b, v] = #{f : idx[b, f] == v}  (0/1 here; exact in bf16).
    idx = idx_ref[...]                                              # (bm, F) int32
    lanes = lax.broadcasted_iota(jnp.int32, (bm, vocab_pad), 1)
    counts = jnp.zeros((bm, vocab_pad), jnp.float32)
    for f in range(F):                                              # static unroll, F ~ 21
        counts = counts + (lanes == idx[:, f:f + 1]).astype(jnp.float32)
    c = counts.astype(jnp.bfloat16)

    # Deep layer 1: fused (gather + Linear + folded BN) -> ReLU.  Dropout = id at eval.
    h = jnp.dot(c, temb_ref[...], preferred_element_type=jnp.float32)
    h = jnp.maximum(h + b1_ref[...], 0.0)                           # (bm, H1) f32

    # Deep layer 2: Linear + folded BN -> ReLU.
    h = jnp.dot(h, w2_ref[...], preferred_element_type=jnp.float32)
    h = jnp.maximum(h + b2_ref[...], 0.0)                           # (bm, H2) f32

    # Final Linear (H2 -> 1) and wide term, produced transposed (1, bm) so the
    # store is lane-dense (batch on the lane axis).
    dn = (((1,), (1,)), ((), ()))                                   # contract last dims (A @ B^T)
    logit_t = lax.dot_general(w3t_ref[...], h, dn,
                              preferred_element_type=jnp.float32)    # (1, bm)
    wide_t = lax.dot_general(lint_ref[...], c, dn,
                             preferred_element_type=jnp.float32)     # (1, bm)
    out_ref[0] = jax.nn.sigmoid(logit_t + wide_t + bout_ref[...])


def wd_pallas_forward(idx, fused, *, bm=1024):
    """idx: (B, F) int32 global-vocab rows.  fused: prepared/folded parameters."""
    B, F = idx.shape
    temb = fused["temb"]
    vocab_pad, H1 = temb.shape
    H2 = fused["w2"].shape[1]

    bm_eff = min(bm, _round_up(B, 128))          # lane-aligned batch tile
    B_pad = _round_up(B, bm_eff)
    n_tiles = B_pad // bm_eff
    if B_pad != B:
        idx = jnp.pad(idx, ((0, B_pad - B), (0, 0)))   # pad rows hit index 0; discarded below

    def bcast(shape):
        return pl.BlockSpec(shape, lambda i, _s=shape: (0,) * len(_s))

    out = pl.pallas_call(
        wd_kernel,
        out_shape=jax.ShapeDtypeStruct((n_tiles, 1, bm_eff), jnp.float32),
        grid=(n_tiles,),
        in_specs=[
            pl.BlockSpec((bm_eff, F), lambda i: (i, 0)),   # indices tile (int32)
            bcast((vocab_pad, H1)),                        # fused emb@W1 table (bf16)
            bcast((1, H1)),                                # b1 (BN folded)
            bcast((1, vocab_pad)),                         # wide linear table^T (bf16)
            bcast((H1, H2)),                               # w2 (BN folded)
            bcast((1, H2)),                                # b2 (BN folded)
            bcast((1, H2)),                                # w3^T
            bcast((1, 1)),                                 # b3 + wide bias
        ],
        out_specs=pl.BlockSpec((1, 1, bm_eff), lambda i: (i, 0, 0)),
        compiler_params=pltpu.CompilerParams(dimension_semantics=("parallel",)),
    )(idx, fused["temb"], fused["b1"], fused["lint"], fused["w2"],
      fused["b2"], fused["w3t"], fused["bout"])
    return out.reshape(B_pad)[:B]                                    # (B,)


# ---------------------------------------------------------------------------
# Model setup (deterministic params), BN/gather folding, plain-JAX reference
# ---------------------------------------------------------------------------
def build_model(field_dims, embed_dim, mlp_dims, key):
    field_dims = np.asarray(field_dims)
    sel = np.r_[0:3, 4:8, 10:15, 17:19, 21:24, 26:len(field_dims)]   # module's field slice
    sel_dims = field_dims[sel].astype(np.int64)
    offsets = np.array((0, *np.cumsum(sel_dims)[:-1]), dtype=np.int32)
    vocab = int(sel_dims.sum())
    F = len(sel_dims)
    D0 = F * embed_dim
    H1, H2 = mlp_dims

    ks = jax.random.split(key, 8)
    params = {
        "emb_table": 0.01 * jax.random.normal(ks[0], (vocab, embed_dim), jnp.float32),
        "lin_table": 0.01 * jax.random.normal(ks[1], (vocab, 1), jnp.float32),
        "lin_bias": jnp.zeros((1,), jnp.float32),
        "w1": 0.05 * jax.random.normal(ks[2], (D0, H1), jnp.float32),
        "b1": 0.01 * jax.random.normal(ks[3], (1, H1), jnp.float32),
        "w2": 0.05 * jax.random.normal(ks[4], (H1, H2), jnp.float32),
        "b2": 0.01 * jax.random.normal(ks[5], (1, H2), jnp.float32),
        "w3": 0.05 * jax.random.normal(ks[6], (H2, 1), jnp.float32),
        "b3": 0.01 * jax.random.normal(ks[7], (1, 1), jnp.float32),
        # BatchNorm1d running stats / affine (eval mode)
        "bn1_gamma": jnp.ones((1, H1), jnp.float32), "bn1_beta": jnp.zeros((1, H1), jnp.float32),
        "bn1_mean": jnp.zeros((1, H1), jnp.float32), "bn1_var": jnp.ones((1, H1), jnp.float32),
        "bn2_gamma": jnp.ones((1, H2), jnp.float32), "bn2_beta": jnp.zeros((1, H2), jnp.float32),
        "bn2_mean": jnp.zeros((1, H2), jnp.float32), "bn2_var": jnp.ones((1, H2), jnp.float32),
    }
    meta = dict(sel=jnp.asarray(sel, jnp.int32),
                offsets=jnp.asarray(offsets, jnp.int32),
                sel_dims=sel_dims, embed_dim=embed_dim,
                num_fields=F, vocab=vocab, D0=D0)
    return params, meta


def prepare_fused_params(params, meta, eps=1e-5):
    """Fold BN into the Linears; pre-contract emb_table with W1; pad vocab to 128 lanes."""
    E, F, vocab = meta["embed_dim"], meta["num_fields"], meta["vocab"]
    H1 = params["w1"].shape[1]

    s1 = params["bn1_gamma"] / jnp.sqrt(params["bn1_var"] + eps)
    t1 = params["bn1_beta"] - params["bn1_mean"] * s1
    s2 = params["bn2_gamma"] / jnp.sqrt(params["bn2_var"] + eps)
    t2 = params["bn2_beta"] - params["bn2_mean"] * s2

    w1p = params["w1"] * s1                    # (D0, H1)
    b1p = params["b1"] * s1 + t1               # (1, H1)
    w2p = params["w2"] * s2
    b2p = params["b2"] * s2 + t2

    # T[v] = emb_table[v] @ W1'[field(v)*E : (field(v)+1)*E]    -> (vocab, H1)
    field_of = np.repeat(np.arange(F), meta["sel_dims"])        # (vocab,)
    w1_blocks = w1p.reshape(F, E, H1)
    temb = jnp.einsum("ve,veh->vh", params["emb_table"], w1_blocks[field_of])

    vocab_pad = _round_up(vocab, 128)
    pad = vocab_pad - vocab
    temb = jnp.pad(temb, ((0, pad), (0, 0))).astype(jnp.bfloat16)
    lint = jnp.pad(params["lin_table"][:, 0], (0, pad)).reshape(1, vocab_pad).astype(jnp.bfloat16)

    return dict(
        temb=temb,
        b1=b1p.astype(jnp.float32),
        lint=lint,
        w2=w2p.astype(jnp.float32),
        b2=b2p.astype(jnp.float32),
        w3t=params["w3"].T.astype(jnp.float32),
        bout=(params["b3"] + params["lin_bias"][None, :]).astype(jnp.float32),
    )


def wide_and_deep(x, additional, fused, meta, *, bm=1024):
    """x: (B, num_fields_orig) int32. `additional` is accepted but unused (matches reference)."""
    del additional
    x_sel = jnp.take(x, meta["sel"], axis=1)                        # field slice + concat
    idx = (x_sel + meta["offsets"][None, :]).astype(jnp.int32)      # global vocab rows
    return wd_pallas_forward(idx, fused, bm=bm)


def reference_forward(x, params, meta, eps=1e-5):
    """Plain-JAX unfused f32 reference mirroring the PyTorch module (eval mode)."""
    x_sel = jnp.take(x, meta["sel"], axis=1)
    idx = x_sel + meta["offsets"][None, :]
    B = x.shape[0]
    emb = jnp.take(params["emb_table"], idx, axis=0).reshape(B, meta["D0"])
    wide = jnp.take(params["lin_table"], idx, axis=0).sum(axis=1) + params["lin_bias"]

    def bn(h, g, b, m, v):
        return g * (h - m) / jnp.sqrt(v + eps) + b

    h = jnp.maximum(bn(emb @ params["w1"] + params["b1"],
                       params["bn1_gamma"], params["bn1_beta"],
                       params["bn1_mean"], params["bn1_var"]), 0.0)
    h = jnp.maximum(bn(h @ params["w2"] + params["b2"],
                       params["bn2_gamma"], params["bn2_beta"],
                       params["bn2_mean"], params["bn2_var"]), 0.0)
    logit = h @ params["w3"] + params["b3"] + wide
    return jax.nn.sigmoid(logit[:, 0])


# ---------------------------------------------------------------------------
if __name__ == "__main__":
    num_fields_orig = 30
    field_dims = (np.arange(num_fields_orig) % 7) + 3     # small per-field vocabs
    embed_dim = 16
    mlp_dims = (64, 32)
    dropout = 0.2                                         # identity at inference
    vocab_size = int(field_dims.sum())                    # module arg; unused by forward

    key = jax.random.PRNGKey(0)
    params, meta = build_model(field_dims, embed_dim, mlp_dims, key)
    fused = prepare_fused_params(params, meta)

    B = 16
    kx, ka = jax.random.split(jax.random.PRNGKey(0))
    x = jnp.stack(
        [jax.random.randint(jax.random.fold_in(kx, f), (B,), 0, int(field_dims[f]),
                            dtype=jnp.int32)
         for f in range(num_fields_orig)], axis=1)        # (B, 30)
    additional = jax.random.normal(ka, (B, 1), jnp.float32)   # unused by forward

    fwd = jax.jit(lambda xx, aa: wide_and_deep(xx, aa, fused, meta))
    out = jax.block_until_ready(fwd(x, additional))

    ref = reference_forward(x, params, meta)
    assert out.shape == (B,) and out.dtype == jnp.float32
    assert bool(jnp.all((out > 0.0) & (out < 1.0)))
    assert bool(jnp.allclose(out, ref, atol=5e-3, rtol=0.0)), \
        f"max abs err {float(jnp.max(jnp.abs(out - ref)))}"
    print("KERNEL_OK")
</pallas_src>

<mosaic_0001>
module attributes {stable_mosaic.version = 11 : i64} {
  func.func @wd_kernel(%arg0: i32, %arg1: memref<128x21xi32, #tpu.memory_space<vmem>>, %arg2: memref<128x64xbf16, #tpu.memory_space<vmem>>, %arg3: memref<1x64xf32, #tpu.memory_space<vmem>>, %arg4: memref<1x128xbf16, #tpu.memory_space<vmem>>, %arg5: memref<64x32xf32, #tpu.memory_space<vmem>>, %arg6: memref<1x32xf32, #tpu.memory_space<vmem>>, %arg7: memref<1x32xf32, #tpu.memory_space<vmem>>, %arg8: memref<1x1xf32, #tpu.memory_space<vmem>>, %arg9: memref<1x1x128xf32, #tpu.memory_space<vmem>>) attributes {dimension_semantics = [#tpu.dimension_semantics<parallel>], iteration_bounds = array<i64: 1>, scalar_prefetch = 0 : i64, scratch_operands = 0 : i64, tpu.core_type = #tpu.core_type<tc>, window_params = [{transform_indices = @transform_0, window_bounds = array<i64: 128, 21>}, {pipeline_mode = #tpu.pipeline_mode<synchronous>, transform_indices = @transform_1, window_bounds = array<i64: 128, 64>}, {pipeline_mode = #tpu.pipeline_mode<synchronous>, transform_indices = @transform_2, window_bounds = array<i64: 1, 64>}, {pipeline_mode = #tpu.pipeline_mode<synchronous>, transform_indices = @transform_3, window_bounds = array<i64: 1, 128>}, {pipeline_mode = #tpu.pipeline_mode<synchronous>, transform_indices = @transform_4, window_bounds = array<i64: 64, 32>}, {pipeline_mode = #tpu.pipeline_mode<synchronous>, transform_indices = @transform_5, window_bounds = array<i64: 1, 32>}, {pipeline_mode = #tpu.pipeline_mode<synchronous>, transform_indices = @transform_6, window_bounds = array<i64: 1, 32>}, {pipeline_mode = #tpu.pipeline_mode<synchronous>, transform_indices = @transform_7, window_bounds = array<i64: 1, 1>}, {transform_indices = @transform_8, window_bounds = array<i64: 1, 1, 128>}]} {
    %c0 = arith.constant 0 : index
    %c0_0 = arith.constant 0 : index
    %0 = vector.load %arg1[%c0, %c0_0] : memref<128x21xi32, #tpu.memory_space<vmem>>, vector<128x21xi32>
    %1 = tpu.iota {dimensions = array<i32: 1>} : vector<128x128xi32>
    %cst = arith.constant 0.000000e+00 : f32
    %2 = vector.broadcast %cst : f32 to vector<128x128xf32>
    %3 = vector.extract_strided_slice %0 {offsets = [0, 0], sizes = [128, 1], strides = [1, 1]} : vector<128x21xi32> to vector<128x1xi32>
    %4 = vector.broadcast %3 : vector<128x1xi32> to vector<128x128xi32>
    %5 = arith.cmpi eq, %1, %4 : vector<128x128xi32>
    %6 = arith.extui %5 : vector<128x128xi1> to vector<128x128xi32>
    %7 = arith.sitofp %6 : vector<128x128xi32> to vector<128x128xf32>
    %8 = arith.addf %2, %7 : vector<128x128xf32>
    %9 = vector.extract_strided_slice %0 {offsets = [0, 1], sizes = [128, 1], strides = [1, 1]} : vector<128x21xi32> to vector<128x1xi32>
    %10 = vector.broadcast %9 : vector<128x1xi32> to vector<128x128xi32>
    %11 = arith.cmpi eq, %1, %10 : vector<128x128xi32>
    %12 = arith.extui %11 : vector<128x128xi1> to vector<128x128xi32>
    %13 = arith.sitofp %12 : vector<128x128xi32> to vector<128x128xf32>
    %14 = arith.addf %8, %13 : vector<128x128xf32>
    %15 = vector.extract_strided_slice %0 {offsets = [0, 2], sizes = [128, 1], strides = [1, 1]} : vector<128x21xi32> to vector<128x1xi32>
    %16 = vector.broadcast %15 : vector<128x1xi32> to vector<128x128xi32>
    %17 = arith.cmpi eq, %1, %16 : vector<128x128xi32>
    %18 = arith.extui %17 : vector<128x128xi1> to vector<128x128xi32>
    %19 = arith.sitofp %18 : vector<128x128xi32> to vector<128x128xf32>
    %20 = arith.addf %14, %19 : vector<128x128xf32>
    %21 = vector.extract_strided_slice %0 {offsets = [0, 3], sizes = [128, 1], strides = [1, 1]} : vector<128x21xi32> to vector<128x1xi32>
    %22 = vector.broadcast %21 : vector<128x1xi32> to vector<128x128xi32>
    %23 = arith.cmpi eq, %1, %22 : vector<128x128xi32>
    %24 = arith.extui %23 : vector<128x128xi1> to vector<128x128xi32>
    %25 = arith.sitofp %24 : vector<128x128xi32> to vector<128x128xf32>
    %26 = arith.addf %20, %25 : vector<128x128xf32>
    %27 = vector.extract_strided_slice %0 {offsets = [0, 4], sizes = [128, 1], strides = [1, 1]} : vector<128x21xi32> to vector<128x1xi32>
    %28 = vector.broadcast %27 : vector<128x1xi32> to vector<128x128xi32>
    %29 = arith.cmpi eq, %1, %28 : vector<128x128xi32>
    %30 = arith.extui %29 : vector<128x128xi1> to vector<128x128xi32>
    %31 = arith.sitofp %30 : vector<128x128xi32> to vector<128x128xf32>
    %32 = arith.addf %26, %31 : vector<128x128xf32>
    %33 = vector.extract_strided_slice %0 {offsets = [0, 5], sizes = [128, 1], strides = [1, 1]} : vector<128x21xi32> to vector<128x1xi32>
    %34 = vector.broadcast %33 : vector<128x1xi32> to vector<128x128xi32>
    %35 = arith.cmpi eq, %1, %34 : vector<128x128xi32>
    %36 = arith.extui %35 : vector<128x128xi1> to vector<128x128xi32>
    %37 = arith.sitofp %36 : vector<128x128xi32> to vector<128x128xf32>
    %38 = arith.addf %32, %37 : vector<128x128xf32>
    %39 = vector.extract_strided_slice %0 {offsets = [0, 6], sizes = [128, 1], strides = [1, 1]} : vector<128x21xi32> to vector<128x1xi32>
    %40 = vector.broadcast %39 : vector<128x1xi32> to vector<128x128xi32>
    %41 = arith.cmpi eq, %1, %40 : vector<128x128xi32>
    %42 = arith.extui %41 : vector<128x128xi1> to vector<128x128xi32>
    %43 = arith.sitofp %42 : vector<128x128xi32> to vector<128x128xf32>
    %44 = arith.addf %38, %43 : vector<128x128xf32>
    %45 = vector.extract_strided_slice %0 {offsets = [0, 7], sizes = [128, 1], strides = [1, 1]} : vector<128x21xi32> to vector<128x1xi32>
    %46 = vector.broadcast %45 : vector<128x1xi32> to vector<128x128xi32>
    %47 = arith.cmpi eq, %1, %46 : vector<128x128xi32>
    %48 = arith.extui %47 : vector<128x128xi1> to vector<128x128xi32>
    %49 = arith.sitofp %48 : vector<128x128xi32> to vector<128x128xf32>
    %50 = arith.addf %44, %49 : vector<128x128xf32>
    %51 = vector.extract_strided_slice %0 {offsets = [0, 8], sizes = [128, 1], strides = [1, 1]} : vector<128x21xi32> to vector<128x1xi32>
    %52 = vector.broadcast %51 : vector<128x1xi32> to vector<128x128xi32>
    %53 = arith.cmpi eq, %1, %52 : vector<128x128xi32>
    %54 = arith.extui %53 : vector<128x128xi1> to vector<128x128xi32>
    %55 = arith.sitofp %54 : vector<128x128xi32> to vector<128x128xf32>
    %56 = arith.addf %50, %55 : vector<128x128xf32>
    %57 = vector.extract_strided_slice %0 {offsets = [0, 9], sizes = [128, 1], strides = [1, 1]} : vector<128x21xi32> to vector<128x1xi32>
    %58 = vector.broadcast %57 : vector<128x1xi32> to vector<128x128xi32>
    %59 = arith.cmpi eq, %1, %58 : vector<128x128xi32>
    %60 = arith.extui %59 : vector<128x128xi1> to vector<128x128xi32>
    %61 = arith.sitofp %60 : vector<128x128xi32> to vector<128x128xf32>
    %62 = arith.addf %56, %61 : vector<128x128xf32>
    %63 = vector.extract_strided_slice %0 {offsets = [0, 10], sizes = [128, 1], strides = [1, 1]} : vector<128x21xi32> to vector<128x1xi32>
    %64 = vector.broadcast %63 : vector<128x1xi32> to vector<128x128xi32>
    %65 = arith.cmpi eq, %1, %64 : vector<128x128xi32>
    %66 = arith.extui %65 : vector<128x128xi1> to vector<128x128xi32>
    %67 = arith.sitofp %66 : vector<128x128xi32> to vector<128x128xf32>
    %68 = arith.addf %62, %67 : vector<128x128xf32>
    %69 = vector.extract_strided_slice %0 {offsets = [0, 11], sizes = [128, 1], strides = [1, 1]} : vector<128x21xi32> to vector<128x1xi32>
    %70 = vector.broadcast %69 : vector<128x1xi32> to vector<128x128xi32>
    %71 = arith.cmpi eq, %1, %70 : vector<128x128xi32>
    %72 = arith.extui %71 : vector<128x128xi1> to vector<128x128xi32>
    %73 = arith.sitofp %72 : vector<128x128xi32> to vector<128x128xf32>
    %74 = arith.addf %68, %73 : vector<128x128xf32>
    %75 = vector.extract_strided_slice %0 {offsets = [0, 12], sizes = [128, 1], strides = [1, 1]} : vector<128x21xi32> to vector<128x1xi32>
    %76 = vector.broadcast %75 : vector<128x1xi32> to vector<128x128xi32>
    %77 = arith.cmpi eq, %1, %76 : vector<128x128xi32>
    %78 = arith.extui %77 : vector<128x128xi1> to vector<128x128xi32>
    %79 = arith.sitofp %78 : vector<128x128xi32> to vector<128x128xf32>
    %80 = arith.addf %74, %79 : vector<128x128xf32>
    %81 = vector.extract_strided_slice %0 {offsets = [0, 13], sizes = [128, 1], strides = [1, 1]} : vector<128x21xi32> to vector<128x1xi32>
    %82 = vector.broadcast %81 : vector<128x1xi32> to vector<128x128xi32>
    %83 = arith.cmpi eq, %1, %82 : vector<128x128xi32>
    %84 = arith.extui %83 : vector<128x128xi1> to vector<128x128xi32>
    %85 = arith.sitofp %84 : vector<128x128xi32> to vector<128x128xf32>
    %86 = arith.addf %80, %85 : vector<128x128xf32>
    %87 = vector.extract_strided_slice %0 {offsets = [0, 14], sizes = [128, 1], strides = [1, 1]} : vector<128x21xi32> to vector<128x1xi32>
    %88 = vector.broadcast %87 : vector<128x1xi32> to vector<128x128xi32>
    %89 = arith.cmpi eq, %1, %88 : vector<128x128xi32>
    %90 = arith.extui %89 : vector<128x128xi1> to vector<128x128xi32>
    %91 = arith.sitofp %90 : vector<128x128xi32> to vector<128x128xf32>
    %92 = arith.addf %86, %91 : vector<128x128xf32>
    %93 = vector.extract_strided_slice %0 {offsets = [0, 15], sizes = [128, 1], strides = [1, 1]} : vector<128x21xi32> to vector<128x1xi32>
    %94 = vector.broadcast %93 : vector<128x1xi32> to vector<128x128xi32>
    %95 = arith.cmpi eq, %1, %94 : vector<128x128xi32>
    %96 = arith.extui %95 : vector<128x128xi1> to vector<128x128xi32>
    %97 = arith.sitofp %96 : vector<128x128xi32> to vector<128x128xf32>
    %98 = arith.addf %92, %97 : vector<128x128xf32>
    %99 = vector.extract_strided_slice %0 {offsets = [0, 16], sizes = [128, 1], strides = [1, 1]} : vector<128x21xi32> to vector<128x1xi32>
    %100 = vector.broadcast %99 : vector<128x1xi32> to vector<128x128xi32>
    %101 = arith.cmpi eq, %1, %100 : vector<128x128xi32>
    %102 = arith.extui %101 : vector<128x128xi1> to vector<128x128xi32>
    %103 = arith.sitofp %102 : vector<128x128xi32> to vector<128x128xf32>
    %104 = arith.addf %98, %103 : vector<128x128xf32>
    %105 = vector.extract_strided_slice %0 {offsets = [0, 17], sizes = [128, 1], strides = [1, 1]} : vector<128x21xi32> to vector<128x1xi32>
    %106 = vector.broadcast %105 : vector<128x1xi32> to vector<128x128xi32>
    %107 = arith.cmpi eq, %1, %106 : vector<128x128xi32>
    %108 = arith.extui %107 : vector<128x128xi1> to vector<128x128xi32>
    %109 = arith.sitofp %108 : vector<128x128xi32> to vector<128x128xf32>
    %110 = arith.addf %104, %109 : vector<128x128xf32>
    %111 = vector.extract_strided_slice %0 {offsets = [0, 18], sizes = [128, 1], strides = [1, 1]} : vector<128x21xi32> to vector<128x1xi32>
    %112 = vector.broadcast %111 : vector<128x1xi32> to vector<128x128xi32>
    %113 = arith.cmpi eq, %1, %112 : vector<128x128xi32>
    %114 = arith.extui %113 : vector<128x128xi1> to vector<128x128xi32>
    %115 = arith.sitofp %114 : vector<128x128xi32> to vector<128x128xf32>
    %116 = arith.addf %110, %115 : vector<128x128xf32>
    %117 = vector.extract_strided_slice %0 {offsets = [0, 19], sizes = [128, 1], strides = [1, 1]} : vector<128x21xi32> to vector<128x1xi32>
    %118 = vector.broadcast %117 : vector<128x1xi32> to vector<128x128xi32>
    %119 = arith.cmpi eq, %1, %118 : vector<128x128xi32>
    %120 = arith.extui %119 : vector<128x128xi1> to vector<128x128xi32>
    %121 = arith.sitofp %120 : vector<128x128xi32> to vector<128x128xf32>
    %122 = arith.addf %116, %121 : vector<128x128xf32>
    %123 = vector.extract_strided_slice %0 {offsets = [0, 20], sizes = [128, 1], strides = [1, 1]} : vector<128x21xi32> to vector<128x1xi32>
    %124 = vector.broadcast %123 : vector<128x1xi32> to vector<128x128xi32>
    %125 = arith.cmpi eq, %1, %124 : vector<128x128xi32>
    %126 = arith.extui %125 : vector<128x128xi1> to vector<128x128xi32>
    %127 = arith.sitofp %126 : vector<128x128xi32> to vector<128x128xf32>
    %128 = arith.addf %122, %127 : vector<128x128xf32>
    %129 = arith.truncf %128 : vector<128x128xf32> to vector<128x128xbf16>
    %c0_1 = arith.constant 0 : index
    %c0_2 = arith.constant 0 : index
    %130 = vector.load %arg2[%c0_1, %c0_2] : memref<128x64xbf16, #tpu.memory_space<vmem>>, vector<128x64xbf16>
    %cst_3 = arith.constant dense<0.000000e+00> : vector<128x64xf32>
    %131 = tpu.matmul %129, %130, %cst_3 {dimension_numbers = #tpu.dot_dimension_numbers<[1], [0], [0], [1], [0, 0, 1, 1], [], []>} : vector<128x128xbf16>, vector<128x64xbf16>, vector<128x64xf32> -> vector<128x64xf32>
    %c0_4 = arith.constant 0 : index
    %c0_5 = arith.constant 0 : index
    %132 = vector.load %arg3[%c0_4, %c0_5] : memref<1x64xf32, #tpu.memory_space<vmem>>, vector<1x64xf32>
    %133 = vector.broadcast %132 : vector<1x64xf32> to vector<128x64xf32>
    %134 = arith.addf %131, %133 : vector<128x64xf32>
    %cst_6 = arith.constant 0.000000e+00 : f32
    %135 = vector.broadcast %cst_6 : f32 to vector<128x64xf32>
    %136 = arith.maximumf %134, %135 : vector<128x64xf32>
    %c0_7 = arith.constant 0 : index
    %c0_8 = arith.constant 0 : index
    %137 = vector.load %arg5[%c0_7, %c0_8] : memref<64x32xf32, #tpu.memory_space<vmem>>, vector<64x32xf32>
    %cst_9 = arith.constant dense<0.000000e+00> : vector<128x32xf32>
    %138 = tpu.matmul %136, %137, %cst_9 {dimension_numbers = #tpu.dot_dimension_numbers<[1], [0], [0], [1], [0, 0, 1, 1], [], []>} : vector<128x64xf32>, vector<64x32xf32>, vector<128x32xf32> -> vector<128x32xf32>
    %c0_10 = arith.constant 0 : index
    %c0_11 = arith.constant 0 : index
    %139 = vector.load %arg6[%c0_10, %c0_11] : memref<1x32xf32, #tpu.memory_space<vmem>>, vector<1x32xf32>
    %140 = vector.broadcast %139 : vector<1x32xf32> to vector<128x32xf32>
    %141 = arith.addf %138, %140 : vector<128x32xf32>
    %cst_12 = arith.constant 0.000000e+00 : f32
    %142 = vector.broadcast %cst_12 : f32 to vector<128x32xf32>
    %143 = arith.maximumf %141, %142 : vector<128x32xf32>
    %c0_13 = arith.constant 0 : index
    %c0_14 = arith.constant 0 : index
    %144 = vector.load %arg7[%c0_13, %c0_14] : memref<1x32xf32, #tpu.memory_space<vmem>>, vector<1x32xf32>
    %cst_15 = arith.constant dense<0.000000e+00> : vector<1x128xf32>
    %145 = tpu.matmul %144, %143, %cst_15 {dimension_numbers = #tpu.dot_dimension_numbers<[1], [1], [0], [0], [0, 0, 1, 0], [], []>} : vector<1x32xf32>, vector<128x32xf32>, vector<1x128xf32> -> vector<1x128xf32>
    %c0_16 = arith.constant 0 : index
    %c0_17 = arith.constant 0 : index
    %146 = vector.load %arg4[%c0_16, %c0_17] : memref<1x128xbf16, #tpu.memory_space<vmem>>, vector<1x128xbf16>
    %cst_18 = arith.constant dense<0.000000e+00> : vector<1x128xf32>
    %147 = tpu.matmul %146, %129, %cst_18 {dimension_numbers = #tpu.dot_dimension_numbers<[1], [1], [0], [0], [0, 0, 1, 0], [], []>} : vector<1x128xbf16>, vector<128x128xbf16>, vector<1x128xf32> -> vector<1x128xf32>
    %148 = arith.addf %145, %147 : vector<1x128xf32>
    %c0_19 = arith.constant 0 : index
    %c0_20 = arith.constant 0 : index
    %149 = vector.load %arg8[%c0_19, %c0_20] : memref<1x1xf32, #tpu.memory_space<vmem>>, vector<1x1xf32>
    %150 = vector.broadcast %149 : vector<1x1xf32> to vector<1x128xf32>
    %151 = arith.addf %148, %150 : vector<1x128xf32>
    %152 = arith.negf %151 : vector<1x128xf32>
    %153 = math.exp %152 : vector<1x128xf32>
    %cst_21 = arith.constant 1.000000e+00 : f32
    %154 = vector.broadcast %cst_21 : f32 to vector<1x128xf32>
    %155 = arith.addf %154, %153 : vector<1x128xf32>
    %156 = arith.divf %154, %155 : vector<1x128xf32>
    %c0_22 = arith.constant 0 : index
    %c0_23 = arith.constant 0 : index
    %c0_24 = arith.constant 0 : index
    %157 = vector.load %arg9[%c0_22, %c0_23, %c0_24] : memref<1x1x128xf32, #tpu.memory_space<vmem>>, vector<1x1x128xf32>
    %158 = vector.shape_cast %157 : vector<1x1x128xf32> to vector<1x128xf32>
    %159 = vector.shape_cast %156 : vector<1x128xf32> to vector<1x1x128xf32>
    tpu.vector_store %arg9[%c0_22, %c0_23, %c0_24], %159 {strides = array<i32>} : memref<1x1x128xf32, #tpu.memory_space<vmem>>, vector<1x1x128xf32>,
    return
  }
  func.func @transform_0(%arg0: i32) -> (i32, i32) {
    %c0_i32 = arith.constant 0 : i32
    %c0_i32_0 = arith.constant 0 : i32
    return %arg0, %c0_i32 : i32, i32
  }
  func.func @transform_1(%arg0: i32) -> (i32, i32) {
    %c0_i32 = arith.constant 0 : i32
    %c0_i32_0 = arith.constant 0 : i32
    %c0_i32_1 = arith.constant 0 : i32
    return %c0_i32, %c0_i32_0 : i32, i32
  }
  func.func @transform_2(%arg0: i32) -> (i32, i32) {
    %c0_i32 = arith.constant 0 : i32
    %c0_i32_0 = arith.constant 0 : i32
    %c0_i32_1 = arith.constant 0 : i32
    return %c0_i32, %c0_i32_0 : i32, i32
  }
  func.func @transform_3(%arg0: i32) -> (i32, i32) {
    %c0_i32 = arith.constant 0 : i32
    %c0_i32_0 = arith.constant 0 : i32
    %c0_i32_1 = arith.constant 0 : i32
    return %c0_i32, %c0_i32_0 : i32, i32
  }
  func.func @transform_4(%arg0: i32) -> (i32, i32) {
    %c0_i32 = arith.constant 0 : i32
    %c0_i32_0 = arith.constant 0 : i32
    %c0_i32_1 = arith.constant 0 : i32
    return %c0_i32, %c0_i32_0 : i32, i32
  }
  func.func @transform_5(%arg0: i32) -> (i32, i32) {
    %c0_i32 = arith.constant 0 : i32
    %c0_i32_0 = arith.constant 0 : i32
    %c0_i32_1 = arith.constant 0 : i32
    return %c0_i32, %c0_i32_0 : i32, i32
  }
  func.func @transform_6(%arg0: i32) -> (i32, i32) {
    %c0_i32 = arith.constant 0 : i32
    %c0_i32_0 = arith.constant 0 : i32
    %c0_i32_1 = arith.constant 0 : i32
    return %c0_i32, %c0_i32_0 : i32, i32
  }
  func.func @transform_7(%arg0: i32) -> (i32, i32) {
    %c0_i32 = arith.constant 0 : i32
    %c0_i32_0 = arith.constant 0 : i32
    %c0_i32_1 = arith.constant 0 : i32
    return %c0_i32, %c0_i32_0 : i32, i32
  }
  func.func @transform_8(%arg0: i32) -> (i32, i32, i32) {
    %c0_i32 = arith.constant 0 : i32
    %c0_i32_0 = arith.constant 0 : i32
    %c0_i32_1 = arith.constant 0 : i32
    return %arg0, %c0_i32, %c0_i32_0 : i32, i32, i32
  }
}

</mosaic_0001>

<bundles_post_ra>
// kernel: _lambda_.1
= control target key start
LH: loop header
LB: loop body
LE: loop exit
PB: predicated region body
PF: predicated region fallthrough
CT: control target
= control target key end

     0   :  { %v6418_v0 = vmov 0   ;;  %v3769_v17 = vmov 1   ;;  %v3770_v18 = vmov 2   ;;  %v3771_v19 = vmov 3   ;;  %s6409_s0 = inlined_call_operand.vmem [shape: s32[128,21], index: 0, kind: input, shape index: {}]   ;;  %s6410_s1 = inlined_call_operand.vmem [shape: bf16[128,64], index: 1, kind: input, shape index: {}]   ;;  %s6411_s4 = inlined_call_operand.vmem [shape: f32[64,32], index: 4, kind: input, shape index: {}]   ;;  %s6412_s2 = inlined_call_operand.vmem [shape: f32[1,64], index: 2, kind: input, shape index: {}]   ;;  %s6413_s3 = inlined_call_operand.vmem [shape: bf16[1,128], index: 3, kind: input, shape index: {}]   ;;  %s6414_s7 = inlined_call_operand.<no memory space> [shape: f32[1,1], index: 7, kind: input, shape index: {}]   ;;  %s6415_s5 = inlined_call_operand.vmem [shape: f32[1,32], index: 5, kind: input, shape index: {}]   ;;  %s6416_s6 = inlined_call_operand.vmem [shape: f32[1,32], index: 6, kind: input, shape index: {}]   ;;  %s6417_s8 = inlined_call_operand.vmem [shape: f32[1,1,128], index: 8, kind: output, shape index: {}]  }
   0x1   :  { %3602 = vset.pattern.permute.xlu1 %v6418_v0  ;;  %3601 = vset.pattern.permute.xlu0 %v6418_v0  ;;  %v3841_v1 = vld [vmem:[%s6409_s0 + $0x10] sm:$0xff]  ;;  %v3846_v2 = vld [vmem:[%s6409_s0] sm:$0xff]  ;;  %v3853_v3 = vld [vmem:[%s6409_s0 + $0x18] sm:$0xff]  ;;  %v3772_v23 = vmov 4   ;;  %v3773_v38 = vmov 5   ;;  %v3774_v55 = vmov 6  }
   0x2   :  { %57 = vperm.xlu1 %3602, %v3841_v1   ;;  %51 = vperm.xlu0 %3601, %v3846_v2   ;;  %v3858_v4 = vld [vmem:[%s6409_s0 + $0x8] sm:$0xff]  ;;  %v3870_v6 = vld [vmem:[%s6409_s0 + $0x20] sm:$0xff]  ;;  %v3877_v7 = vld [vmem:[%s6409_s0 + $0x38] sm:$0xff]  ;;  %v3775_v0 = vmov 7  }
   0x3   :  { %v3865_v5 = vld [vmem:[%s6409_s0 + $0x28] sm:$0xff]  ;;  %v3882_v8 = vld [vmem:[%s6409_s0 + $0x30] sm:$0xff]  ;;  %v3894_v10 = vld [vmem:[%s6409_s0 + $0x40] sm:$0xff] }
   0x4   :  { %v3889_v9 = vld [vmem:[%s6409_s0 + $0x48] sm:$0xff]  ;;  %v3901_v11 = vld [vmem:[%s6409_s0 + $0x58] sm:$0xff]  ;;  %v3906_v12 = vld [vmem:[%s6409_s0 + $0x50] sm:$0xff] }
   0x5   :  { %v3913_v13 = vld [vmem:[%s6409_s0 + $0x68] sm:$0xff]  ;;  %v3918_v14 = vld [vmem:[%s6409_s0 + $0x60] sm:$0xff]  ;;  %v3925_v15 = vld [vmem:[%s6409_s0 + $0x78] sm:$0xff] }
   0x6   :  { %60 = vperm.xlu1 %3602, %v3853_v3   ;;  %54 = vperm.xlu0 %3601, %v3858_v4   ;;  %v3930_v16 = vld [vmem:[%s6409_s0 + $0x70] sm:$0xff] }
   0xa   :  { %66 = vperm.xlu1 %3602, %v3865_v5   ;;  %63 = vperm.xlu0 %3601, %v3870_v6  }
   0xe   :  { %72 = vperm.xlu1 %3602, %v3877_v7   ;;  %69 = vperm.xlu0 %3601, %v3882_v8  }
  0x12   :  { %78 = vperm.xlu1 %3602, %v3889_v9   ;;  %75 = vperm.xlu0 %3601, %v3894_v10  }
  0x16   :  { %84 = vperm.xlu1 %3602, %v3901_v11   ;;  %81 = vperm.xlu0 %3601, %v3906_v12  }
  0x1a   :  { %90 = vperm.xlu1 %3602, %v3913_v13   ;;  %87 = vperm.xlu0 %3601, %v3918_v14  }
  0x1e   :  { %96 = vperm.xlu1 %3602, %v3925_v15   ;;  %93 = vperm.xlu0 %3601, %v3930_v16  }
  0x22   :  { %3604 = vset.pattern.permute.xlu1 %v3769_v17  ;;  %3603 = vset.pattern.permute.xlu0 %v3769_v17 }
  0x23   :  { %166 = vperm.xlu1 %3604, %v3858_v4   ;;  %163 = vperm.xlu0 %3603, %v3846_v2  }
  0x27   :  { %169 = vperm.xlu1 %3604, %v3841_v1   ;;  %172 = vperm.xlu0 %3603, %v3853_v3  }
  0x2b   :  { %175 = vperm.xlu1 %3604, %v3870_v6   ;;  %178 = vperm.xlu0 %3603, %v3865_v5  }
  0x2f   :  { %181 = vperm.xlu1 %3604, %v3882_v8   ;;  %184 = vperm.xlu0 %3603, %v3877_v7  }
  0x33   :  { %187 = vperm.xlu1 %3604, %v3894_v10   ;;  %190 = vperm.xlu0 %3603, %v3889_v9  }
  0x37   :  { %193 = vperm.xlu1 %3604, %v3906_v12   ;;  %196 = vperm.xlu0 %3603, %v3901_v11  }
  0x3b   :  { %199 = vperm.xlu1 %3604, %v3918_v14   ;;  %202 = vperm.xlu0 %3603, %v3913_v13  }
  0x3f   :  { %205 = vperm.xlu1 %3604, %v3930_v16   ;;  %208 = vperm.xlu0 %3603, %v3925_v15  }
  0x43   :  { %3605 = vset.pattern.permute.xlu1 %v3770_v18  ;;  %3606 = vset.pattern.permute.xlu0 %v3770_v18 }
  0x44   :  { %275 = vperm.xlu1 %3605, %v3846_v2   ;;  %278 = vperm.xlu0 %3606, %v3858_v4  }
  0x48   :  { %281 = vperm.xlu1 %3605, %v3841_v1   ;;  %287 = vperm.xlu0 %3606, %v3870_v6  }
  0x4c   :  { %284 = vperm.xlu1 %3605, %v3853_v3   ;;  %293 = vperm.xlu0 %3606, %v3882_v8  }
  0x50   :  { %290 = vperm.xlu1 %3605, %v3865_v5   ;;  %299 = vperm.xlu0 %3606, %v3894_v10  }
  0x54   :  { %296 = vperm.xlu1 %3605, %v3877_v7   ;;  %305 = vperm.xlu0 %3606, %v3906_v12  }
  0x58   :  { %302 = vperm.xlu1 %3605, %v3889_v9   ;;  %311 = vperm.xlu0 %3606, %v3918_v14  }
  0x5c   :  { %308 = vperm.xlu1 %3605, %v3901_v11   ;;  %317 = vperm.xlu0 %3606, %v3930_v16  }
  0x60   :  { %314 = vperm.xlu1 %3605, %v3913_v13   ;;  %3607 = vset.pattern.permute.xlu0 %v3771_v19 }
  0x61   :  { %387 = vperm.xlu0 %3607, %v3846_v2  }
  0x64   :  { %320 = vperm.xlu1 %3605, %v3925_v15  }
  0x65   :  { %396 = vperm.xlu0 %3607, %v3853_v3  }
  0x68   :  { %3608 = vset.pattern.permute.xlu1 %v3771_v19 }
  0x69   :  { %390 = vperm.xlu1 %3608, %v3858_v4   ;;  %402 = vperm.xlu0 %3607, %v3865_v5  }
  0x6d   :  { %393 = vperm.xlu1 %3608, %v3841_v1   ;;  %408 = vperm.xlu0 %3607, %v3877_v7  }
  0x71   :  { %399 = vperm.xlu1 %3608, %v3870_v6   ;;  %414 = vperm.xlu0 %3607, %v3889_v9  }
  0x75   :  { %405 = vperm.xlu1 %3608, %v3882_v8   ;;  %420 = vperm.xlu0 %3607, %v3901_v11  }
  0x79   :  { %411 = vperm.xlu1 %3608, %v3894_v10   ;;  %426 = vperm.xlu0 %3607, %v3913_v13  }
  0x7d   :  { %v3978_v20 = vpop.permute.xlu1 %57  ;;  %417 = vperm.xlu1 %3608, %v3906_v12   ;;  %432 = vperm.xlu0 %3607, %v3925_v15   ;;  %v3982_v21 = vpop.permute.xlu0 %51 }
  0x81   :  { %v3984_v22 = vpop.permute.xlu1 %60  ;;  %423 = vperm.xlu1 %3608, %v3918_v14   ;;  %3610 = vset.pattern.permute.xlu0 %v3772_v23  ;;  %v3987_v24 = vpop.permute.xlu0 %54 }
  0x82   :  { %6493 = vst [vmem:[#allocation3_spill] sm:$0xff] %v3984_v22  ;;  %502 = vperm.xlu0 %3610, %v3858_v4   ;;  %v6470_v22 = vmov 17  }
  0x85   :  { %v3990_v25 = vpop.permute.xlu1 %66  ;;  %429 = vperm.xlu1 %3608, %v3930_v16   ;;  %v3993_v26 = vpop.permute.xlu0 %63 }
  0x86   :  { %6494 = vst [vmem:[#allocation4_spill] sm:$0xff] %v3993_v26  ;;  %511 = vperm.xlu0 %3610, %v3870_v6  }
  0x89   :  { %v3996_v27 = vpop.permute.xlu1 %72  ;;  %3609 = vset.pattern.permute.xlu1 %v3772_v23  ;;  %v3998_v28 = vpop.permute.xlu0 %69 }
  0x8a   :  { %6495 = vst [vmem:[#allocation5_spill] sm:$0xff] %v3998_v28  ;;  %499 = vperm.xlu1 %3609, %v3846_v2   ;;  %517 = vperm.xlu0 %3610, %v3882_v8  }
  0x8d   :  { %v4002_v29 = vpop.permute.xlu1 %78  ;;  %v4004_v30 = vpop.permute.xlu0 %75 }
  0x8e   :  { %6496 = vst [vmem:[#allocation6_spill] sm:$0xff] %v4002_v29  ;;  %6497 = vst [vmem:[#allocation7_spill] sm:$0xff] %v4004_v30  ;;  %505 = vperm.xlu1 %3609, %v3841_v1   ;;  %523 = vperm.xlu0 %3610, %v3894_v10  }
  0x91   :  { %v4008_v31 = vpop.permute.xlu1 %84  ;;  %v4010_v32 = vpop.permute.xlu0 %81 }
  0x92   :  { %6498 = vst [vmem:[#allocation8_spill] sm:$0xff] %v4008_v31  ;;  %6499 = vst [vmem:[#allocation9_spill] sm:$0xff] %v4010_v32  ;;  %508 = vperm.xlu1 %3609, %v3853_v3   ;;  %529 = vperm.xlu0 %3610, %v3906_v12  }
  0x95   :  { %v4014_v33 = vpop.permute.xlu1 %90  ;;  %v4016_v34 = vpop.permute.xlu0 %87 }
  0x96   :  { %6500 = vst [vmem:[#allocation10_spill] sm:$0xff] %v4014_v33  ;;  %6501 = vst [vmem:[#allocation11_spill] sm:$0xff] %v4016_v34  ;;  %514 = vperm.xlu1 %3609, %v3865_v5   ;;  %535 = vperm.xlu0 %3610, %v3918_v14   ;;  %v6430_v34 = vmov 8  }
  0x99   :  { %v4020_v35 = vpop.permute.xlu1 %96  ;;  %v4022_v36 = vpop.permute.xlu0 %93 }
  0x9a   :  { %6502 = vst [vmem:[#allocation12_spill] sm:$0xff] %v4020_v35  ;;  %6503 = vst [vmem:[#allocation13_spill] sm:$0xff] %v4022_v36  ;;  %520 = vperm.xlu1 %3609, %v3877_v7   ;;  %541 = vperm.xlu0 %3610, %v3930_v16   ;;  %v6428_v35 = vmov 10  }
  0x9e   :  { %v4026_v37 = vpop.permute.xlu1 %166  ;;  %526 = vperm.xlu1 %3609, %v3889_v9   ;;  %3611 = vset.pattern.permute.xlu0 %v3773_v38  ;;  %v4029_v39 = vpop.permute.xlu0 %163 }
  0x9f   :  { %611 = vperm.xlu0 %3611, %v3846_v2  }
  0xa2   :  { %v4032_v40 = vpop.permute.xlu1 %169  ;;  %532 = vperm.xlu1 %3609, %v3901_v11   ;;  %v4035_v41 = vpop.permute.xlu0 %172 }
  0xa3   :  { %6504 = vst [vmem:[#allocation14_spill] sm:$0xff] %v4035_v41  ;;  %620 = vperm.xlu0 %3611, %v3853_v3  }
  0xa6   :  { %v4038_v42 = vpop.permute.xlu1 %175  ;;  %538 = vperm.xlu1 %3609, %v3913_v13   ;;  %v4041_v43 = vpop.permute.xlu0 %178 }
  0xa7   :  { %6505 = vst [vmem:[#allocation15_spill] sm:$0xff] %v4038_v42  ;;  %626 = vperm.xlu0 %3611, %v3865_v5  }
  0xaa   :  { %v4044_v44 = vpop.permute.xlu1 %181  ;;  %544 = vperm.xlu1 %3609, %v3925_v15   ;;  %v4047_v45 = vpop.permute.xlu0 %184 }
  0xab   :  { %6506 = vst [vmem:[#allocation16_spill] sm:$0xff] %v4044_v44  ;;  %632 = vperm.xlu0 %3611, %v3877_v7  }
  0xae   :  { %v4050_v46 = vpop.permute.xlu1 %187  ;;  %3612 = vset.pattern.permute.xlu1 %v3773_v38  ;;  %v4052_v47 = vpop.permute.xlu0 %190 }
  0xaf   :  { %6507 = vst [vmem:[#allocation17_spill] sm:$0xff] %v4050_v46  ;;  %6508 = vst [vmem:[#allocation18_spill] sm:$0xff] %v4052_v47  ;;  %614 = vperm.xlu1 %3612, %v3858_v4   ;;  %638 = vperm.xlu0 %3611, %v3889_v9  }
  0xb2   :  { %v4056_v48 = vpop.permute.xlu1 %193  ;;  %v4058_v49 = vpop.permute.xlu0 %196 }
  0xb3   :  { %6509 = vst [vmem:[#allocation19_spill] sm:$0xff] %v4056_v48  ;;  %6510 = vst [vmem:[#allocation20_spill] sm:$0xff] %v4058_v49  ;;  %617 = vperm.xlu1 %3612, %v3841_v1   ;;  %644 = vperm.xlu0 %3611, %v3901_v11  }
  0xb6   :  { %v4062_v50 = vpop.permute.xlu1 %199  ;;  %v4064_v51 = vpop.permute.xlu0 %202 }
  0xb7   :  { %6511 = vst [vmem:[#allocation21_spill] sm:$0xff] %v4062_v50  ;;  %6512 = vst [vmem:[#allocation22_spill] sm:$0xff] %v4064_v51  ;;  %623 = vperm.xlu1 %3612, %v3870_v6   ;;  %650 = vperm.xlu0 %3611, %v3913_v13  }
  0xba   :  { %v4068_v52 = vpop.permute.xlu1 %205  ;;  %v4070_v53 = vpop.permute.xlu0 %208 }
  0xbb   :  { %6513 = vst [vmem:[#allocation23_spill] sm:$0xff] %v4068_v52  ;;  %6514 = vst [vmem:[#allocation24_spill] sm:$0xff] %v4070_v53  ;;  %629 = vperm.xlu1 %3612, %v3882_v8   ;;  %656 = vperm.xlu0 %3611, %v3925_v15  }
  0xbf   :  { %635 = vperm.xlu1 %3612, %v3894_v10   ;;  %v4075_v54 = vpop.permute.xlu1 %275  ;;  %3614 = vset.pattern.permute.xlu0 %v3774_v55  ;;  %v4077_v56 = vpop.permute.xlu0 %278 }
  0xc0   :  { %6515 = vst [vmem:[#allocation25_spill] sm:$0xff] %v4075_v54  ;;  %6516 = vst [vmem:[#allocation26_spill] sm:$0xff] %v4077_v56  ;;  %726 = vperm.xlu0 %3614, %v3858_v4  }
  0xc3   :  { %641 = vperm.xlu1 %3612, %v3906_v12   ;;  %v4081_v57 = vpop.permute.xlu1 %281  ;;  %v4083_v58 = vpop.permute.xlu0 %287 }
  0xc4   :  { %6517 = vst [vmem:[#allocation27_spill] sm:$0xff] %v4083_v58  ;;  %735 = vperm.xlu0 %3614, %v3870_v6  }
  0xc7   :  { %647 = vperm.xlu1 %3612, %v3918_v14   ;;  %v4087_v59 = vpop.permute.xlu1 %284  ;;  %v4089_v60 = vpop.permute.xlu0 %293 }
  0xc8   :  { %6518 = vst [vmem:[#allocation28_spill] sm:$0xff] %v4087_v59  ;;  %6519 = vst [vmem:[#allocation29_spill] sm:$0xff] %v4089_v60  ;;  %741 = vperm.xlu0 %3614, %v3882_v8  }
  0xcb   :  { %653 = vperm.xlu1 %3612, %v3930_v16   ;;  %v4093_v61 = vpop.permute.xlu1 %290  ;;  %v4095_v62 = vpop.permute.xlu0 %299 }
  0xcc   :  { %6520 = vst [vmem:[#allocation30_spill] sm:$0xff] %v4095_v62  ;;  %747 = vperm.xlu0 %3614, %v3894_v10   ;;  %v6462_v62 = vmov 16  }
  0xcf   :  { %3613 = vset.pattern.permute.xlu1 %v3774_v55  ;;  %v4098_v63 = vpop.permute.xlu1 %296  ;;  %v4100_v17 = vpop.permute.xlu0 %305 }
  0xd0   :  { %6521 = vst [vmem:[#allocation31_spill] sm:$0xff] %v4100_v17  ;;  %723 = vperm.xlu1 %3613, %v3846_v2   ;;  %753 = vperm.xlu0 %3614, %v3906_v12  }
  0xd3   :  { %v4104_v18 = vpop.permute.xlu1 %302  ;;  %v4106_v19 = vpop.permute.xlu0 %311 }
  0xd4   :  { %6522 = vst [vmem:[#allocation32_spill] sm:$0xff] %v4104_v18  ;;  %6523 = vst [vmem:[#allocation33_spill] sm:$0xff] %v4106_v19  ;;  %729 = vperm.xlu1 %3613, %v3841_v1   ;;  %759 = vperm.xlu0 %3614, %v3918_v14  }
  0xd7   :  { %v4110_v23 = vpop.permute.xlu1 %308  ;;  %v4112_v38 = vpop.permute.xlu0 %317 }
  0xd8   :  { %6524 = vst [vmem:[#allocation34_spill] sm:$0xff] %v4110_v23  ;;  %6525 = vst [vmem:[#allocation35_spill] sm:$0xff] %v4112_v38  ;;  %732 = vperm.xlu1 %3613, %v3853_v3   ;;  %765 = vperm.xlu0 %3614, %v3930_v16  }
  0xdb   :  { %v4116_v55 = vpop.permute.xlu1 %314 }
  0xdc   :  { %6526 = vst [vmem:[#allocation36_spill] sm:$0xff] %v4116_v55  ;;  %738 = vperm.xlu1 %3613, %v3865_v5   ;;  %3615 = vset.pattern.permute.xlu0 %v3775_v0  ;;  %v4119_v18 = vpop.permute.xlu0 %387 }
  0xdd   :  { %6527 = vst [vmem:[#allocation37_spill] sm:$0xff] %v4119_v18  ;;  %835 = vperm.xlu0 %3615, %v3846_v2  }
  0xdf   :  { %v4122_v19 = vpop.permute.xlu1 %320 }
  0xe0   :  { %6528 = vst [vmem:[#allocation38_spill] sm:$0xff] %v4122_v19  ;;  %744 = vperm.xlu1 %3613, %v3877_v7   ;;  %v4125_v23 = vpop.permute.xlu0 %396 }
  0xe1   :  { %6529 = vst [vmem:[#allocation39_spill] sm:$0xff] %v4125_v23  ;;  %844 = vperm.xlu0 %3615, %v3853_v3  }
  0xe4   :  { %750 = vperm.xlu1 %3613, %v3889_v9   ;;  %v4129_v38 = vpop.permute.xlu1 %390  ;;  %v4131_v55 = vpop.permute.xlu0 %402 }
  0xe5   :  { %6530 = vst [vmem:[#allocation40_spill] sm:$0xff] %v4129_v38  ;;  %850 = vperm.xlu0 %3615, %v3865_v5  }
  0xe8   :  { %756 = vperm.xlu1 %3613, %v3901_v11   ;;  %v4135_v60 = vpop.permute.xlu1 %393  ;;  %v4137_v58 = vpop.permute.xlu0 %408 }
  0xe9   :  { %856 = vperm.xlu0 %3615, %v3877_v7  }
  0xec   :  { %762 = vperm.xlu1 %3613, %v3913_v13   ;;  %v4141_v19 = vpop.permute.xlu1 %399  ;;  %v4143_v53 = vpop.permute.xlu0 %414 }
  0xed   :  { %6531 = vst [vmem:[#allocation41_spill] sm:$0xff] %v4141_v19  ;;  %6532 = vst [vmem:[#allocation42_spill] sm:$0xff] %v4143_v53  ;;  %862 = vperm.xlu0 %3615, %v3889_v9  }
  0xf0   :  { %768 = vperm.xlu1 %3613, %v3925_v15   ;;  %v4147_v52 = vpop.permute.xlu1 %405  ;;  %v4149_v51 = vpop.permute.xlu0 %420 }
  0xf1   :  { %6533 = vst [vmem:[#allocation43_spill] sm:$0xff] %v4147_v52  ;;  %6534 = vst [vmem:[#allocation44_spill] sm:$0xff] %v4149_v51  ;;  %868 = vperm.xlu0 %3615, %v3901_v11  }
  0xf4   :  { %3616 = vset.pattern.permute.xlu1 %v3775_v0  ;;  %v4152_v50 = vpop.permute.xlu1 %411  ;;  %v4154_v49 = vpop.permute.xlu0 %426  ;;  %v6423_v0 = vmov 9  }
  0xf5   :  { %6535 = vst [vmem:[#allocation45_spill] sm:$0xff] %v4152_v50  ;;  %6536 = vst [vmem:[#allocation46_spill] sm:$0xff] %v4154_v49  ;;  %838 = vperm.xlu1 %3616, %v3858_v4   ;;  %874 = vperm.xlu0 %3615, %v3913_v13  }
  0xf8   :  { %v4158_v53 = vpop.permute.xlu1 %417  ;;  %v4160_v19 = vpop.permute.xlu0 %432 }
  0xf9   :  { %6537 = vst [vmem:[#allocation47_spill] sm:$0xff] %v4158_v53  ;;  %6538 = vst [vmem:[#allocation48_spill] sm:$0xff] %v4160_v19  ;;  %841 = vperm.xlu1 %3616, %v3841_v1   ;;  %880 = vperm.xlu0 %3615, %v3925_v15  }
  0xfc   :  { %v4164_v51 = vpop.permute.xlu1 %423 }
  0xfd   :  { %6539 = vst [vmem:[#allocation49_spill] sm:$0xff] %v4164_v51  ;;  %847 = vperm.xlu1 %3616, %v3870_v6   ;;  %3618 = vset.pattern.permute.xlu0 %v6423_v0  ;;  %v4168_v49 = vpop.permute.xlu0 %502 }
  0xfe   :  { %6540 = vst [vmem:[#allocation50_spill] sm:$0xff] %v4168_v49  ;;  %1059 = vperm.xlu0 %3618, %v3846_v2  }
 0x100   :  { %v4171_v13 = vpop.permute.xlu1 %429 }
 0x101   :  { %6541 = vst [vmem:[#allocation51_spill] sm:$0xff] %v4171_v13  ;;  %853 = vperm.xlu1 %3616, %v3882_v8   ;;  %v4174_v19 = vpop.permute.xlu0 %511 }
 0x102   :  { %6542 = vst [vmem:[#allocation52_spill] sm:$0xff] %v4174_v19  ;;  %1068 = vperm.xlu0 %3618, %v3853_v3  }
 0x105   :  { %859 = vperm.xlu1 %3616, %v3894_v10   ;;  %v4178_v51 = vpop.permute.xlu1 %499  ;;  %v4180_v52 = vpop.permute.xlu0 %517 }
 0x106   :  { %6543 = vst [vmem:[#allocation53_spill] sm:$0xff] %v4178_v51  ;;  %6544 = vst [vmem:[#allocation54_spill] sm:$0xff] %v4180_v52  ;;  %1071 = vperm.xlu0 %3618, %v3870_v6  }
 0x109   :  { %865 = vperm.xlu1 %3616, %v3906_v12   ;;  %v4184_v0 = vpop.permute.xlu1 %505  ;;  %v4186_v36 = vpop.permute.xlu0 %523 }
 0x10a   :  { %6545 = vst [vmem:[#allocation55_spill] sm:$0xff] %v4186_v36  ;;  %1083 = vperm.xlu0 %3618, %v3894_v10  }
 0x10d   :  { %871 = vperm.xlu1 %3616, %v3918_v14   ;;  %v4190_v19 = vpop.permute.xlu1 %508  ;;  %v4192_v13 = vpop.permute.xlu0 %529 }
 0x10e   :  { %6546 = vst [vmem:[#allocation56_spill] sm:$0xff] %v4190_v19  ;;  %6547 = vst [vmem:[#allocation57_spill] sm:$0xff] %v4192_v13  ;;  %1089 = vperm.xlu0 %3618, %v3906_v12  }
 0x111   :  { %877 = vperm.xlu1 %3616, %v3930_v16   ;;  %v4196_v52 = vpop.permute.xlu1 %514  ;;  %v4198_v47 = vpop.permute.xlu0 %535 }
 0x112   :  { %6548 = vst [vmem:[#allocation58_spill] sm:$0xff] %v4198_v47  ;;  %3646 = vset.pattern.permute.xlu0 %v6428_v35 }
 0x113   :  { %1174 = vperm.xlu0 %3646, %v3858_v4  }
 0x115   :  { %3617 = vset.pattern.permute.xlu1 %v6430_v34  ;;  %v4203_v44 = vpop.permute.xlu1 %520  ;;  %v4205_v33 = vpop.permute.xlu0 %541 }
 0x116   :  { %6549 = vst [vmem:[#allocation59_spill] sm:$0xff] %v4205_v33  ;;  %947 = vperm.xlu1 %3617, %v3846_v2  }
 0x117   :  { %1183 = vperm.xlu0 %3646, %v3870_v6  }
 0x119   :  { %v4209_v16 = vpop.permute.xlu1 %526 }
 0x11a   :  { %6550 = vst [vmem:[#allocation60_spill] sm:$0xff] %v4209_v16  ;;  %953 = vperm.xlu1 %3617, %v3841_v1   ;;  %v4212_v47 = vpop.permute.xlu0 %611  ;;  %v6435_v16 = vmov 11  }
 0x11b   :  { %6551 = vst [vmem:[#allocation61_spill] sm:$0xff] %v4212_v47  ;;  %1195 = vperm.xlu0 %3646, %v3894_v10  }
 0x11d   :  { %v4215_v35 = vpop.permute.xlu1 %532 }
 0x11e   :  { %6552 = vst [vmem:[#allocation62_spill] sm:$0xff] %v4215_v35  ;;  %956 = vperm.xlu1 %3617, %v3853_v3   ;;  %v4218_v34 = vpop.permute.xlu0 %620  ;;  %v6556_v35 = vmov 9  }
 0x11f   :  { %6553 = vst [vmem:[#allocation63_spill] sm:$0xff] %v4218_v34  ;;  %1201 = vperm.xlu0 %3646, %v3906_v12  }
 0x121   :  { %v4221_v33 = vpop.permute.xlu1 %538 }
 0x122   :  { %6554 = vst [vmem:[#allocation64_spill] sm:$0xff] %v4221_v33  ;;  %962 = vperm.xlu1 %3617, %v3865_v5   ;;  %v4224_v31 = vpop.permute.xlu0 %626 }
 0x123   :  { %3653 = vset.pattern.permute.xlu0 %v6435_v16 }
 0x124   :  { %1283 = vperm.xlu0 %3653, %v3846_v2  }
 0x125   :  { %v4228_v42 = vpop.permute.xlu1 %544 }
 0x126   :  { %6555 = vst [vmem:[#allocation65_spill] sm:$0xff] %v4228_v42  ;;  %3619 = vset.pattern.permute.xlu1 %v6556_v35  ;;  %v4231_v29 = vpop.permute.xlu0 %632  ;;  %v6560_v42 = vmov 10  }
 0x127   :  { %1062 = vperm.xlu1 %3619, %v3858_v4  }
 0x128   :  { %1292 = vperm.xlu0 %3653, %v3853_v3  }
 0x12a   :  { %v4235_v33 = vpop.permute.xlu1 %614  ;;  %v4237_v28 = vpop.permute.xlu0 %638 }
 0x12b   :  { %6557 = vst [vmem:[#allocation66_spill] sm:$0xff] %v4235_v33  ;;  %6558 = vst [vmem:[#allocation67_spill] sm:$0xff] %v4237_v28  ;;  %1065 = vperm.xlu1 %3619, %v3841_v1  }
 0x12c   :  { %1295 = vperm.xlu0 %3653, %v3870_v6  }
 0x12e   :  { %v4241_v16 = vpop.permute.xlu1 %617  ;;  %v4243_v26 = vpop.permute.xlu0 %644 }
 0x12f   :  { %6559 = vst [vmem:[#allocation68_spill] sm:$0xff] %v4243_v26  ;;  %3620 = vset.pattern.permute.xlu1 %v6560_v42  ;;  %v6445_v26 = vmov 12  }
 0x130   :  { %1171 = vperm.xlu1 %3620, %v3846_v2   ;;  %1307 = vperm.xlu0 %3653, %v3894_v10  }
 0x132   :  { %v4248_v34 = vpop.permute.xlu1 %623  ;;  %v4250_v13 = vpop.permute.xlu0 %650 }
 0x133   :  { %6561 = vst [vmem:[#allocation69_spill] sm:$0xff] %v4248_v34  ;;  %6562 = vst [vmem:[#allocation70_spill] sm:$0xff] %v4250_v13  ;;  %v6567_v13 = vmov 11  }
 0x134   :  { %1177 = vperm.xlu1 %3620, %v3841_v1   ;;  %1313 = vperm.xlu0 %3653, %v3906_v12  }
 0x136   :  { %v4254_v28 = vpop.permute.xlu1 %629  ;;  %v4256_v47 = vpop.permute.xlu0 %656 }
 0x137   :  { %6563 = vst [vmem:[#allocation71_spill] sm:$0xff] %v4254_v28  ;;  %6564 = vst [vmem:[#allocation72_spill] sm:$0xff] %v4256_v47 }
 0x138   :  { %1180 = vperm.xlu1 %3620, %v3853_v3   ;;  %3660 = vset.pattern.permute.xlu0 %v6445_v26 }
 0x139   :  { %1398 = vperm.xlu0 %3660, %v3858_v4  }
 0x13a   :  { %v4261_v19 = vpop.permute.xlu1 %635 }
 0x13b   :  { %6565 = vst [vmem:[#allocation73_spill] sm:$0xff] %v4261_v19  ;;  %v4263_v34 = vpop.permute.xlu0 %726  ;;  %v6572_v19 = vmov 12  }
 0x13c   :  { %6566 = vst [vmem:[#allocation74_spill] sm:$0xff] %v4263_v34  ;;  %3621 = vset.pattern.permute.xlu1 %v6567_v13 }
 0x13d   :  { %1286 = vperm.xlu1 %3621, %v3858_v4   ;;  %1401 = vperm.xlu0 %3660, %v3841_v1  }
 0x13e   :  { %v4268_v28 = vpop.permute.xlu1 %641 }
 0x13f   :  { %6568 = vst [vmem:[#allocation75_spill] sm:$0xff] %v4268_v28  ;;  %v4270_v47 = vpop.permute.xlu0 %735 }
 0x140   :  { %6569 = vst [vmem:[#allocation76_spill] sm:$0xff] %v4270_v47  ;;  %v6575_v47 = vmov 8  }
 0x141   :  { %1289 = vperm.xlu1 %3621, %v3841_v1   ;;  %1410 = vperm.xlu0 %3660, %v3865_v5  }
 0x142   :  { %v4274_v26 = vpop.permute.xlu1 %647 }
 0x143   :  { %6570 = vst [vmem:[#allocation77_spill] sm:$0xff] %v4274_v26  ;;  %v4276_v33 = vpop.permute.xlu0 %741 }
 0x144   :  { %6571 = vst [vmem:[#allocation78_spill] sm:$0xff] %v4276_v33 }
 0x145   :  { %3622 = vset.pattern.permute.xlu1 %v6572_v19  ;;  %1416 = vperm.xlu0 %3660, %v3877_v7  }
 0x146   :  { %1395 = vperm.xlu1 %3622, %v3846_v2   ;;  %v4281_v34 = vpop.permute.xlu1 %653 }
 0x147   :  { %6573 = vst [vmem:[#allocation79_spill] sm:$0xff] %v4281_v34  ;;  %v4283_v36 = vpop.permute.xlu0 %747 }
 0x148   :  { %6574 = vst [vmem:[#allocation80_spill] sm:$0xff] %v4283_v36 }
 0x149   :  { %1422 = vperm.xlu0 %3660, %v3889_v9  }
 0x14a   :  { %3623 = vset.pattern.permute.xlu1 %v6575_v47 }
 0x14b   :  { %965 = vperm.xlu1 %3623, %v3882_v8   ;;  %v4288_v28 = vpop.permute.xlu1 %723  ;;  %v4290_v26 = vpop.permute.xlu0 %753 }
 0x14c   :  { %6576 = vst [vmem:[#allocation81_spill] sm:$0xff] %v4288_v28  ;;  %6577 = vst [vmem:[#allocation82_spill] sm:$0xff] %v4290_v26 }
 0x14d   :  { %3666 = vset.pattern.permute.xlu0 %v6575_v47 }
 0x14e   :  { %950 = vperm.xlu0 %3666, %v3858_v4  }
 0x14f   :  { %968 = vperm.xlu1 %3623, %v3877_v7   ;;  %v4295_v33 = vpop.permute.xlu1 %729  ;;  %v4297_v34 = vpop.permute.xlu0 %759 }
 0x150   :  { %6578 = vst [vmem:[#allocation83_spill] sm:$0xff] %v4297_v34 }
 0x152   :  { %959 = vperm.xlu0 %3666, %v3870_v6  }
 0x153   :  { %3624 = vset.pattern.permute.xlu1 %v6572_v19  ;;  %v4301_v36 = vpop.permute.xlu1 %732  ;;  %v4303_v51 = vpop.permute.xlu0 %765 }
 0x154   :  { %6579 = vst [vmem:[#allocation84_spill] sm:$0xff] %v4301_v36  ;;  %6580 = vst [vmem:[#allocation85_spill] sm:$0xff] %v4303_v51  ;;  %1404 = vperm.xlu1 %3624, %v3853_v3   ;;  %v6451_v36 = vmov 13  }
 0x156   :  { %971 = vperm.xlu0 %3666, %v3894_v10  }
 0x157   :  { %v4307_v26 = vpop.permute.xlu1 %738 }
 0x158   :  { %3625 = vset.pattern.permute.xlu1 %v6556_v35  ;;  %v4310_v28 = vpop.permute.xlu0 %835 }
 0x159   :  { %6581 = vst [vmem:[#allocation86_spill] sm:$0xff] %v4310_v28  ;;  %1074 = vperm.xlu1 %3625, %v3865_v5  }
 0x15a   :  { %977 = vperm.xlu0 %3666, %v3906_v12  }
 0x15b   :  { %v4314_v34 = vpop.permute.xlu1 %744 }
 0x15c   :  { %v4316_v49 = vpop.permute.xlu0 %844 }
 0x15d   :  { %6582 = vst [vmem:[#allocation87_spill] sm:$0xff] %v4316_v49  ;;  %3626 = vset.pattern.permute.xlu1 %v6451_v36 }
 0x15e   :  { %1507 = vperm.xlu1 %3626, %v3846_v2   ;;  %983 = vperm.xlu0 %3666, %v3918_v14  }
 0x15f   :  { %v4321_v51 = vpop.permute.xlu1 %750 }
 0x160   :  { %6583 = vst [vmem:[#allocation88_spill] sm:$0xff] %v4321_v51  ;;  %v4323_v53 = vpop.permute.xlu0 %850 }
 0x162   :  { %3627 = vset.pattern.permute.xlu1 %v6556_v35  ;;  %992 = vperm.xlu0 %3666, %v3925_v15  }
 0x163   :  { %1077 = vperm.xlu1 %3627, %v3882_v8   ;;  %v4328_v28 = vpop.permute.xlu1 %756 }
 0x164   :  { %6584 = vst [vmem:[#allocation89_spill] sm:$0xff] %v4328_v28  ;;  %v4330_v49 = vpop.permute.xlu0 %856 }
 0x166   :  { %3670 = vset.pattern.permute.xlu0 %v6451_v36 }
 0x167   :  { %1080 = vperm.xlu1 %3627, %v3877_v7   ;;  %v4334_v50 = vpop.permute.xlu1 %762  ;;  %1510 = vperm.xlu0 %3670, %v3858_v4  }
 0x168   :  { %6585 = vst [vmem:[#allocation90_spill] sm:$0xff] %v4334_v50  ;;  %v4337_v51 = vpop.permute.xlu0 %862 }
 0x169   :  { %6586 = vst [vmem:[#allocation91_spill] sm:$0xff] %v4337_v51  ;;  %v6453_v51 = vmov 14  }
 0x16b   :  { %3628 = vset.pattern.permute.xlu1 %v6451_v36  ;;  %v4340_v38 = vpop.permute.xlu1 %768  ;;  %1513 = vperm.xlu0 %3670, %v3841_v1  }
 0x16c   :  { %6587 = vst [vmem:[#allocation92_spill] sm:$0xff] %v4340_v38  ;;  %1516 = vperm.xlu1 %3628, %v3853_v3   ;;  %v4344_v28 = vpop.permute.xlu0 %868 }
 0x16d   :  { %6588 = vst [vmem:[#allocation93_spill] sm:$0xff] %v4344_v28 }
 0x16f   :  { %1522 = vperm.xlu0 %3670, %v3865_v5  }
 0x170   :  { %3629 = vset.pattern.permute.xlu1 %v6560_v42  ;;  %v4348_v23 = vpop.permute.xlu1 %838  ;;  %v4350_v50 = vpop.permute.xlu0 %874 }
 0x171   :  { %6589 = vst [vmem:[#allocation94_spill] sm:$0xff] %v4348_v23  ;;  %6590 = vst [vmem:[#allocation95_spill] sm:$0xff] %v4350_v50  ;;  %1186 = vperm.xlu1 %3629, %v3865_v5  }
 0x173   :  { %1528 = vperm.xlu0 %3670, %v3877_v7  }
 0x174   :  { %v4354_v36 = vpop.permute.xlu1 %841  ;;  %v4356_v38 = vpop.permute.xlu0 %880 }
 0x175   :  { %6591 = vst [vmem:[#allocation96_spill] sm:$0xff] %v4356_v38  ;;  %3630 = vset.pattern.permute.xlu1 %v6453_v51 }
 0x176   :  { %1619 = vperm.xlu1 %3630, %v3846_v2  }
 0x177   :  { %1531 = vperm.xlu0 %3670, %v3894_v10  }
 0x178   :  { %v4361_v28 = vpop.permute.xlu1 %847 }
 0x179   :  { %6592 = vst [vmem:[#allocation97_spill] sm:$0xff] %v4361_v28  ;;  %v4363_v23 = vpop.permute.xlu0 %1059  ;;  %v6598_v28 = vmov 14  }
 0x17a   :  { %6593 = vst [vmem:[#allocation98_spill] sm:$0xff] %v4363_v23  ;;  %3631 = vset.pattern.permute.xlu1 %v6560_v42 }
 0x17b   :  { %1189 = vperm.xlu1 %3631, %v3882_v8   ;;  %1537 = vperm.xlu0 %3670, %v3906_v12  }
 0x17c   :  { %v4368_v50 = vpop.permute.xlu1 %853 }
 0x17d   :  { %6594 = vst [vmem:[#allocation99_spill] sm:$0xff] %v4368_v50  ;;  %v4370_v38 = vpop.permute.xlu0 %1068 }
 0x17e   :  { %6595 = vst [vmem:[#allocation100_spill] sm:$0xff] %v4370_v38 }
 0x17f   :  { %1192 = vperm.xlu1 %3631, %v3877_v7   ;;  %1552 = vperm.xlu0 %3670, %v3925_v15  }
 0x180   :  { %v4374_v51 = vpop.permute.xlu1 %859 }
 0x181   :  { %6596 = vst [vmem:[#allocation101_spill] sm:$0xff] %v4374_v51  ;;  %v4376_v18 = vpop.permute.xlu0 %1071  ;;  %v6458_v51 = vmov 15  }
 0x182   :  { %6597 = vst [vmem:[#allocation102_spill] sm:$0xff] %v4376_v18 }
 0x183   :  { %3632 = vset.pattern.permute.xlu1 %v6598_v28  ;;  %3701 = vset.pattern.permute.xlu0 %v6598_v28 }
 0x184   :  { %1628 = vperm.xlu1 %3632, %v3853_v3   ;;  %v4381_v23 = vpop.permute.xlu1 %865  ;;  %1622 = vperm.xlu0 %3701, %v3858_v4  }
 0x185   :  { %6599 = vst [vmem:[#allocation103_spill] sm:$0xff] %v4381_v23  ;;  %v4384_v50 = vpop.permute.xlu0 %1083 }
 0x186   :  { %6600 = vst [vmem:[#allocation104_spill] sm:$0xff] %v4384_v50 }
 0x188   :  { %3633 = vset.pattern.permute.xlu1 %v6567_v13  ;;  %v4387_v38 = vpop.permute.xlu1 %871  ;;  %1625 = vperm.xlu0 %3701, %v3841_v1  }
 0x189   :  { %6601 = vst [vmem:[#allocation105_spill] sm:$0xff] %v4387_v38  ;;  %1298 = vperm.xlu1 %3633, %v3865_v5   ;;  %v4391_v15 = vpop.permute.xlu0 %1089 }
 0x18a   :  { %6602 = vst [vmem:[#allocation106_spill] sm:$0xff] %v4391_v15 }
 0x18c   :  { %v4393_v18 = vpop.permute.xlu1 %877  ;;  %1634 = vperm.xlu0 %3701, %v3865_v5  }
 0x18d   :  { %6603 = vst [vmem:[#allocation107_spill] sm:$0xff] %v4393_v18  ;;  %3634 = vset.pattern.permute.xlu1 %v6458_v51 }
 0x18e   :  { %1731 = vperm.xlu1 %3634, %v3846_v2   ;;  %v4398_v23 = vpop.permute.xlu0 %1174 }
 0x18f   :  { %6604 = vst [vmem:[#allocation108_spill] sm:$0xff] %v4398_v23 }
 0x190   :  { %1640 = vperm.xlu0 %3701, %v3877_v7  }
 0x191   :  { %v4401_v38 = vpop.permute.xlu1 %947 }
 0x192   :  { %6605 = vst [vmem:[#allocation109_spill] sm:$0xff] %v4401_v38  ;;  %3635 = vset.pattern.permute.xlu1 %v6567_v13  ;;  %v4404_v50 = vpop.permute.xlu0 %1183  ;;  %v6610_v38 = vmov 15  }
 0x193   :  { %6606 = vst [vmem:[#allocation110_spill] sm:$0xff] %v4404_v50  ;;  %1301 = vperm.xlu1 %3635, %v3882_v8  }
 0x194   :  { %1643 = vperm.xlu0 %3701, %v3894_v10  }
 0x195   :  { %v4408_v18 = vpop.permute.xlu1 %953 }
 0x196   :  { %v4410_v15 = vpop.permute.xlu0 %1195 }
 0x197   :  { %6607 = vst [vmem:[#allocation111_spill] sm:$0xff] %v4410_v15  ;;  %1304 = vperm.xlu1 %3635, %v3877_v7  }
 0x198   :  { %1649 = vperm.xlu0 %3701, %v3906_v12  }
 0x199   :  { %v4414_v51 = vpop.permute.xlu1 %956 }
 0x19a   :  { %6608 = vst [vmem:[#allocation112_spill] sm:$0xff] %v4414_v51  ;;  %v4416_v23 = vpop.permute.xlu0 %1201 }
 0x19b   :  { %6609 = vst [vmem:[#allocation113_spill] sm:$0xff] %v4416_v23  ;;  %3636 = vset.pattern.permute.xlu1 %v6610_v38 }
 0x19c   :  { %1740 = vperm.xlu1 %3636, %v3853_v3   ;;  %1655 = vperm.xlu0 %3701, %v3918_v14  }
 0x19d   :  { %v4421_v50 = vpop.permute.xlu1 %962 }
 0x19f   :  { %v4423_v17 = vpop.permute.xlu0 %1283 }
 0x1a0   :  { %6611 = vst [vmem:[#allocation114_spill] sm:$0xff] %v4423_v17  ;;  %3637 = vset.pattern.permute.xlu1 %v6575_v47  ;;  %3703 = vset.pattern.permute.xlu0 %v6610_v38 }
 0x1a1   :  { %974 = vperm.xlu1 %3637, %v3889_v9   ;;  %1734 = vperm.xlu0 %3703, %v3858_v4  }
 0x1a2   :  { %v4429_v51 = vpop.permute.xlu1 %1062 }
 0x1a3   :  { %6612 = vst [vmem:[#allocation115_spill] sm:$0xff] %v4429_v51  ;;  %v4431_v23 = vpop.permute.xlu0 %1292 }
 0x1a4   :  { %6613 = vst [vmem:[#allocation116_spill] sm:$0xff] %v4431_v23 }
 0x1a5   :  { %3638 = vset.pattern.permute.xlu1 %v6572_v19  ;;  %1737 = vperm.xlu0 %3703, %v3841_v1  }
 0x1a6   :  { %1407 = vperm.xlu1 %3638, %v3870_v6   ;;  %v4436_v15 = vpop.permute.xlu1 %1065 }
 0x1a7   :  { %v4438_v17 = vpop.permute.xlu0 %1295 }
 0x1a8   :  { %6614 = vst [vmem:[#allocation117_spill] sm:$0xff] %v4438_v17 }
 0x1a9   :  { %1746 = vperm.xlu0 %3703, %v3865_v5  }
 0x1aa   :  { %3639 = vset.pattern.permute.xlu1 %v6462_v62 }
 0x1ab   :  { %1843 = vperm.xlu1 %3639, %v3846_v2   ;;  %v4443_v51 = vpop.permute.xlu1 %1171  ;;  %v4445_v23 = vpop.permute.xlu0 %1307 }
 0x1ac   :  { %6615 = vst [vmem:[#allocation118_spill] sm:$0xff] %v4443_v51  ;;  %6616 = vst [vmem:[#allocation119_spill] sm:$0xff] %v4445_v23 }
 0x1ad   :  { %1752 = vperm.xlu0 %3703, %v3877_v7  }
 0x1af   :  { %1846 = vperm.xlu1 %3639, %v3858_v4   ;;  %v4449_v59 = vpop.permute.xlu1 %1177  ;;  %v4451_v56 = vpop.permute.xlu0 %1313 }
 0x1b0   :  { %6617 = vst [vmem:[#allocation120_spill] sm:$0xff] %v4451_v56 }
 0x1b1   :  { %1755 = vperm.xlu0 %3703, %v3894_v10  }
 0x1b3   :  { %3640 = vset.pattern.permute.xlu1 %v6575_v47  ;;  %v4455_v17 = vpop.permute.xlu1 %1180 }
 0x1b4   :  { %6618 = vst [vmem:[#allocation121_spill] sm:$0xff] %v4455_v17  ;;  %980 = vperm.xlu1 %3640, %v3901_v11   ;;  %v4458_v62 = vpop.permute.xlu0 %1398  ;;  %v6621_v17 = vmov 16  }
 0x1b5   :  { %6619 = vst [vmem:[#allocation122_spill] sm:$0xff] %v4458_v62  ;;  %1761 = vperm.xlu0 %3703, %v3906_v12  }
 0x1b8   :  { %3641 = vset.pattern.permute.xlu1 %v6572_v19  ;;  %v4462_v23 = vpop.permute.xlu1 %1286  ;;  %v4464_v51 = vpop.permute.xlu0 %1401 }
 0x1b9   :  { %6620 = vst [vmem:[#allocation123_spill] sm:$0xff] %v4462_v23  ;;  %1413 = vperm.xlu1 %3641, %v3882_v8   ;;  %1767 = vperm.xlu0 %3703, %v3918_v14  }
 0x1bc   :  { %v4468_v56 = vpop.permute.xlu1 %1289  ;;  %v4470_v54 = vpop.permute.xlu0 %1410 }
 0x1bd   :  { %3642 = vset.pattern.permute.xlu1 %v6621_v17  ;;  %3708 = vset.pattern.permute.xlu0 %v6621_v17 }
 0x1be   :  { %1849 = vperm.xlu1 %3642, %v3841_v1   ;;  %1861 = vperm.xlu0 %3708, %v3882_v8  }
 0x1c0   :  { %v4476_v62 = vpop.permute.xlu0 %1416 }
 0x1c1   :  { %v4478_v23 = vpop.permute.xlu1 %1395 }
 0x1c2   :  { %6622 = vst [vmem:[#allocation124_spill] sm:$0xff] %v4478_v23  ;;  %1852 = vperm.xlu1 %3642, %v3853_v3   ;;  %1867 = vperm.xlu0 %3708, %v3894_v10   ;;  %v6626_v23 = vmov 13  }
 0x1c4   :  { %v4482_v48 = vpop.permute.xlu0 %1422 }
 0x1c5   :  { %6623 = vst [vmem:[#allocation125_spill] sm:$0xff] %v4482_v48  ;;  %v6468_v48 = vmov 20  }
 0x1c6   :  { %3643 = vset.pattern.permute.xlu1 %v6556_v35  ;;  %v4485_v46 = vpop.permute.xlu1 %965  ;;  %1873 = vperm.xlu0 %3708, %v3906_v12  }
 0x1c7   :  { %6624 = vst [vmem:[#allocation126_spill] sm:$0xff] %v4485_v46  ;;  %1086 = vperm.xlu1 %3643, %v3889_v9  }
 0x1c9   :  { %v4489_v32 = vpop.permute.xlu0 %950 }
 0x1ca   :  { %6625 = vst [vmem:[#allocation127_spill] sm:$0xff] %v4489_v32  ;;  %v4491_v30 = vpop.permute.xlu1 %968  ;;  %1879 = vperm.xlu0 %3708, %v3918_v14  }
 0x1cb   :  { %3644 = vset.pattern.permute.xlu1 %v6626_v23 }
 0x1cc   :  { %1519 = vperm.xlu1 %3644, %v3870_v6  }
 0x1cd   :  { %v4496_v41 = vpop.permute.xlu0 %959 }
 0x1ce   :  { %6627 = vst [vmem:[#allocation128_spill] sm:$0xff] %v4496_v41  ;;  %3713 = vset.pattern.permute.xlu0 %v6468_v48 }
 0x1cf   :  { %v4499_v46 = vpop.permute.xlu1 %1404  ;;  %2291 = vperm.xlu0 %3713, %v3846_v2  }
 0x1d0   :  { %6628 = vst [vmem:[#allocation129_spill] sm:$0xff] %v4499_v46  ;;  %3645 = vset.pattern.permute.xlu1 %v6470_v22  ;;  %v6474_v22 = vlaneseq }
 0x1d1   :  { %1955 = vperm.xlu1 %3645, %v3846_v2   ;;  %v4504_v32 = vpop.permute.xlu0 %971 }
 0x1d2   :  { %v4528_v46 = vand.u32 127, %v6474_v22  ;;  %v6479_v22 = vmov 0.0  }
 0x1d3   :  { %2300 = vperm.xlu0 %3713, %v3853_v3  }
 0x1d4   :  { %v4507_v14 = vpop.permute.xlu1 %1074  ;;  %vm212_vm0 = vcmp.eq.s32.totalorder %v4528_v46, %v4032_v40  ;;  %vm100_vm1 = vcmp.eq.s32.totalorder %v4528_v46, %v3978_v20  ;;  %vm324_vm2 = vcmp.eq.s32.totalorder %v4528_v46, %v4081_v57  ;;  %vm436_vm3 = vcmp.eq.s32.totalorder %v4528_v46, %v4135_v60 }
 0x1d5   :  { %1958 = vperm.xlu1 %3645, %v3858_v4   ;;  %v4510_v6 = vpop.permute.xlu0 %977  ;;  %vm548_vm4 = vcmp.eq.s32.totalorder %v4528_v46, %v4184_v0  ;;  %v3055_v57 = vsel %vm436_vm3, 1.0, %v6479_v22  ;;  %vm660_vm5 = vcmp.eq.s32.totalorder %v4528_v46, %v4241_v16  ;;  %vm215_vm6 = vcmp.eq.s32.totalorder %v4528_v46, %v4041_v43 }
 0x1d6   :  { %6629 = vst [vmem:[#allocation130_spill] sm:$0xff] %v4510_v6  ;;  %vm772_vm7 = vcmp.eq.s32.totalorder %v4528_v46, %v4295_v33  ;;  %vm103_vm8 = vcmp.eq.s32.totalorder %v4528_v46, %v3990_v25  ;;  %vm327_vm9 = vcmp.eq.s32.totalorder %v4528_v46, %v4093_v61  ;;  %v3026_v43 = vsel %vm215_vm6, 1.0, %v6479_v22 }
 0x1d7   :  { %2306 = vperm.xlu0 %3713, %v3865_v5   ;;  %vm884_vm10 = vcmp.eq.s32.totalorder %v4528_v46, %v4354_v36  ;;  %vm439_vm11 = vcmp.eq.s32.totalorder %v4528_v46, %v4131_v55  ;;  %v3010_v33 = vsel %vm103_vm8, 1.0, %v6479_v22  ;;  %v3042_v61 = vsel %vm327_vm9, 1.0, %v6479_v22 }
 0x1d8   :  { %vm996_vm12 = vcmp.eq.s32.totalorder %v4528_v46, %v4408_v18  ;;  %v263_v55 = vadd.f32 %v3026_v43, %v3010_v33  ;;  %vm551_vm13 = vcmp.eq.s32.totalorder %v4528_v46, %v4196_v52  ;;  %vm1108_vm14 = vcmp.eq.s32.totalorder %v4528_v46, %v4436_v15  ;;  %v4610_v18 = vld [vmem:[%s6409_s0 + $0x60] sm:$0xff] }
 0x1d9   :  { %3647 = vset.pattern.permute.xlu1 %v6556_v35  ;;  %v4514_v48 = vpop.permute.xlu1 %1507  ;;  %v4516_v41 = vpop.permute.xlu0 %983  ;;  %vm663_vm15 = vcmp.eq.s32.totalorder %v4528_v46, %v4224_v31  ;;  %v3135_v52 = vsel %vm996_vm12, 1.0, %v6479_v22  ;;  %v6477_v15 = vmov 18   ;;  %v3151_v31 = vsel %vm1108_vm14, 1.0, %v6479_v22 }
 0x1da   :  { %6630 = vst [vmem:[#allocation131_spill] sm:$0xff] %v4516_v41  ;;  %1092 = vperm.xlu1 %3647, %v3901_v11   ;;  %v6633_v11 = vmov 17   ;;  %vm217_vm3 = vcmp.eq.s32.totalorder %v4528_v46, %v4047_v45  ;;  %vm329_vm6 = vcmp.eq.s32.totalorder %v4528_v46, %v4098_v63  ;;  %vm1444_vm8 = vcmp.eq.s32.totalorder %v4528_v46, %v4464_v51 }
 0x1db   :  { %2312 = vperm.xlu0 %3713, %v3877_v7   ;;  %vm441_vm9 = vcmp.eq.s32.totalorder %v4528_v46, %v4137_v58  ;;  %v4722_v58 = vld [vmem:[%s6409_s0 + $0x38] sm:$0xff]  ;;  %vm665_vm14 = vcmp.eq.s32.totalorder %v4528_v46, %v4231_v29 }
 0x1dd   :  { %v4520_v2 = vpop.permute.xlu0 %992 }
 0x1de   :  { %6631 = vst [vmem:[#allocation132_spill] sm:$0xff] %v4520_v2  ;;  %3648 = vset.pattern.permute.xlu1 %v6626_v23  ;;  %v4523_v4 = vpop.permute.xlu1 %1077  ;;  %v3023_v2 = vsel %vm212_vm0, 1.0, %v6479_v22  ;;  %vm1220_vm0 = vcmp.eq.s32.totalorder %v4528_v46, %v4449_v59  ;;  %v4665_v59 = vld [vmem:[%s6409_s0 + $0x8] sm:$0xff] }
 0x1df   :  { %6632 = vst [vmem:[#allocation133_spill] sm:$0xff] %v4523_v4  ;;  %1525 = vperm.xlu1 %3648, %v3882_v8   ;;  %2318 = vperm.xlu0 %3713, %v3889_v9  }
 0x1e2   :  { %v4530_v6 = vpop.permute.xlu1 %1080  ;;  %v4532_v41 = vpop.permute.xlu0 %1510 }
 0x1e3   :  { %3649 = vset.pattern.permute.xlu1 %v6633_v11  ;;  %2321 = vperm.xlu0 %3713, %v3906_v12   ;;  %v3039_v12 = vsel %vm324_vm2, 1.0, %v6479_v22  ;;  %vm1332_vm2 = vcmp.eq.s32.totalorder %v4528_v46, %v4468_v56 }
 0x1e4   :  { %1961 = vperm.xlu1 %3649, %v3841_v1   ;;  %v3007_v1 = vsel %vm100_vm1, 1.0, %v6479_v22  ;;  %vm775_vm1 = vcmp.eq.s32.totalorder %v4528_v46, %v4307_v26 }
 0x1e5   :  { %v260_v20 = vadd.f32 %v3023_v2, %v3007_v1  ;;  %v3058_v1 = vsel %vm439_vm11, 1.0, %v6479_v22  ;;  %v3106_v56 = vsel %vm775_vm1, 1.0, %v6479_v22 }
 0x1e6   :  { %v4543_v8 = vpop.permute.xlu0 %1513 }
 0x1e7   :  { %v4546_v4 = vpop.permute.xlu1 %1516  ;;  %3717 = vset.pattern.permute.xlu0 %v6633_v11  ;;  %vm1556_vm11 = vcmp.eq.s32.totalorder %v4528_v46, %v4543_v8 }
 0x1e8   :  { %6634 = vst [vmem:[#allocation134_spill] sm:$0xff] %v4546_v4  ;;  %1964 = vperm.xlu1 %3649, %v3853_v3   ;;  %1970 = vperm.xlu0 %3717, %v3865_v5   ;;  %v372_v4 = vadd.f32 %v3039_v12, %v260_v20  ;;  %v3071_v5 = vsel %vm548_vm4, 1.0, %v6479_v22  ;;  %v375_v20 = vadd.f32 %v3042_v61, %v263_v55  ;;  %v4639_v61 = vld [vmem:[%s6409_s0 + $0x78] sm:$0xff] }
 0x1e9   :  { %vm887_vm4 = vcmp.eq.s32.totalorder %v4528_v46, %v4323_v53  ;;  %v3183_v53 = vsel %vm1332_vm2, 1.0, %v6479_v22 }
 0x1ea   :  { %v4557_v40 = vpop.permute.xlu0 %1522  ;;  %v484_v60 = vadd.f32 %v3055_v57, %v372_v4  ;;  %v3119_v4 = vsel %vm884_vm10, 1.0, %v6479_v22  ;;  %v3074_v57 = vsel %vm551_vm13, 1.0, %v6479_v22  ;;  %v487_v43 = vadd.f32 %v3058_v1, %v375_v20 }
 0x1eb   :  { %v3122_v20 = vsel %vm887_vm4, 1.0, %v6479_v22  ;;  %vm1111_vm10 = vcmp.eq.s32.totalorder %v4528_v46, %v4507_v14  ;;  %vm553_vm13 = vcmp.eq.s32.totalorder %v4528_v46, %v4203_v44  ;;  %vm1559_vm2 = vcmp.eq.s32.totalorder %v4528_v46, %v4557_v40 }
 0x1ec   :  { %3650 = vset.pattern.permute.xlu1 %v6560_v42  ;;  %v4563_v3 = vpop.permute.xlu1 %1186  ;;  %1976 = vperm.xlu0 %3717, %v3877_v7   ;;  %v3087_v7 = vsel %vm660_vm5, 1.0, %v6479_v22  ;;  %v596_v16 = vadd.f32 %v3071_v5, %v484_v60  ;;  %v599_v26 = vadd.f32 %v3074_v57, %v487_v43  ;;  %vm105_vm5 = vcmp.eq.s32.totalorder %v4528_v46, %v3996_v27  ;;  %v4684_v43 = vld [vmem:[%s6409_s0 + $0x28] sm:$0xff] }
 0x1ed   :  { %1198 = vperm.xlu1 %3650, %v3889_v9   ;;  %v3103_v9 = vsel %vm772_vm7, 1.0, %v6479_v22  ;;  %vm999_vm7 = vcmp.eq.s32.totalorder %v4528_v46, %v4421_v50  ;;  %v3012_v57 = vsel %vm105_vm5, 1.0, %v6479_v22  ;;  %v3044_v27 = vsel %vm329_vm6, 1.0, %v6479_v22 }
 0x1ee   :  { %v4572_v0 = vpop.permute.xlu0 %1528  ;;  %v708_v2 = vadd.f32 %v3087_v7, %v596_v16  ;;  %v4630_v16 = vld [vmem:[%s6409_s0] sm:$0xff]  ;;  %v3138_v51 = vsel %vm999_vm7, 1.0, %v6479_v22  ;;  %vm1223_vm12 = vcmp.eq.s32.totalorder %v4528_v46, %v4563_v3  ;;  %v3060_v50 = vsel %vm441_vm9, 1.0, %v6479_v22 }
 0x1ef   :  { %v3154_v8 = vsel %vm1111_vm10, 1.0, %v6479_v22  ;;  %vm889_vm4 = vcmp.eq.s32.totalorder %v4528_v46, %v4330_v49  ;;  %vm1001_vm6 = vcmp.eq.s32.totalorder %v4528_v46, %v4491_v30  ;;  %v4789_v30 = vld [vmem:[%s6409_s0 + $0x10] sm:$0xff]  ;;  %vm1113_vm7 = vcmp.eq.s32.totalorder %v4528_v46, %v4530_v6  ;;  %v3752_v6 = vld [vmem:[%s6409_s0 + $0x18] sm:$0xff] }
 0x1f0   :  { %1979 = vperm.xlu0 %3717, %v3894_v10   ;;  %v4596_v10 = vld [vmem:[%s6409_s0 + $0x20] sm:$0xff]  ;;  %v820_v12 = vadd.f32 %v3103_v9, %v708_v2  ;;  %v3090_v9 = vsel %vm663_vm15, 1.0, %v6479_v22  ;;  %v3167_v2 = vsel %vm1220_vm0, 1.0, %v6479_v22  ;;  %vm1447_vm15 = vcmp.eq.s32.totalorder %v4528_v46, %v4470_v54 }
 0x1f1   :  { %3651 = vset.pattern.permute.xlu1 %v6598_v28  ;;  %v4587_v25 = vpop.permute.xlu1 %1619  ;;  %v711_v45 = vadd.f32 %v3090_v9, %v599_v26  ;;  %vm777_vm0 = vcmp.eq.s32.totalorder %v4528_v46, %v4314_v34  ;;  %v3218_v54 = vsel %vm1559_vm2, 1.0, %v6479_v22  ;;  %v4781_v34 = vld [vmem:[%s6409_s0 + $0x50] sm:$0xff]  ;;  %v3124_v40 = vsel %vm889_vm4, 1.0, %v6479_v22 }
 0x1f2   :  { %1631 = vperm.xlu1 %3651, %v4596_v10   ;;  %v4599_v36 = vpop.permute.xlu0 %1531  ;;  %v932_v5 = vadd.f32 %v3119_v4, %v820_v12  ;;  %v3028_v12 = vsel %vm217_vm3, 1.0, %v6479_v22  ;;  %v3108_v29 = vsel %vm777_vm0, 1.0, %v6479_v22  ;;  %vm1449_vm9 = vcmp.eq.s32.totalorder %v4528_v46, %v4476_v62 }
 0x1f3   :  { %v265_v14 = vadd.f32 %v3028_v12, %v3012_v57  ;;  %vm1561_vm10 = vcmp.eq.s32.totalorder %v4528_v46, %v4572_v0  ;;  %v3204_v62 = vsel %vm1449_vm9, 1.0, %v6479_v22  ;;  %vm99_vm0 = vcmp.eq.s32.totalorder %v4528_v46, %v3987_v24  ;;  %v6672_v24 = vld [vmem:[#allocation9_spill] sm:$0xff] }
 0x1f4   :  { %1991 = vperm.xlu0 %3717, %v4610_v18   ;;  %v1044_v33 = vadd.f32 %v3135_v52, %v932_v5  ;;  %v823_v5 = vadd.f32 %v3106_v56, %v711_v45  ;;  %vm210_vm2 = vcmp.eq.s32.totalorder %v4528_v46, %v4029_v39 }
 0x1f5   :  { %v377_v3 = vadd.f32 %v3044_v27, %v265_v14  ;;  %v4748_v14 = vld [vmem:[%s6409_s0 + $0x48] sm:$0xff] }
 0x1f6   :  { %3652 = vset.pattern.permute.xlu1 %v6477_v15  ;;  %v4620_v60 = vpop.permute.xlu1 %1189  ;;  %v4622_v7 = vpop.permute.xlu0 %1537  ;;  %v1156_v55 = vadd.f32 %v3151_v31, %v1044_v33  ;;  %v935_v9 = vadd.f32 %v3122_v20, %v823_v5  ;;  %v3199_v33 = vsel %vm1444_vm8, 1.0, %v6479_v22 }
 0x1f7   :  { %6635 = vst [vmem:[#allocation135_spill] sm:$0xff] %v4620_v60  ;;  %2067 = vperm.xlu1 %3652, %v4630_v16   ;;  %v489_v12 = vadd.f32 %v3060_v50, %v377_v3 }
 0x1f8   :  { %2000 = vperm.xlu0 %3717, %v4639_v61   ;;  %v1268_v52 = vadd.f32 %v3167_v2, %v1156_v55  ;;  %v4713_v2 = vld [vmem:[%s6409_s0 + $0x58] sm:$0xff]  ;;  %v1047_v56 = vadd.f32 %v3138_v51, %v935_v9  ;;  %v3215_v55 = vsel %vm1556_vm11, 1.0, %v6479_v22  ;;  %v3092_v9 = vsel %vm665_vm14, 1.0, %v6479_v22 }
 0x1fa   :  { %v4653_v4 = vpop.permute.xlu1 %1192  ;;  %v4655_v1 = vpop.permute.xlu0 %1552  ;;  %v1380_v31 = vadd.f32 %v3183_v53, %v1268_v52  ;;  %v3170_v53 = vsel %vm1223_vm12, 1.0, %v6479_v22  ;;  %v1159_v44 = vadd.f32 %v3154_v8, %v1047_v56  ;;  %v3076_v52 = vsel %vm553_vm13, 1.0, %v6479_v22 }
 0x1fb   :  { %6636 = vst [vmem:[#allocation136_spill] sm:$0xff] %v4655_v1  ;;  %2070 = vperm.xlu1 %3652, %v4665_v59   ;;  %v601_v3 = vadd.f32 %v3076_v52, %v489_v12  ;;  %vm1225_vm8 = vcmp.eq.s32.totalorder %v4528_v46, %v4653_v4  ;;  %v3732_v1 = vld [vmem:[%s6410_s1 + $0x10] sm:$0xff]  }
 0x1fc   :  { %3720 = vset.pattern.permute.xlu0 %v6477_v15  ;;  %v1492_v45 = vadd.f32 %v3199_v33, %v1380_v31  ;;  %v1271_v27 = vadd.f32 %v3170_v53, %v1159_v44  ;;  %v4742_v31 = vld [vmem:[%s6409_s0 + $0x30] sm:$0xff]  ;;  %v3202_v33 = vsel %vm1447_vm15, 1.0, %v6479_v22  ;;  %v3172_v4 = vsel %vm1225_vm8, 1.0, %v6479_v22 }
 0x1fd   :  { %2082 = vperm.xlu0 %3720, %v4684_v43   ;;  %vm98_vm15 = vcmp.eq.s32.totalorder %v4528_v46, %v3982_v21 }
 0x1fe   :  { %v1604_v57 = vadd.f32 %v3215_v55, %v1492_v45  ;;  %v713_v45 = vadd.f32 %v3092_v9, %v601_v3  ;;  %v3156_v9 = vsel %vm1113_vm7, 1.0, %v6479_v22 }
 0x1ff   :  { %3654 = vset.pattern.permute.xlu1 %v6560_v42  ;;  %v4701_v63 = vpop.permute.xlu1 %1628  ;;  %v4703_v26 = vpop.permute.xlu0 %1622 }
 0x200   :  { %1204 = vperm.xlu1 %3654, %v4713_v2   ;;  %v825_v44 = vadd.f32 %v3108_v29, %v713_v45 }
 0x201   :  { %2088 = vperm.xlu0 %3720, %v4722_v58  }
 0x203   :  { %v1626_v20 = vpop.permute.xlu0 %1625 }
 0x204   :  { %vm1668_vm1 = vcmp.eq.s32.totalorder %v4528_v46, %v1626_v20  ;;  %3655 = vset.pattern.permute.xlu1 %v6598_v28  ;;  %v1299_v5 = vpop.permute.xlu1 %1298 }
 0x205   :  { %v3231_v51 = vsel %vm1668_vm1, 1.0, %v6479_v22  ;;  %vm1335_vm3 = vcmp.eq.s32.totalorder %v4528_v46, %v1299_v5  ;;  %1637 = vperm.xlu1 %3655, %v4742_v31   ;;  %2094 = vperm.xlu0 %3720, %v4748_v14   ;;  %v937_v5 = vadd.f32 %v3124_v40, %v825_v44  ;;  %vm211_vm1 = vcmp.eq.s32.totalorder %v4528_v46, %v4026_v37  ;;  %v6673_v37 = vld [vmem:[#allocation17_spill] sm:$0xff] }
 0x206   :  { %v4759_v50 = vadd.f32 %v3231_v51, %v1604_v57  ;;  %v3186_v8 = vsel %vm1335_vm3, 1.0, %v6479_v22  ;;  %v3140_v57 = vsel %vm1001_vm6, 1.0, %v6479_v22  ;;  %v4800_v51 = vld [vmem:[%s6409_s0 + $0x68] sm:$0xff]  ;;  %vm108_vm6 = vcmp.eq.s32.totalorder %v4528_v46, %v6672_v24  ;;  %v6675_v24 = vld [vmem:[#allocation25_spill] sm:$0xff] }
 0x207   :  { %v1383_v56 = vadd.f32 %v3186_v8, %v1271_v27  ;;  %v1635_v55 = vpop.permute.xlu0 %1634  ;;  %v1049_v8 = vadd.f32 %v3140_v57, %v937_v5  ;;  %vm218_vm7 = vcmp.eq.s32.totalorder %v4528_v46, %v6673_v37  ;;  %vm322_vm9 = vcmp.eq.s32.totalorder %v4528_v46, %v6675_v24 }
 0x208   :  { %6637 = vst [vmem:[#allocation137_spill] sm:$0xff] %v4759_v50  ;;  %vm1671_vm5 = vcmp.eq.s32.totalorder %v4528_v46, %v1635_v55  ;;  %v6475_v55 = vmov 19  }
 0x209   :  { %v1495_v53 = vadd.f32 %v3202_v33, %v1383_v56  ;;  %3656 = vset.pattern.permute.xlu1 %v6477_v15  ;;  %v4776_v49 = vpop.permute.xlu1 %1731  ;;  %2097 = vperm.xlu0 %3720, %v4781_v34   ;;  %v3234_v12 = vsel %vm1671_vm5, 1.0, %v6479_v22  ;;  %v1161_v56 = vadd.f32 %v3156_v9, %v1049_v8 }
 0x20a   :  { %2073 = vperm.xlu1 %3656, %v4789_v30  }
 0x20b   :  { %v1607_v20 = vadd.f32 %v3218_v54, %v1495_v53  ;;  %v1641_v52 = vpop.permute.xlu0 %1640  ;;  %v1273_v54 = vadd.f32 %v3172_v4, %v1161_v56 }
 0x20c   :  { %vm1673_vm12 = vcmp.eq.s32.totalorder %v4528_v46, %v1641_v52 }
 0x20d   :  { %v1719_v27 = vadd.f32 %v3234_v12, %v1607_v20  ;;  %2106 = vperm.xlu0 %3720, %v4800_v51   ;;  %v3220_v12 = vsel %vm1561_vm10, 1.0, %v6479_v22  ;;  %v3236_v57 = vsel %vm1673_vm12, 1.0, %v6479_v22 }
 0x20e   :  { %2076 = vperm.xlu1 %3656, %v3752_v6   ;;  %v4807_v33 = vpop.permute.xlu1 %1301 }
 0x20f   :  { %6638 = vst [vmem:[#allocation138_spill] sm:$0xff] %v4807_v33  ;;  %v4809_v3 = vpop.permute.xlu0 %1643 }
 0x211   :  { %3722 = vset.pattern.permute.xlu0 %v6475_v55 }
 0x212   :  { %3657 = vset.pattern.permute.xlu1 %v6567_v13  ;;  %v1305_v29 = vpop.permute.xlu1 %1304  ;;  %2194 = vperm.xlu0 %3722, %v4684_v43  }
 0x213   :  { %vm1337_vm11 = vcmp.eq.s32.totalorder %v4528_v46, %v1305_v29  ;;  %1310 = vperm.xlu1 %3657, %v4748_v14   ;;  %v4821_v45 = vpop.permute.xlu0 %1649 }
 0x214   :  { %v3188_v53 = vsel %vm1337_vm11, 1.0, %v6479_v22 }
 0x215   :  { %v1385_v40 = vadd.f32 %v3188_v53, %v1273_v54 }
 0x216   :  { %2200 = vperm.xlu0 %3722, %v4722_v58  }
 0x217   :  { %v1497_v44 = vadd.f32 %v3204_v62, %v1385_v40  ;;  %3658 = vset.pattern.permute.xlu1 %v6610_v38  ;;  %v4829_v0 = vpop.permute.xlu1 %1740  ;;  %v4831_v20 = vpop.permute.xlu0 %1655 }
 0x218   :  { %6639 = vst [vmem:[#allocation139_spill] sm:$0xff] %v4831_v20  ;;  %1743 = vperm.xlu1 %3658, %v4596_v10  }
 0x219   :  { %v1609_v5 = vadd.f32 %v3220_v12, %v1497_v44  ;;  %v6643_v44 = vmov 20  }
 0x21a   :  { %2206 = vperm.xlu0 %3722, %v4748_v14  }
 0x21b   :  { %v1721_v52 = vadd.f32 %v3236_v57, %v1609_v5  ;;  %v6646_v5 = vmov 0  }
 0x21c   :  { %3659 = vset.pattern.permute.xlu1 %v6475_v55  ;;  %v4837_v9 = vpop.permute.xlu1 %974  ;;  %v4839_v8 = vpop.permute.xlu0 %1734 }
 0x21d   :  { %6640 = vst [vmem:[#allocation140_spill] sm:$0xff] %v4837_v9  ;;  %2179 = vperm.xlu1 %3659, %v4630_v16  }
 0x21e   :  { %2209 = vperm.xlu0 %3722, %v4781_v34  }
 0x220   :  { %v4843_v4 = vpop.permute.xlu0 %1737 }
 0x221   :  { %2182 = vperm.xlu1 %3659, %v4665_v59   ;;  %v4846_v56 = vpop.permute.xlu1 %1407 }
 0x222   :  { %6641 = vst [vmem:[#allocation141_spill] sm:$0xff] %v4846_v56  ;;  %2215 = vperm.xlu0 %3722, %v4610_v18  }
 0x224   :  { %v1747_v29 = vpop.permute.xlu0 %1746 }
 0x225   :  { %vm1783_vm13 = vcmp.eq.s32.totalorder %v4528_v46, %v1747_v29  ;;  %3661 = vset.pattern.permute.xlu1 %v6567_v13 }
 0x226   :  { %v3250_v54 = vsel %vm1783_vm13, 1.0, %v6479_v22  ;;  %1316 = vperm.xlu1 %3661, %v4713_v2   ;;  %v4853_v16 = vpop.permute.xlu1 %1843  ;;  %2224 = vperm.xlu0 %3722, %v4639_v61  }
 0x227   :  { %v4856_v62 = vadd.f32 %v3250_v54, %v1719_v27 }
 0x228   :  { %v1753_v53 = vpop.permute.xlu0 %1752 }
 0x229   :  { %6642 = vst [vmem:[#allocation142_spill] sm:$0xff] %v4856_v62  ;;  %vm1785_vm14 = vcmp.eq.s32.totalorder %v4528_v46, %v1753_v53  ;;  %v3753_v53 = vld [vmem:[%s6409_s0 + $0x40] sm:$0xff] }
 0x22a   :  { %v3252_v40 = vsel %vm1785_vm14, 1.0, %v6479_v22  ;;  %3662 = vset.pattern.permute.xlu1 %v6610_v38  ;;  %v4861_v12 = vpop.permute.xlu1 %1846  ;;  %3725 = vset.pattern.permute.xlu0 %v6643_v44 }
 0x22b   :  { %v4864_v57 = vadd.f32 %v3252_v40, %v1721_v52  ;;  %1749 = vperm.xlu1 %3662, %v4742_v31   ;;  %2330 = vperm.xlu0 %3725, %v4800_v51   ;;  %v3727_v40 = vld [vmem:[%s6410_s1 + $0x38] sm:$0xff]  }
 0x22c   :  { %3451 = vmatprep.subr.bf16.mxu0 %v3727_v40  ;;  %v4902_v15 = vpop.permute.xlu0 %1755 }
 0x22d   :  { %6644 = vst [vmem:[#allocation143_spill] sm:$0xff] %v4864_v57  ;;  %3452 = vmatpush3.bf16.msra.mxu0 %v3727_v40  ;;  %v6678_v57 = vld [vmem:[#allocation30_spill] sm:$0xff] }
 0x22e   :  { %vm330_vm12 = vcmp.eq.s32.totalorder %v4528_v46, %v6678_v57  ;;  %v6683_v57 = vld [vmem:[#allocation39_spill] sm:$0xff] }
 0x22f   :  { %3663 = vset.pattern.permute.xlu1 %v6475_v55  ;;  %v4869_v27 = vpop.permute.xlu1 %980  ;;  %3726 = vset.pattern.permute.xlu0 %v6646_v5 }
 0x230   :  { %6645 = vst [vmem:[#allocation144_spill] sm:$0xff] %v4869_v27  ;;  %2185 = vperm.xlu1 %3663, %v4789_v30   ;;  %v4919_v22 = vpop.permute.xlu0 %1761 }
 0x234   :  { %2188 = vperm.xlu1 %3663, %v3752_v6   ;;  %v4873_v29 = vpop.permute.xlu1 %1413  ;;  %v4928_v20 = vpop.permute.xlu0 %1767 }
 0x235   :  { %6647 = vst [vmem:[#allocation145_spill] sm:$0xff] %v4873_v29  ;;  %6651 = vst [vmem:[#allocation149_spill] sm:$0xff] %v4928_v20  ;;  %v3733_v29 = vld [vmem:[%s6410_s1 + $0x8] sm:$0xff]   ;;  %v3734_v20 = vld [vmem:[%s6410_s1] sm:$0xff]  }
 0x238   :  { %3664 = vset.pattern.permute.xlu1 %v6575_v47 }
 0x239   :  { %986 = vperm.xlu1 %3664, %v4800_v51   ;;  %v4877_v52 = vpop.permute.xlu1 %1849 }
 0x23d   :  { %3665 = vset.pattern.permute.xlu1 %v6572_v19  ;;  %v4880_v54 = vpop.permute.xlu1 %1852 }
 0x23e   :  { %1419 = vperm.xlu1 %3665, %v3753_v53   ;;  %v3728_v53 = vld [vmem:[%s6410_s1 + $0x30] sm:$0xff]  }
 0x23f   :  { %3453 = vmatprep.subr.bf16.mxu0 %v3728_v53 }
 0x240   :  { %3454 = vmatpush3.bf16.msra.mxu0 %v3728_v53  ;;  %v3730_v53 = vld [vmem:[%s6410_s1 + $0x20] sm:$0xff]  }
 0x242   :  { %3667 = vset.pattern.permute.xlu1 %v6621_v17  ;;  %v4886_v6 = vpop.permute.xlu1 %1086 }
 0x243   :  { %6648 = vst [vmem:[#allocation146_spill] sm:$0xff] %v4886_v6  ;;  %1855 = vperm.xlu1 %3667, %v4596_v10  }
 0x247   :  { %1858 = vperm.xlu1 %3667, %v4684_v43   ;;  %v4893_v5 = vpop.permute.xlu1 %1519  ;;  %v3729_v43 = vld [vmem:[%s6410_s1 + $0x28] sm:$0xff]  }
 0x248   :  { %6649 = vst [vmem:[#allocation147_spill] sm:$0xff] %v4893_v5  ;;  %3455 = vmatprep.subr.bf16.mxu0 %v3729_v43 }
 0x249   :  { %3456 = vmatpush3.bf16.msra.mxu0 %v3729_v43 }
 0x24a   :  { %3457 = vmatprep.subr.bf16.mxu0 %v3730_v53 }
 0x24b   :  { %3668 = vset.pattern.permute.xlu1 %v6643_v44 }
 0x24c   :  { %2294 = vperm.xlu1 %3668, %v4665_v59   ;;  %v4900_v55 = vpop.permute.xlu1 %1955  ;;  %v4916_v59 = vld [vmem:[%s6409_s0 + $0x70] sm:$0xff] }
 0x24d   :  { %3458 = vmatpush3.bf16.msra.mxu0 %v3730_v53 }
 0x250   :  { %3669 = vset.pattern.permute.xlu1 %v6575_v47  ;;  %v4908_v40 = vpop.permute.xlu1 %1958  ;;  %v3731_v47 = vld [vmem:[%s6410_s1 + $0x18] sm:$0xff]  }
 0x251   :  { %989 = vperm.xlu1 %3669, %v4916_v59   ;;  %3459 = vmatprep.subr.bf16.mxu0 %v3731_v47 }
 0x252   :  { %3460 = vmatpush3.bf16.msra.mxu0 %v3731_v47 }
 0x253   :  { %3461 = vmatprep.subr.bf16.mxu0 %v3732_v1 }
 0x255   :  { %3671 = vset.pattern.permute.xlu1 %v6572_v19  ;;  %v4925_v43 = vpop.permute.xlu1 %1092 }
 0x256   :  { %6650 = vst [vmem:[#allocation148_spill] sm:$0xff] %v4925_v43  ;;  %1425 = vperm.xlu1 %3671, %v4781_v34   ;;  %3462 = vmatpush3.bf16.msra.mxu0 %v3732_v1  ;;  %v4940_v34 = vpop.permute.xlu0 %1861  ;;  %v6674_v43 = vld [vmem:[#allocation19_spill] sm:$0xff] }
 0x257   :  { %6653 = vst [vmem:[#allocation151_spill] sm:$0xff] %v4940_v34  ;;  %3463 = vmatprep.subr.bf16.mxu0 %v3733_v29  ;;  %v6655_v34 = vmov 0.0   ;;  %vm220_vm8 = vcmp.eq.s32.totalorder %v4528_v46, %v6674_v43 }
 0x258   :  { %v3005_v39 = vsel %vm98_vm15, 1.0, %v6655_v34  ;;  %v3015_v27 = vsel %vm108_vm6, 1.0, %v6655_v34  ;;  %v3031_v19 = vsel %vm220_vm8, 1.0, %v6655_v34  ;;  %vm437_vm15 = vcmp.eq.s32.totalorder %v4528_v46, %v6683_v57 }
 0x25a   :  { %1428 = vperm.xlu1 %3671, %v4713_v2   ;;  %v4934_v53 = vpop.permute.xlu1 %1525  ;;  %3464 = vmatpush3.bf16.msra.mxu0 %v3733_v29 }
 0x25b   :  { %6652 = vst [vmem:[#allocation150_spill] sm:$0xff] %v4934_v53  ;;  %3465 = vmatprep.subr.bf16.mxu0 %v3734_v20  ;;  %v4952_v53 = vpop.permute.xlu0 %1867 }
 0x25e   :  { %3672 = vset.pattern.permute.xlu1 %v6621_v17  ;;  %3466 = vmatpush3.bf16.msra.mxu0 %v3734_v20 }
 0x25f   :  { %1864 = vperm.xlu1 %3672, %v4722_v58   ;;  %v4943_v47 = vpop.permute.xlu1 %1961  ;;  %3543 = vmatprep.subr.mxu0 %v6655_v34  ;;  %v4959_v29 = vpop.permute.xlu0 %1873 }
 0x260   :  { %6657 = vst [vmem:[#allocation154_spill] sm:$0xff] %v4959_v29 }
 0x263   :  { %3673 = vset.pattern.permute.xlu1 %v6643_v44  ;;  %v4949_v1 = vpop.permute.xlu1 %1964  ;;  %v4964_v5 = vpop.permute.xlu0 %1879 }
 0x264   :  { %6654 = vst [vmem:[#allocation152_spill] sm:$0xff] %v4949_v1  ;;  %2297 = vperm.xlu1 %3673, %v4789_v30   ;;  %6659 = vst [vmem:[#allocation156_spill] sm:$0xff] %v4964_v5  ;;  %v6701_v1 = vld [vmem:[#allocation127_spill] sm:$0xff] }
 0x268   :  { %3674 = vset.pattern.permute.xlu1 %v6556_v35  ;;  %v4956_v58 = vpop.permute.xlu1 %1198 }
 0x269   :  { %6656 = vst [vmem:[#allocation153_spill] sm:$0xff] %v4956_v58  ;;  %1095 = vperm.xlu1 %3674, %v4610_v18   ;;  %v4973_v58 = vpop.permute.xlu0 %2291 }
 0x26d   :  { %1098 = vperm.xlu1 %3674, %v4800_v51   ;;  %v4962_v62 = vpop.permute.xlu1 %1631  ;;  %v4980_v5 = vpop.permute.xlu0 %2300 }
 0x26e   :  { %6658 = vst [vmem:[#allocation155_spill] sm:$0xff] %v4962_v62  ;;  %6661 = vst [vmem:[#allocation158_spill] sm:$0xff] %v4980_v5  ;;  %v3037_v5 = vsel %vm322_vm9, 1.0, %v6655_v34 }
 0x271   :  { %3675 = vset.pattern.permute.xlu1 %v6626_v23  ;;  %v4985_v56 = vpop.permute.xlu0 %2306 }
 0x272   :  { %1534 = vperm.xlu1 %3675, %v4748_v14   ;;  %v4968_v30 = vpop.permute.xlu1 %2067  ;;  %6663 = vst [vmem:[#allocation160_spill] sm:$0xff] %v4985_v56  ;;  %v6668_v56 = vld [vmem:[#allocation14_spill] sm:$0xff] }
 0x273   :  { %vm213_vm4 = vcmp.eq.s32.totalorder %v4528_v46, %v6668_v56  ;;  %v3006_v56 = vsel %vm99_vm0, 1.0, %v6655_v34 }
 0x275   :  { %v4991_v33 = vpop.permute.xlu0 %2312 }
 0x276   :  { %3676 = vset.pattern.permute.xlu1 %v6633_v11  ;;  %v4971_v20 = vpop.permute.xlu1 %2070  ;;  %6665 = vst [vmem:[#allocation162_spill] sm:$0xff] %v4991_v33  ;;  %v6677_v33 = vld [vmem:[#allocation28_spill] sm:$0xff] }
 0x277   :  { %1967 = vperm.xlu1 %3676, %v4596_v10   ;;  %vm325_vm11 = vcmp.eq.s32.totalorder %v4528_v46, %v6677_v33 }
 0x279   :  { %v5012_v21 = vpop.permute.xlu0 %2318 }
 0x27a   :  { %6670 = vst [vmem:[#allocation14_spill] sm:$0xff] %v5012_v21 }
 0x27b   :  { %3677 = vset.pattern.permute.xlu1 %v6556_v35  ;;  %v4977_v6 = vpop.permute.xlu1 %1204 }
 0x27c   :  { %6660 = vst [vmem:[#allocation157_spill] sm:$0xff] %v4977_v6  ;;  %1101 = vperm.xlu1 %3677, %v4916_v59   ;;  %v6671_v6 = vld [vmem:[#allocation7_spill] sm:$0xff] }
 0x27d   :  { %vm106_vm5 = vcmp.eq.s32.totalorder %v4528_v46, %v6671_v6  ;;  %v3024_v6 = vsel %vm213_vm4, 1.0, %v6655_v34 }
 0x27e   :  { %v3013_v37 = vsel %vm106_vm5, 1.0, %v6655_v34 }
 0x280   :  { %1104 = vperm.xlu1 %3677, %v4639_v61   ;;  %v4983_v62 = vpop.permute.xlu1 %1637 }
 0x281   :  { %6662 = vst [vmem:[#allocation159_spill] sm:$0xff] %v4983_v62  ;;  %v6667_v62 = vld [vmem:[#allocation3_spill] sm:$0xff] }
 0x282   :  { %vm101_vm3 = vcmp.eq.s32.totalorder %v4528_v46, %v6667_v62  ;;  %v3022_v62 = vsel %vm211_vm1, 1.0, %v6655_v34 }
 0x283   :  { %v3008_v21 = vsel %vm101_vm3, 1.0, %v6655_v34  ;;  %v259_v44 = vadd.f32 %v3022_v62, %v3006_v56  ;;  %v3045_v56 = vsel %vm330_vm12, 1.0, %v6655_v34  ;;  %v6684_v62 = vld [vmem:[#allocation40_spill] sm:$0xff] }
 0x284   :  { %3678 = vset.pattern.permute.xlu1 %v6626_v23  ;;  %v6676_v23 = vld [vmem:[#allocation26_spill] sm:$0xff]  ;;  %v261_v24 = vadd.f32 %v3024_v6, %v3008_v21  ;;  %v3040_v21 = vsel %vm325_vm11, 1.0, %v6655_v34  ;;  %vm435_vm0 = vcmp.eq.s32.totalorder %v4528_v46, %v6684_v62  ;;  %v6685_v6 = vld [vmem:[#allocation45_spill] sm:$0xff] }
 0x285   :  { %1540 = vperm.xlu1 %3678, %v4713_v2   ;;  %v4989_v9 = vpop.permute.xlu1 %2073  ;;  %vm323_vm10 = vcmp.eq.s32.totalorder %v4528_v46, %v6676_v23  ;;  %v5047_v23 = vpop.permute.xlu0 %2321  ;;  %vm442_vm1 = vcmp.eq.s32.totalorder %v4528_v46, %v6685_v6  ;;  %v6689_v6 = vld [vmem:[#allocation55_spill] sm:$0xff] }
 0x286   :  { %6664 = vst [vmem:[#allocation161_spill] sm:$0xff] %v4989_v9  ;;  %v6680_v9 = vld [vmem:[#allocation31_spill] sm:$0xff]  ;;  %6681 = vst [vmem:[#allocation9_spill] sm:$0xff] %v5047_v23  ;;  %v3038_v33 = vsel %vm323_vm10, 1.0, %v6655_v34  ;;  %vm554_vm5 = vcmp.eq.s32.totalorder %v4528_v46, %v6689_v6 }
 0x287   :  { %vm332_vm13 = vcmp.eq.s32.totalorder %v4528_v46, %v6680_v9  ;;  %v268_v9 = vadd.f32 %v3031_v19, %v3015_v27  ;;  %v6686_v23 = vld [vmem:[#allocation47_spill] sm:$0xff]  ;;  %v3054_v27 = vsel %vm435_vm0, 1.0, %v6655_v34 }
 0x289   :  { %3679 = vset.pattern.permute.xlu1 %v6633_v11  ;;  %v4994_v35 = vpop.permute.xlu1 %2076  ;;  %v3029_v11 = vsel %vm218_vm7, 1.0, %v6655_v34 }
 0x28a   :  { %6666 = vst [vmem:[#allocation163_spill] sm:$0xff] %v4994_v35  ;;  %1973 = vperm.xlu1 %3679, %v4742_v31   ;;  %v6687_v35 = vld [vmem:[#allocation50_spill] sm:$0xff] }
 0x28b   :  { %vm547_vm3 = vcmp.eq.s32.totalorder %v4528_v46, %v6687_v35  ;;  %v5078_v35 = vpop.permute.xlu0 %1970 }
 0x28c   :  { %6690 = vst [vmem:[#allocation17_spill] sm:$0xff] %v5078_v35 }
 0x28e   :  { %3680 = vset.pattern.permute.xlu1 %v6560_v42  ;;  %v5010_v60 = vpop.permute.xlu1 %1310 }
 0x28f   :  { %6669 = vst [vmem:[#allocation3_spill] sm:$0xff] %v5010_v60  ;;  %1207 = vperm.xlu1 %3680, %v4610_v18   ;;  %v3021_v60 = vsel %vm210_vm2, 1.0, %v6655_v34  ;;  %vm444_vm2 = vcmp.eq.s32.totalorder %v4528_v46, %v6686_v23 }
 0x290   :  { %v258_v17 = vadd.f32 %v3021_v60, %v3005_v39  ;;  %v266_v60 = vadd.f32 %v3029_v11, %v3013_v37  ;;  %v6682_v39 = vld [vmem:[#allocation37_spill] sm:$0xff]  ;;  %v3047_v37 = vsel %vm332_vm13, 1.0, %v6655_v34 }
 0x291   :  { %vm434_vm14 = vcmp.eq.s32.totalorder %v4528_v46, %v6682_v39  ;;  %v371_v39 = vadd.f32 %v3038_v33, %v259_v44  ;;  %v380_v23 = vadd.f32 %v3047_v37, %v268_v9  ;;  %v3063_v44 = vsel %vm444_vm2, 1.0, %v6655_v34  ;;  %v6688_v33 = vld [vmem:[#allocation53_spill] sm:$0xff]  ;;  %v6692_v9 = vld [vmem:[#allocation56_spill] sm:$0xff] }
 0x292   :  { %v370_v11 = vadd.f32 %v3037_v5, %v258_v17  ;;  %v3053_v57 = vsel %vm434_vm14, 1.0, %v6655_v34  ;;  %v373_v17 = vadd.f32 %v3040_v21, %v261_v24  ;;  %v378_v19 = vadd.f32 %v3045_v56, %v266_v60  ;;  %v6691_v60 = vld [vmem:[#allocation66_spill] sm:$0xff]  ;;  %v6693_v37 = vld [vmem:[#allocation61_spill] sm:$0xff] }
 0x293   :  { %1210 = vperm.xlu1 %3680, %v4800_v51   ;;  %v5041_v43 = vpop.permute.xlu1 %1743  ;;  %v3061_v5 = vsel %vm442_vm1, 1.0, %v6655_v34  ;;  %vm546_vm4 = vcmp.eq.s32.totalorder %v4528_v46, %v6688_v33  ;;  %v3070_v24 = vsel %vm547_vm3, 1.0, %v6655_v34  ;;  %vm659_vm6 = vcmp.eq.s32.totalorder %v4528_v46, %v6691_v60  ;;  %v6699_v60 = vld [vmem:[#allocation94_spill] sm:$0xff] }
 0x294   :  { %6679 = vst [vmem:[#allocation7_spill] sm:$0xff] %v5041_v43  ;;  %v3056_v43 = vsel %vm437_vm15, 1.0, %v6655_v34  ;;  %v482_v29 = vadd.f32 %v3053_v57, %v370_v11  ;;  %v483_v21 = vadd.f32 %v3054_v27, %v371_v39  ;;  %v490_v56 = vadd.f32 %v3061_v5, %v378_v19  ;;  %v6695_v57 = vld [vmem:[#allocation74_spill] sm:$0xff]  ;;  %v6697_v27 = vld [vmem:[#allocation81_spill] sm:$0xff] }
 0x295   :  { %v485_v50 = vadd.f32 %v3056_v43, %v373_v17  ;;  %vm549_vm7 = vcmp.eq.s32.totalorder %v4528_v46, %v6692_v9  ;;  %vm658_vm8 = vcmp.eq.s32.totalorder %v4528_v46, %v6693_v37  ;;  %v6694_v33 = vmov 18   ;;  %v6696_v17 = vld [vmem:[#allocation57_spill] sm:$0xff]  ;;  %v6700_v9 = vld [vmem:[#allocation86_spill] sm:$0xff]  ;;  %v5109_v37 = vpop.permute.xlu0 %1976 }
 0x296   :  { %v492_v35 = vadd.f32 %v3063_v44, %v380_v23  ;;  %v3069_v43 = vsel %vm546_vm4, 1.0, %v6655_v34  ;;  %v3077_v11 = vsel %vm554_vm5, 1.0, %v6655_v34  ;;  %vm771_vm9 = vcmp.eq.s32.totalorder %v4528_v46, %v6695_v57  ;;  %v6698_v44 = vld [vmem:[#allocation73_spill] sm:$0xff] }
 0x297   :  { %3681 = vset.pattern.permute.xlu1 %v6598_v28  ;;  %v595_v39 = vadd.f32 %v3070_v24, %v483_v21  ;;  %vm556_vm10 = vcmp.eq.s32.totalorder %v4528_v46, %v6696_v17  ;;  %v3086_v19 = vsel %vm659_vm6, 1.0, %v6655_v34  ;;  %vm770_vm11 = vcmp.eq.s32.totalorder %v4528_v46, %v6697_v27 }
 0x298   :  { %1646 = vperm.xlu1 %3681, %v4748_v14   ;;  %v5069_v62 = vpop.permute.xlu1 %2179  ;;  %v3072_v5 = vsel %vm549_vm7, 1.0, %v6655_v34  ;;  %v3085_v23 = vsel %vm658_vm8, 1.0, %v6655_v34  ;;  %vm666_vm12 = vcmp.eq.s32.totalorder %v4528_v46, %v6698_v44  ;;  %vm883_vm13 = vcmp.eq.s32.totalorder %v4528_v46, %v6699_v60 }
 0x299   :  { %v602_v24 = vadd.f32 %v3077_v11, %v490_v56  ;;  %v3102_v21 = vsel %vm771_vm9, 1.0, %v6655_v34  ;;  %vm882_vm14 = vcmp.eq.s32.totalorder %v4528_v46, %v6700_v9  ;;  %v3079_v57 = vsel %vm556_vm10, 1.0, %v6655_v34  ;;  %v6703_v9 = vld [vmem:[#allocation80_spill] sm:$0xff] }
 0x29a   :  { %v707_v17 = vadd.f32 %v3086_v19, %v595_v39  ;;  %v3101_v27 = vsel %vm770_vm11, 1.0, %v6655_v34  ;;  %vm995_vm15 = vcmp.eq.s32.totalorder %v4528_v46, %v6701_v1  ;;  %v3118_v11 = vsel %vm883_vm13, 1.0, %v6655_v34  ;;  %v6704_v19 = vld [vmem:[#allocation109_spill] sm:$0xff]  ;;  %v6705_v1 = vld [vmem:[#allocation63_spill] sm:$0xff] }
 0x29b   :  { %vm778_vm0 = vcmp.eq.s32.totalorder %v4528_v46, %v6703_v9  ;;  %v3117_v39 = vsel %vm882_vm14, 1.0, %v6655_v34  ;;  %vm994_vm1 = vcmp.eq.s32.totalorder %v4528_v46, %v6704_v19  ;;  %vm661_vm2 = vcmp.eq.s32.totalorder %v4528_v46, %v6705_v1 }
 0x29c   :  { %3682 = vset.pattern.permute.xlu1 %v6694_v33  ;;  %v5088_v6 = vpop.permute.xlu1 %2182  ;;  %v819_v60 = vadd.f32 %v3102_v21, %v707_v17  ;;  %v6707_v17 = vld [vmem:[#allocation101_spill] sm:$0xff]  ;;  %v3109_v9 = vsel %vm778_vm0, 1.0, %v6655_v34  ;;  %vm1002_vm8 = vcmp.eq.s32.totalorder %v4528_v46, %v4504_v32 }
 0x29d   :  { %2079 = vperm.xlu1 %3682, %v4596_v10   ;;  %v594_v10 = vadd.f32 %v3069_v43, %v482_v29  ;;  %v597_v29 = vadd.f32 %v3072_v5, %v485_v50  ;;  %v3093_v43 = vsel %vm666_vm12, 1.0, %v6655_v34  ;;  %v3134_v5 = vsel %vm995_vm15, 1.0, %v6655_v34 }
 0x29e   :  { %v931_v21 = vadd.f32 %v3118_v11, %v819_v60  ;;  %vm890_vm4 = vcmp.eq.s32.totalorder %v4528_v46, %v6707_v17  ;;  %v3088_v60 = vsel %vm661_vm2, 1.0, %v6655_v34  ;;  %v6713_v17 = vld [vmem:[#allocation108_spill] sm:$0xff] }
 0x29f   :  { %v706_v56 = vadd.f32 %v3085_v23, %v594_v10  ;;  %v714_v23 = vadd.f32 %v3093_v43, %v602_v24  ;;  %v6706_v10 = vld [vmem:[#allocation75_spill] sm:$0xff]  ;;  %v5140_v24 = vpop.permute.xlu0 %1979  ;;  %v3125_v19 = vsel %vm890_vm4, 1.0, %v6655_v34  ;;  %vm1219_vm10 = vcmp.eq.s32.totalorder %v4528_v46, %v6713_v17 }
 0x2a0   :  { %vm668_vm3 = vcmp.eq.s32.totalorder %v4528_v46, %v6706_v10  ;;  %v6711_v43 = vld [vmem:[#allocation115_spill] sm:$0xff]  ;;  %v1043_v11 = vadd.f32 %v3134_v5, %v931_v21  ;;  %v6714_v5 = vld [vmem:[#allocation118_spill] sm:$0xff]  ;;  %v3166_v17 = vsel %vm1219_vm10, 1.0, %v6655_v34  ;;  %vm1667_vm10 = vcmp.eq.s32.totalorder %v4528_v46, %v4703_v26 }
 0x2a1   :  { %3683 = vset.pattern.permute.xlu1 %v6560_v42  ;;  %v5116_v44 = vpop.permute.xlu1 %1316  ;;  %v604_v42 = vadd.f32 %v3079_v57, %v492_v35  ;;  %v818_v50 = vadd.f32 %v3101_v27, %v706_v56  ;;  %v3133_v57 = vsel %vm994_vm1, 1.0, %v6655_v34  ;;  %v6710_v56 = vld [vmem:[#allocation98_spill] sm:$0xff]  ;;  %vm1107_vm7 = vcmp.eq.s32.totalorder %v4528_v46, %v6711_v43 }
 0x2a2   :  { %6702 = vst [vmem:[#allocation19_spill] sm:$0xff] %v5116_v44  ;;  %1213 = vperm.xlu1 %3683, %v4916_v59   ;;  %v6708_v44 = vld [vmem:[#allocation82_spill] sm:$0xff]  ;;  %vm1106_vm6 = vcmp.eq.s32.totalorder %v4528_v46, %v6710_v56  ;;  %vm1218_vm11 = vcmp.eq.s32.totalorder %v4528_v46, %v6714_v5  ;;  %v3150_v21 = vsel %vm1107_vm7, 1.0, %v6655_v34  ;;  %v3141_v56 = vsel %vm1002_vm8, 1.0, %v6655_v34 }
 0x2a3   :  { %vm780_vm5 = vcmp.eq.s32.totalorder %v4528_v46, %v6708_v44  ;;  %v930_v35 = vadd.f32 %v3117_v39, %v818_v50  ;;  %v6712_v39 = vld [vmem:[#allocation84_spill] sm:$0xff]  ;;  %v826_v50 = vadd.f32 %v3109_v9, %v714_v23  ;;  %v3149_v1 = vsel %vm1106_vm6, 1.0, %v6655_v34 }
 0x2a4   :  { %vm773_vm9 = vcmp.eq.s32.totalorder %v4528_v46, %v6712_v39  ;;  %v3111_v32 = vsel %vm780_vm5, 1.0, %v6655_v34  ;;  %v709_v44 = vadd.f32 %v3088_v60, %v597_v29  ;;  %v3165_v5 = vsel %vm1218_vm11, 1.0, %v6655_v34  ;;  %v6719_v29 = vld [vmem:[#allocation111_spill] sm:$0xff] }
 0x2a5   :  { %v1042_v10 = vadd.f32 %v3133_v57, %v930_v35  ;;  %v3104_v23 = vsel %vm773_vm9, 1.0, %v6655_v34  ;;  %v938_v9 = vadd.f32 %v3125_v19, %v826_v50  ;;  %v6715_v35 = vld [vmem:[#allocation104_spill] sm:$0xff]  ;;  %v1155_v57 = vadd.f32 %v3150_v21, %v1043_v11  ;;  %v6718_v19 = vld [vmem:[#allocation114_spill] sm:$0xff]  ;;  %v6720_v60 = vld [vmem:[#allocation123_spill] sm:$0xff] }
 0x2a6   :  { %1216 = vperm.xlu1 %3683, %v4639_v61   ;;  %v5138_v27 = vpop.permute.xlu1 %1749  ;;  %v3095_v61 = vsel %vm668_vm3, 1.0, %v6655_v34  ;;  %vm1114_vm12 = vcmp.eq.s32.totalorder %v4528_v46, %v6715_v35  ;;  %vm1330_vm14 = vcmp.eq.s32.totalorder %v4528_v46, %v6718_v19  ;;  %vm1226_vm15 = vcmp.eq.s32.totalorder %v4528_v46, %v6719_v29 }
 0x2a7   :  { %6709 = vst [vmem:[#allocation25_spill] sm:$0xff] %v5138_v27  ;;  %v716_v39 = vadd.f32 %v3095_v61, %v604_v42  ;;  %v5176_v27 = vpop.permute.xlu0 %1991  ;;  %v1154_v50 = vadd.f32 %v3149_v1, %v1042_v10  ;;  %v1050_v11 = vadd.f32 %v3141_v56, %v938_v9  ;;  %v3157_v35 = vsel %vm1114_vm12, 1.0, %v6655_v34  ;;  %v6721_v61 = vld [vmem:[#allocation124_spill] sm:$0xff]  ;;  %v6723_v1 = vld [vmem:[#allocation103_spill] sm:$0xff]  ;;  %v6724_v9 = vld [vmem:[#allocation122_spill] sm:$0xff] }
 0x2a8   :  { %6716 = vst [vmem:[#allocation26_spill] sm:$0xff] %v5176_v27  ;;  %vm1331_vm0 = vcmp.eq.s32.totalorder %v4528_v46, %v6720_v60  ;;  %vm1442_vm1 = vcmp.eq.s32.totalorder %v4528_v46, %v6721_v61  ;;  %vm892_vm3 = vcmp.eq.s32.totalorder %v4528_v46, %v6723_v1  ;;  %v3181_v56 = vsel %vm1330_vm14, 1.0, %v6655_v34 }
 0x2a9   :  { %v828_v21 = vadd.f32 %v3111_v32, %v716_v39  ;;  %v1266_v42 = vadd.f32 %v3165_v5, %v1154_v50  ;;  %v6722_v32 = vld [vmem:[#allocation100_spill] sm:$0xff]  ;;  %vm1443_vm4 = vcmp.eq.s32.totalorder %v4528_v46, %v6724_v9  ;;  %vm1554_vm5 = vcmp.eq.s32.totalorder %v4528_v46, %v4514_v48  ;;  %v6726_v39 = vld [vmem:[#allocation119_spill] sm:$0xff] }
 0x2aa   :  { %3684 = vset.pattern.permute.xlu1 %v6598_v28  ;;  %v6717_v28 = vld [vmem:[#allocation87_spill] sm:$0xff]  ;;  %vm1109_vm2 = vcmp.eq.s32.totalorder %v4528_v46, %v6722_v32  ;;  %vm1338_vm7 = vcmp.eq.s32.totalorder %v4528_v46, %v6726_v39  ;;  %vm1555_vm8 = vcmp.eq.s32.totalorder %v4528_v46, %v4532_v41  ;;  %vm1666_vm9 = vcmp.eq.s32.totalorder %v4528_v46, %v4587_v25 }
 0x2ab   :  { %1652 = vperm.xlu1 %3684, %v4713_v2   ;;  %v5172_v43 = vpop.permute.xlu1 %2185  ;;  %vm885_vm13 = vcmp.eq.s32.totalorder %v4528_v46, %v6717_v28  ;;  %v821_v2 = vadd.f32 %v3104_v23, %v709_v44  ;;  %v1267_v28 = vadd.f32 %v3166_v17, %v1155_v57  ;;  %v3173_v23 = vsel %vm1226_vm15, 1.0, %v6655_v34  ;;  %v6725_v44 = vld [vmem:[#allocation112_spill] sm:$0xff]  ;;  %v5219_v5 = vpop.permute.xlu0 %2000 }
 0x2ac   :  { %v3120_v10 = vsel %vm885_vm13, 1.0, %v6655_v34  ;;  %v1162_v57 = vadd.f32 %v3157_v35, %v1050_v11  ;;  %vm997_vm6 = vcmp.eq.s32.totalorder %v4528_v46, %v6725_v44  ;;  %v3197_v17 = vsel %vm1442_vm1, 1.0, %v6655_v34  ;;  %6727 = vst [vmem:[#allocation28_spill] sm:$0xff] %v5219_v5  ;;  %v6795_v5 = vld [vmem:[#allocation60_spill] sm:$0xff] }
 0x2ad   :  { %v1378_v19 = vadd.f32 %v3181_v56, %v1266_v42  ;;  %v933_v50 = vadd.f32 %v3120_v10, %v821_v2  ;;  %v5229_v11 = vsel %vm1109_vm2, 1.0, %v6655_v34  ;;  %v3198_v35 = vsel %vm1443_vm4, 1.0, %v6655_v34 }
 0x2ae   :  { %v3213_v29 = vsel %vm1554_vm5, 1.0, %v6655_v34  ;;  %v3127_v41 = vsel %vm892_vm3, 1.0, %v6655_v34  ;;  %v1274_v2 = vadd.f32 %v3173_v23, %v1162_v57  ;;  %v3136_v60 = vsel %vm997_vm6, 1.0, %v6655_v34 }
 0x2af   :  { %3685 = vset.pattern.permute.xlu1 %v6694_v33  ;;  %v5190_v27 = vpop.permute.xlu1 %2188  ;;  %v1490_v25 = vadd.f32 %v3197_v17, %v1378_v19  ;;  %v3189_v61 = vsel %vm1338_vm7, 1.0, %v6655_v34  ;;  %v3229_v10 = vsel %vm1666_vm9, 1.0, %v6655_v34  ;;  %vm1778_vm11 = vcmp.eq.s32.totalorder %v4528_v46, %v4776_v49  ;;  %v5264_v56 = vpop.permute.xlu0 %2082  ;;  %v6729_v17 = vld [vmem:[#allocation130_spill] sm:$0xff] }
 0x2b0   :  { %2085 = vperm.xlu1 %3685, %v4742_v31   ;;  %v3182_v31 = vsel %vm1331_vm0, 1.0, %v6655_v34  ;;  %vm1779_vm12 = vcmp.eq.s32.totalorder %v4528_v46, %v4839_v8  ;;  %vm1562_vm13 = vcmp.eq.s32.totalorder %v4528_v46, %v4599_v36  ;;  %v3230_v26 = vsel %vm1667_vm10, 1.0, %v6655_v34 }
 0x2b1   :  { %v1379_v48 = vadd.f32 %v3182_v31, %v1267_v28  ;;  %v3214_v28 = vsel %vm1555_vm8, 1.0, %v6655_v34  ;;  %v1602_v32 = vadd.f32 %v3213_v29, %v1490_v25  ;;  %vm1890_vm14 = vcmp.eq.s32.totalorder %v4528_v46, %v4853_v16 }
 0x2b2   :  { %v5266_v23 = vadd.f32 %v3136_v60, %v933_v50  ;;  %v1386_v8 = vadd.f32 %v3189_v61, %v1274_v2  ;;  %v3245_v36 = vsel %vm1778_vm11, 1.0, %v6655_v34  ;;  %vm1674_vm0 = vcmp.eq.s32.totalorder %v4528_v46, %v4809_v3 }
 0x2b3   :  { %v1491_v1 = vadd.f32 %v3198_v35, %v1379_v48  ;;  %v1714_v57 = vadd.f32 %v3229_v10, %v1602_v32  ;;  %v3246_v16 = vsel %vm1779_vm12, 1.0, %v6655_v34  ;;  %v3221_v44 = vsel %vm1562_vm13, 1.0, %v6655_v34  ;;  %v5295_v35 = vpop.permute.xlu0 %2088  ;;  %v6731_v32 = vld [vmem:[#allocation121_spill] sm:$0xff] }
 0x2b4   :  { %3686 = vset.pattern.permute.xlu1 %v6567_v13  ;;  %v5234_v42 = vpop.permute.xlu1 %986  ;;  %v3261_v31 = vsel %vm1890_vm14, 1.0, %v6655_v34  ;;  %vm1891_vm2 = vcmp.eq.s32.totalorder %v4528_v46, %v4861_v12  ;;  %vm2002_vm3 = vcmp.eq.s32.totalorder %v4528_v46, %v4900_v55  ;;  %vm1786_vm4 = vcmp.eq.s32.totalorder %v4528_v46, %v4902_v15 }
 0x2b5   :  { %1319 = vperm.xlu1 %3686, %v4610_v18   ;;  %v5257_v18 = vadd.f32 %v3127_v41, %v828_v21  ;;  %v1603_v9 = vadd.f32 %v3214_v28, %v1491_v1  ;;  %v6728_v21 = vld [vmem:[#allocation106_spill] sm:$0xff]  ;;  %vm1004_vm5 = vcmp.eq.s32.totalorder %v4528_v46, %v6729_v17  ;;  %v1826_v19 = vadd.f32 %v3245_v36, %v1714_v57  ;;  %v6735_v17 = vld [vmem:[#allocation116_spill] sm:$0xff] }
 0x2b6   :  { %vm1116_vm15 = vcmp.eq.s32.totalorder %v4528_v46, %v6728_v21  ;;  %v3237_v48 = vsel %vm1674_vm0, 1.0, %v6655_v34  ;;  %vm2003_vm6 = vcmp.eq.s32.totalorder %v4528_v46, %v4908_v40  ;;  %vm2114_vm7 = vcmp.eq.s32.totalorder %v4528_v46, %v4968_v30 }
 0x2b7   :  { %v1715_v39 = vadd.f32 %v3230_v26, %v1603_v9  ;;  %vm1898_vm8 = vcmp.eq.s32.totalorder %v4528_v46, %v4952_v53  ;;  %v1938_v25 = vadd.f32 %v3261_v31, %v1826_v19  ;;  %v3262_v2 = vsel %vm1891_vm2, 1.0, %v6655_v34  ;;  %v5347_v26 = vld [vmem:[%s6409_s0 + $0x20] sm:$0xff] }
 0x2b8   :  { %v3277_v60 = vsel %vm2002_vm3, 1.0, %v6655_v34  ;;  %v3253_v61 = vsel %vm1786_vm4, 1.0, %v6655_v34  ;;  %vm2115_vm9 = vcmp.eq.s32.totalorder %v4528_v46, %v4971_v20  ;;  %vm2226_vm10 = vcmp.eq.s32.totalorder %v4528_v46, %v5069_v62 }
 0x2b9   :  { %1322 = vperm.xlu1 %3686, %v4800_v51   ;;  %v1420_v49 = vpop.permute.xlu1 %1419  ;;  %v1827_v50 = vadd.f32 %v3246_v16, %v1715_v39  ;;  %vm2010_vm11 = vcmp.eq.s32.totalorder %v4528_v46, %v5140_v24  ;;  %v3143_v55 = vsel %vm1004_vm5, 1.0, %v6655_v34  ;;  %v3278_v15 = vsel %vm2003_vm6, 1.0, %v6655_v34 }
 0x2ba   :  { %vm1450_vm1 = vcmp.eq.s32.totalorder %v4528_v46, %v1420_v49  ;;  %v3293_v12 = vsel %vm2114_vm7, 1.0, %v6655_v34  ;;  %v3269_v20 = vsel %vm1898_vm8, 1.0, %v6655_v34  ;;  %v2050_v24 = vadd.f32 %v3277_v60, %v1938_v25  ;;  %v5352_v49 = vpop.permute.xlu0 %2094 }
 0x2bb   :  { %v3205_v51 = vsel %vm1450_vm1, 1.0, %v6655_v34  ;;  %v1939_v62 = vadd.f32 %v3262_v2, %v1827_v50  ;;  %vm2227_vm12 = vcmp.eq.s32.totalorder %v4528_v46, %v5088_v6  ;;  %v6730_v28 = vmov 19   ;;  %6732 = vst [vmem:[#allocation30_spill] sm:$0xff] %v5352_v49  ;;  %v6736_v50 = vld [vmem:[#allocation129_spill] sm:$0xff]  ;;  %v6821_v49 = vld [vmem:[#allocation96_spill] sm:$0xff] }
 0x2bc   :  { %v1498_v3 = vadd.f32 %v3205_v51, %v1386_v8  ;;  %vm1221_vm13 = vcmp.eq.s32.totalorder %v4528_v46, %v6731_v32  ;;  %v3294_v30 = vsel %vm2115_vm9, 1.0, %v6655_v34  ;;  %v3309_v1 = vsel %vm2226_vm10, 1.0, %v6655_v34 }
 0x2bd   :  { %3687 = vset.pattern.permute.xlu1 %v6610_v38  ;;  %v3285_v53 = vsel %vm2010_vm11, 1.0, %v6655_v34  ;;  %v2051_v9 = vadd.f32 %v3278_v15, %v1939_v62  ;;  %v2162_v57 = vadd.f32 %v3293_v12, %v2050_v24  ;;  %vm2338_vm14 = vcmp.eq.s32.totalorder %v4528_v46, %v4973_v58  ;;  %v5391_v15 = vld [vmem:[%s6409_s0 + $0x78] sm:$0xff] }
 0x2be   :  { %v1610_v29 = vadd.f32 %v3221_v44, %v1498_v3  ;;  %1758 = vperm.xlu1 %3687, %v4748_v14   ;;  %v5298_v41 = vpop.permute.xlu1 %1855  ;;  %v3159_v36 = vsel %vm1116_vm15, 1.0, %v6655_v34  ;;  %v1052_v16 = vadd.f32 %v3143_v55, %v5257_v18  ;;  %v3310_v44 = vsel %vm2227_vm12, 1.0, %v6655_v34  ;;  %v6734_v3 = vld [vmem:[#allocation113_spill] sm:$0xff] }
 0x2bf   :  { %v3168_v39 = vsel %vm1221_vm13, 1.0, %v6655_v34  ;;  %v2163_v31 = vadd.f32 %v3294_v30, %v2051_v9  ;;  %v2274_v51 = vadd.f32 %v3309_v1, %v2162_v57  ;;  %vm1228_vm0 = vcmp.eq.s32.totalorder %v4528_v46, %v6734_v3 }
 0x2c0   :  { %v1722_v14 = vadd.f32 %v3237_v48, %v1610_v29  ;;  %vm1333_vm1 = vcmp.eq.s32.totalorder %v4528_v46, %v6735_v17  ;;  %v1157_v18 = vadd.f32 %v5229_v11, %v5266_v23  ;;  %v3325_v21 = vsel %vm2338_vm14, 1.0, %v6655_v34  ;;  %v5381_v23 = vpop.permute.xlu0 %2097 }
 0x2c1   :  { %v2275_v19 = vadd.f32 %v3310_v44, %v2163_v31  ;;  %vm1445_vm2 = vcmp.eq.s32.totalorder %v4528_v46, %v6736_v50  ;;  %v1164_v29 = vadd.f32 %v3159_v36, %v1052_v16  ;;  %v3175_v2 = vsel %vm1228_vm0, 1.0, %v6655_v34  ;;  %6737 = vst [vmem:[#allocation37_spill] sm:$0xff] %v5381_v23 }
 0x2c2   :  { %3688 = vset.pattern.permute.xlu1 %v6730_v28  ;;  %v5337_v10 = vpop.permute.xlu1 %1858  ;;  %v1834_v40 = vadd.f32 %v3253_v61, %v1722_v14  ;;  %v1269_v48 = vadd.f32 %v3168_v39, %v1157_v18  ;;  %v3184_v11 = vsel %vm1333_vm1, 1.0, %v6655_v34  ;;  %v6738_v61 = vld [vmem:[#allocation120_spill] sm:$0xff]  ;;  %v6739_v14 = vld [vmem:[#allocation134_spill] sm:$0xff]  ;;  %v3200_v55 = vsel %vm1445_vm2, 1.0, %v6655_v34  ;;  %v6743_v39 = vld [vmem:[#allocation137_spill] sm:$0xff] }
 0x2c3   :  { %2191 = vperm.xlu1 %3688, %v5347_v26   ;;  %vm1340_vm3 = vcmp.eq.s32.totalorder %v4528_v46, %v6738_v61  ;;  %vm1557_vm4 = vcmp.eq.s32.totalorder %v4528_v46, %v6739_v14  ;;  %vm1669_vm5 = vcmp.eq.s32.totalorder %v4528_v46, %v4701_v63  ;;  %v1276_v24 = vadd.f32 %v3175_v2, %v1164_v29  ;;  %v6744_v18 = vld [vmem:[#allocation154_spill] sm:$0xff] }
 0x2c4   :  { %v1946_v8 = vadd.f32 %v3269_v20, %v1834_v40  ;;  %v1381_v62 = vadd.f32 %v3184_v11, %v1269_v48  ;;  %v3191_v40 = vsel %vm1340_vm3, 1.0, %v6655_v34  ;;  %v3216_v32 = vsel %vm1557_vm4, 1.0, %v6655_v34  ;;  %v5410_v63 = vpop.permute.xlu0 %2106  ;;  %v5452_v48 = vld [vmem:[%s6409_s0 + $0x30] sm:$0xff]  ;;  %v6747_v14 = vld [vmem:[#allocation158_spill] sm:$0xff] }
 0x2c5   :  { %vm1564_vm6 = vcmp.eq.s32.totalorder %v4528_v46, %v4622_v7  ;;  %vm1780_vm7 = vcmp.eq.s32.totalorder %v4528_v46, %v4843_v4  ;;  %v3232_v1 = vsel %vm1669_vm5, 1.0, %v6655_v34  ;;  %vm1781_vm8 = vcmp.eq.s32.totalorder %v4528_v46, %v4829_v0  ;;  %6741 = vst [vmem:[#allocation40_spill] sm:$0xff] %v5410_v63  ;;  %v5419_v7 = vld [vmem:[%s6409_s0 + $0x58] sm:$0xff] }
 0x2c6   :  { %v5364_v58 = vadd.f32 %v3285_v53, %v1946_v8  ;;  %v1493_v30 = vadd.f32 %v3200_v55, %v1381_v62  ;;  %v3223_v9 = vsel %vm1564_vm6, 1.0, %v6655_v34  ;;  %vm1892_vm9 = vcmp.eq.s32.totalorder %v4528_v46, %v4877_v52 }
 0x2c7   :  { %3689 = vset.pattern.permute.xlu1 %v6567_v13  ;;  %v2295_v6 = vpop.permute.xlu1 %2294  ;;  %v2386_v13 = vadd.f32 %v3325_v21, %v2274_v51  ;;  %v1388_v57 = vadd.f32 %v3191_v40, %v1276_v24  ;;  %vm1676_vm10 = vcmp.eq.s32.totalorder %v4528_v46, %v4821_v45  ;;  %v3247_v0 = vsel %vm1780_vm7, 1.0, %v6655_v34  ;;  %v6742_v45 = vld [vmem:[#allocation152_spill] sm:$0xff]  ;;  %v6745_v21 = vld [vmem:[#allocation163_spill] sm:$0xff] }
 0x2c8   :  { %6733 = vst [vmem:[#allocation31_spill] sm:$0xff] %v5364_v58  ;;  %vm2339_vm15 = vcmp.eq.s32.totalorder %v4528_v46, %v2295_v6  ;;  %1325 = vperm.xlu1 %3689, %v4916_v59   ;;  %v1605_v53 = vadd.f32 %v3216_v32, %v1493_v30  ;;  %vm1893_vm11 = vcmp.eq.s32.totalorder %v4528_v46, %v4880_v54  ;;  %v3248_v8 = vsel %vm1781_vm8, 1.0, %v6655_v34  ;;  %v5447_v6 = vpop.permute.xlu0 %2194 }
 0x2c9   :  { %v3326_v25 = vsel %vm2339_vm15, 1.0, %v6655_v34  ;;  %vm1788_vm13 = vcmp.eq.s32.totalorder %v4528_v46, %v4919_v22  ;;  %v3263_v16 = vsel %vm1892_vm9, 1.0, %v6655_v34  ;;  %vm2004_vm14 = vcmp.eq.s32.totalorder %v4528_v46, %v4943_v47 }
 0x2ca   :  { %v2387_v60 = vadd.f32 %v3326_v25, %v2275_v19  ;;  %v1717_v52 = vadd.f32 %v3232_v1, %v1605_v53  ;;  %vm2005_vm0 = vcmp.eq.s32.totalorder %v4528_v46, %v6742_v45  ;;  %v3239_v54 = vsel %vm1676_vm10, 1.0, %v6655_v34 }
 0x2cb   :  { %v1828_v31 = vadd.f32 %v3247_v0, %v6743_v39  ;;  %v3264_v51 = vsel %vm1893_vm11, 1.0, %v6655_v34  ;;  %vm1900_vm1 = vcmp.eq.s32.totalorder %v4528_v46, %v6744_v18  ;;  %vm2117_vm15 = vcmp.eq.s32.totalorder %v4528_v46, %v6745_v21 }
 0x2cc   :  { %1328 = vperm.xlu1 %3689, %v5391_v15   ;;  %v5394_v12 = vpop.permute.xlu1 %989  ;;  %v5396_v20 = vpack.c.bf16 %v2387_v60, %v2386_v13  ;;  %v1829_v17 = vadd.f32 %v3248_v8, %v1717_v52  ;;  %v3279_v29 = vsel %vm2004_vm14, 1.0, %v6655_v34  ;;  %v3280_v25 = vsel %vm2005_vm0, 1.0, %v6655_v34  ;;  %v6746_v13 = vld [vmem:[#allocation161_spill] sm:$0xff] }
 0x2cd   :  { %v1940_v50 = vadd.f32 %v3263_v16, %v1828_v31  ;;  %v3255_v2 = vsel %vm1788_vm13, 1.0, %v6655_v34  ;;  %vm2116_vm2 = vcmp.eq.s32.totalorder %v4528_v46, %v6746_v13  ;;  %vm2229_vm3 = vcmp.eq.s32.totalorder %v4528_v46, %v5190_v27  ;;  %v2201_v27 = vpop.permute.xlu0 %2200  ;;  %v6751_v16 = vld [vmem:[#allocation162_spill] sm:$0xff] }
 0x2ce   :  { %6740 = vst [vmem:[#allocation39_spill] sm:$0xff] %v5396_v20  ;;  %3467 = vmatprep.mubr.bf16.mxu0 %v5396_v20  ;;  %v1941_v11 = vadd.f32 %v3264_v51, %v1829_v17  ;;  %v3271_v47 = vsel %vm1900_vm1, 1.0, %v6655_v34  ;;  %v3296_v61 = vsel %vm2117_vm15, 1.0, %v6655_v34  ;;  %vm2341_vm4 = vcmp.eq.s32.totalorder %v4528_v46, %v6747_v14 }
 0x2cf   :  { %vm2009_vm5 = vcmp.eq.s32.totalorder %v4528_v46, %v5109_v37  ;;  %v2052_v22 = vadd.f32 %v3279_v29, %v1940_v50  ;;  %vm2228_vm6 = vcmp.eq.s32.totalorder %v4528_v46, %v5172_v43  ;;  %v6748_v62 = vmov 12   ;;  %v3759_v37 = vld [vmem:[%s6409_s0 + $0x60] sm:$0xff] }
 0x2d0   :  { %3690 = vset.pattern.permute.xlu1 %v6610_v38  ;;  %v2053_v55 = vadd.f32 %v3280_v25, %v1941_v11  ;;  %v3295_v32 = vsel %vm2116_vm2, 1.0, %v6655_v34  ;;  %v3312_v30 = vsel %vm2229_vm3, 1.0, %v6655_v34  ;;  %vm2121_vm7 = vcmp.eq.s32.totalorder %v4528_v46, %v5295_v35  ;;  %v3761_v25 = vld [vmem:[%s6409_s0 + $0x48] sm:$0xff] }
 0x2d1   :  { %1764 = vperm.xlu1 %3690, %v5419_v7   ;;  %v1426_v4 = vpop.permute.xlu1 %1425  ;;  %v3284_v1 = vsel %vm2009_vm5, 1.0, %v6655_v34  ;;  %vm2233_vm9 = vcmp.eq.s32.totalorder %v4528_v46, %v2201_v27  ;;  %v2164_v35 = vadd.f32 %v3295_v32, %v2052_v22  ;;  %v3300_v8 = vsel %vm2121_vm7, 1.0, %v6655_v34  ;;  %v6758_v32 = vld [vmem:[#allocation4_spill] sm:$0xff] }
 0x2d2   :  { %vm1452_vm12 = vcmp.eq.s32.totalorder %v4528_v46, %v1426_v4  ;;  %v2165_v43 = vadd.f32 %v3296_v61, %v2053_v55  ;;  %v3311_v4 = vsel %vm2228_vm6, 1.0, %v6655_v34  ;;  %vm2345_vm10 = vcmp.eq.s32.totalorder %v4528_v46, %v6751_v16 }
 0x2d3   :  { %v3207_v36 = vsel %vm1452_vm12, 1.0, %v6655_v34  ;;  %v2276_v39 = vadd.f32 %v3311_v4, %v2164_v35  ;;  %v3316_v31 = vsel %vm2233_vm9, 1.0, %v6655_v34  ;;  %v3332_v18 = vsel %vm2345_vm10, 1.0, %v6655_v34  ;;  %v6763_v4 = vld [vmem:[#allocation10_spill] sm:$0xff]  ;;  %v6766_v35 = vld [vmem:[#allocation12_spill] sm:$0xff] }
 0x2d4   :  { %v1500_v44 = vadd.f32 %v3207_v36, %v1388_v57  ;;  %v6750_v57 = vld [vmem:[#allocation143_spill] sm:$0xff]  ;;  %v2277_v52 = vadd.f32 %v3312_v30, %v2165_v43  ;;  %v3328_v36 = vsel %vm2341_vm4, 1.0, %v6655_v34  ;;  %v6752_v29 = vmov 16   ;;  %v6759_v30 = vld [vmem:[#allocation5_spill] sm:$0xff] }
 0x2d5   :  { %3691 = vset.pattern.permute.xlu1 %v6730_v28  ;;  %v5441_v3 = vpop.permute.xlu1 %1428  ;;  %v6757_v27 = vmov 17   ;;  %vm102_vm12 = vcmp.eq.s32.totalorder %v4528_v46, %v6758_v32  ;;  %vm104_vm13 = vcmp.eq.s32.totalorder %v4528_v46, %v6759_v30  ;;  %v6761_v43 = vld [vmem:[#allocation15_spill] sm:$0xff]  ;;  %vm111_vm15 = vcmp.eq.s32.totalorder %v4528_v46, %v6763_v4  ;;  %v6773_v4 = vld [vmem:[#allocation24_spill] sm:$0xff] }
 0x2d6   :  { %v1612_v19 = vadd.f32 %v3223_v9, %v1500_v44  ;;  %2197 = vperm.xlu1 %3691, %v5452_v48   ;;  %v5505_v44 = vld [vmem:[%s6409_s0 + $0x68] sm:$0xff]  ;;  %v2389_v21 = vadd.f32 %v3328_v36, %v2277_v52  ;;  %vm214_vm0 = vcmp.eq.s32.totalorder %v4528_v46, %v6761_v43  ;;  %vm113_vm4 = vcmp.eq.s32.totalorder %v4528_v46, %v6766_v35  ;;  %v6767_v52 = vld [vmem:[#allocation18_spill] sm:$0xff]  ;;  %v6768_v36 = vld [vmem:[#allocation13_spill] sm:$0xff] }
 0x2d7   :  { %vm219_vm5 = vcmp.eq.s32.totalorder %v4528_v46, %v6767_v52  ;;  %vm112_vm6 = vcmp.eq.s32.totalorder %v4528_v46, %v6768_v36  ;;  %v3025_v16 = vsel %vm214_vm0, 1.0, %v6655_v34  ;;  %v6775_v52 = vld [vmem:[#allocation29_spill] sm:$0xff] }
 0x2d8   :  { %v1724_v60 = vadd.f32 %v3239_v54, %v1612_v19 }
 0x2da   :  { %3692 = vset.pattern.permute.xlu1 %v6748_v62  ;;  %v1865_v24 = vpop.permute.xlu1 %1864  ;;  %v1836_v40 = vadd.f32 %v3255_v2, %v1724_v60  ;;  %v6755_v60 = vmov 20  }
 0x2db   :  { %vm1897_vm8 = vcmp.eq.s32.totalorder %v4528_v46, %v1865_v24  ;;  %1431 = vperm.xlu1 %3692, %v3759_v37  }
 0x2dc   :  { %v3268_v53 = vsel %vm1897_vm8, 1.0, %v6655_v34  ;;  %v5490_v9 = vadd.f32 %v3271_v47, %v1836_v40 }
 0x2dd   :  { %v1945_v0 = vadd.f32 %v3268_v53, %v6750_v57  ;;  %v6762_v53 = vld [vmem:[#allocation8_spill] sm:$0xff] }
 0x2de   :  { %6749 = vst [vmem:[#allocation45_spill] sm:$0xff] %v5490_v9  ;;  %vm109_vm1 = vcmp.eq.s32.totalorder %v4528_v46, %v6762_v53  ;;  %v6764_v57 = vld [vmem:[#allocation16_spill] sm:$0xff] }
 0x2df   :  { %v2057_v45 = vadd.f32 %v3284_v1, %v1945_v0  ;;  %1434 = vperm.xlu1 %3692, %v5505_v44   ;;  %v2298_v54 = vpop.permute.xlu1 %2297  ;;  %v3009_v1 = vsel %vm102_vm12, 1.0, %v6655_v34  ;;  %vm216_vm2 = vcmp.eq.s32.totalorder %v4528_v46, %v6764_v57  ;;  %v3011_v0 = vsel %vm104_vm13, 1.0, %v6655_v34  ;;  %v6774_v57 = vld [vmem:[#allocation27_spill] sm:$0xff] }
 0x2e0   :  { %vm2340_vm11 = vcmp.eq.s32.totalorder %v4528_v46, %v2298_v54  ;;  %v262_v32 = vadd.f32 %v3025_v16, %v3009_v1  ;;  %vm326_vm12 = vcmp.eq.s32.totalorder %v4528_v46, %v6774_v57  ;;  %vm328_vm13 = vcmp.eq.s32.totalorder %v4528_v46, %v6775_v52  ;;  %v6776_v1 = vld [vmem:[#allocation32_spill] sm:$0xff] }
 0x2e1   :  { %v3327_v51 = vsel %vm2340_vm11, 1.0, %v6655_v34  ;;  %v2169_v17 = vadd.f32 %v3300_v8, %v2057_v45  ;;  %v6769_v45 = vld [vmem:[#allocation20_spill] sm:$0xff]  ;;  %vm225_vm11 = vcmp.eq.s32.totalorder %v4528_v46, %v6773_v4  ;;  %v6782_v52 = vmov 14  }
 0x2e2   :  { %v2388_v19 = vadd.f32 %v3327_v51, %v2276_v39  ;;  %vm221_vm7 = vcmp.eq.s32.totalorder %v4528_v46, %v6769_v45  ;;  %v3016_v39 = vsel %vm109_vm1, 1.0, %v6655_v34  ;;  %v3027_v51 = vsel %vm216_vm2, 1.0, %v6655_v34  ;;  %v6777_v45 = vld [vmem:[#allocation33_spill] sm:$0xff] }
 0x2e3   :  { %v2281_v50 = vadd.f32 %v3316_v31, %v2169_v17  ;;  %3693 = vset.pattern.permute.xlu1 %v6752_v29  ;;  %v3018_v31 = vsel %vm111_vm15, 1.0, %v6655_v34  ;;  %v6770_v17 = vld [vmem:[#allocation21_spill] sm:$0xff]  ;;  %v3032_v30 = vsel %vm221_vm7, 1.0, %v6655_v34  ;;  %v264_v43 = vadd.f32 %v3027_v51, %v3011_v0  ;;  %v6778_v51 = vld [vmem:[#allocation34_spill] sm:$0xff] }
 0x2e4   :  { %1870 = vperm.xlu1 %3693, %v3761_v25   ;;  %v5516_v2 = vpop.permute.xlu1 %1095  ;;  %v5518_v11 = vpack.c.bf16 %v2389_v21, %v2388_v19  ;;  %vm222_vm8 = vcmp.eq.s32.totalorder %v4528_v46, %v6770_v17  ;;  %v3020_v19 = vsel %vm113_vm4, 1.0, %v6655_v34  ;;  %v269_v36 = vadd.f32 %v3032_v30, %v3016_v39  ;;  %v6780_v30 = vld [vmem:[#allocation36_spill] sm:$0xff] }
 0x2e5   :  { %v5520_v13 = vadd.f32 %v3332_v18, %v2281_v50  ;;  %v3762_v18 = vld [vmem:[%s6409_s0 + $0x50] sm:$0xff]  ;;  %v3030_v50 = vsel %vm219_vm5, 1.0, %v6655_v34  ;;  %v3033_v53 = vsel %vm222_vm8, 1.0, %v6655_v34  ;;  %vm334_vm0 = vcmp.eq.s32.totalorder %v4528_v46, %v6777_v45 }
 0x2e6   :  { %6753 = vst [vmem:[#allocation47_spill] sm:$0xff] %v5518_v11  ;;  %3468 = vmatmul.mubr.bf16.vlgmr.msra.gmra.mxu0 %v5518_v11  ;;  %vm333_vm1 = vcmp.eq.s32.totalorder %v4528_v46, %v6778_v51  ;;  %v3036_v17 = vsel %vm225_vm11, 1.0, %v6655_v34  ;;  %vm335_vm2 = vcmp.eq.s32.totalorder %v4528_v46, %v6780_v30  ;;  %v3049_v57 = vsel %vm334_vm0, 1.0, %v6655_v34  ;;  %v6784_v30 = vld [vmem:[#allocation42_spill] sm:$0xff] }
 0x2e7   :  { %6754 = vst [vmem:[#allocation50_spill] sm:$0xff] %v5520_v13  ;;  %vm443_vm5 = vcmp.eq.s32.totalorder %v4528_v46, %v6784_v30  ;;  %v6792_v11 = vld [vmem:[#allocation54_spill] sm:$0xff] }
 0x2e8   :  { %3694 = vset.pattern.permute.xlu1 %v6755_v60  ;;  %v5524_v47 = vpop.permute.xlu1 %1098 }
 0x2e9   :  { %2303 = vperm.xlu1 %3694, %v5347_v26   ;;  %v6756_v26 = vmov 13  }
 0x2ed   :  { %3695 = vset.pattern.permute.xlu1 %v6748_v62  ;;  %v5528_v61 = vpop.permute.xlu1 %1534 }
 0x2ee   :  { %1437 = vperm.xlu1 %3695, %v4916_v59  }
 0x2f2   :  { %1440 = vperm.xlu1 %3695, %v5391_v15   ;;  %v5532_v14 = vpop.permute.xlu1 %1967 }
 0x2f6   :  { %3696 = vset.pattern.permute.xlu1 %v6752_v29 }
 0x2f7   :  { %1876 = vperm.xlu1 %3696, %v5419_v7   ;;  %v5536_v22 = vpop.permute.xlu1 %1101 }
 0x2fb   :  { %3697 = vset.pattern.permute.xlu1 %v6755_v60  ;;  %v5539_v55 = vpop.permute.xlu1 %1104 }
 0x2fc   :  { %2309 = vperm.xlu1 %3697, %v5452_v48  }
 0x300   :  { %3698 = vset.pattern.permute.xlu1 %v6756_v26  ;;  %v5543_v62 = vpop.permute.xlu1 %1540 }
 0x301   :  { %1543 = vperm.xlu1 %3698, %v3759_v37   ;;  %v6760_v37 = vld [vmem:[#allocation6_spill] sm:$0xff] }
 0x302   :  { %vm107_vm14 = vcmp.eq.s32.totalorder %v4528_v46, %v6760_v37  ;;  %v6772_v37 = vld [vmem:[#allocation23_spill] sm:$0xff] }
 0x303   :  { %v3014_v8 = vsel %vm107_vm14, 1.0, %v6655_v34  ;;  %vm224_vm10 = vcmp.eq.s32.totalorder %v4528_v46, %v6772_v37  ;;  %vm331_vm14 = vcmp.eq.s32.totalorder %v4528_v46, %v6776_v1  ;;  %v3043_v37 = vsel %vm328_vm13, 1.0, %v6655_v34 }
 0x304   :  { %v3035_v16 = vsel %vm224_vm10, 1.0, %v6655_v34  ;;  %v3046_v39 = vsel %vm331_vm14, 1.0, %v6655_v34  ;;  %v273_v1 = vadd.f32 %v3036_v17, %v3020_v19  ;;  %vm552_vm13 = vcmp.eq.s32.totalorder %v4528_v46, %v6792_v11  ;;  %v2599_v11 = vld [vmem:[%s6411_s4 + $0x28] sm:$0xff] }
 0x305   :  { %1546 = vperm.xlu1 %3698, %v5505_v44   ;;  %v5546_v24 = vpop.permute.xlu1 %1973  ;;  %v3075_v63 = vsel %vm552_vm13, 1.0, %v6655_v34 }
 0x309   :  { %3699 = vset.pattern.permute.xlu1 %v6757_v27 }
 0x30a   :  { %1982 = vperm.xlu1 %3699, %v3761_v25   ;;  %v5549_v40 = vpop.permute.xlu1 %1207  ;;  %v6771_v25 = vld [vmem:[#allocation22_spill] sm:$0xff] }
 0x30b   :  { %vm223_vm9 = vcmp.eq.s32.totalorder %v4528_v46, %v6771_v25 }
 0x30c   :  { %v3034_v35 = vsel %vm223_vm9, 1.0, %v6655_v34 }
 0x30d   :  { %v271_v25 = vadd.f32 %v3034_v35, %v3018_v31  ;;  %v6783_v35 = vld [vmem:[#allocation41_spill] sm:$0xff] }
 0x30e   :  { %3700 = vset.pattern.permute.xlu1 %v6756_v26  ;;  %v5554_v48 = vpop.permute.xlu1 %1210  ;;  %v3019_v26 = vsel %vm112_vm6, 1.0, %v6655_v34  ;;  %vm438_vm4 = vcmp.eq.s32.totalorder %v4528_v46, %v6783_v35  ;;  %v6786_v35 = vld [vmem:[#allocation44_spill] sm:$0xff] }
 0x30f   :  { %1549 = vperm.xlu1 %3700, %v4916_v59   ;;  %v6765_v59 = vld [vmem:[#allocation11_spill] sm:$0xff]  ;;  %v272_v4 = vadd.f32 %v3035_v16, %v3019_v26  ;;  %v376_v26 = vadd.f32 %v3043_v37, %v264_v43  ;;  %vm445_vm7 = vcmp.eq.s32.totalorder %v4528_v46, %v6786_v35  ;;  %v6787_v43 = vld [vmem:[#allocation46_spill] sm:$0xff]  ;;  %v6788_v37 = vld [vmem:[#allocation48_spill] sm:$0xff] }
 0x310   :  { %vm110_vm3 = vcmp.eq.s32.totalorder %v4528_v46, %v6765_v59  ;;  %v267_v59 = vadd.f32 %v3030_v50, %v3014_v8  ;;  %v6779_v50 = vld [vmem:[#allocation35_spill] sm:$0xff]  ;;  %vm447_vm8 = vcmp.eq.s32.totalorder %v4528_v46, %v6787_v43  ;;  %vm449_vm9 = vcmp.eq.s32.totalorder %v4528_v46, %v6788_v37  ;;  %v6793_v35 = vld [vmem:[#allocation58_spill] sm:$0xff] }
 0x311   :  { %v3017_v21 = vsel %vm110_vm3, 1.0, %v6655_v34  ;;  %vm336_vm15 = vcmp.eq.s32.totalorder %v4528_v46, %v6779_v50  ;;  %v3050_v50 = vsel %vm335_vm2, 1.0, %v6655_v34  ;;  %vm558_vm14 = vcmp.eq.s32.totalorder %v4528_v46, %v6793_v35  ;;  %v6794_v37 = vld [vmem:[#allocation59_spill] sm:$0xff] }
 0x312   :  { %v270_v8 = vadd.f32 %v3033_v53, %v3017_v21  ;;  %v3048_v21 = vsel %vm333_vm1, 1.0, %v6655_v34  ;;  %v6781_v53 = vld [vmem:[#allocation38_spill] sm:$0xff]  ;;  %v3051_v31 = vsel %vm336_vm15, 1.0, %v6655_v34  ;;  %v379_v16 = vadd.f32 %v3046_v39, %v267_v59  ;;  %v6789_v39 = vld [vmem:[#allocation49_spill] sm:$0xff]  ;;  %v6799_v35 = vld [vmem:[#allocation67_spill] sm:$0xff] }
 0x313   :  { %3702 = vset.pattern.permute.xlu1 %v6757_v27  ;;  %v5584_v54 = vpop.permute.xlu1 %1646  ;;  %vm337_vm3 = vcmp.eq.s32.totalorder %v4528_v46, %v6781_v53  ;;  %v381_v20 = vadd.f32 %v3048_v21, %v269_v36  ;;  %v384_v17 = vadd.f32 %v3051_v31, %v272_v4  ;;  %v2601_v59 = vld [vmem:[%s6411_s4 + $0x38] sm:$0xff]  ;;  %v3062_v36 = vsel %vm443_vm5, 1.0, %v6655_v34  ;;  %v6790_v31 = vld [vmem:[#allocation51_spill] sm:$0xff] }
 0x314   :  { %1985 = vperm.xlu1 %3702, %v3762_v18   ;;  %v3041_v18 = vsel %vm326_vm12, 1.0, %v6655_v34  ;;  %v382_v53 = vadd.f32 %v3049_v57, %v270_v8  ;;  %v3052_v19 = vsel %vm337_vm3, 1.0, %v6655_v34  ;;  %v383_v8 = vadd.f32 %v3050_v50, %v271_v25  ;;  %3483 = vmatprep.subr.mxu1 %v2601_v59  ;;  %v6791_v25 = vld [vmem:[#allocation52_spill] sm:$0xff]  ;;  %v5670_v50 = vld [vmem:[%s6409_s0 + $0x40] sm:$0xff] }
 0x315   :  { %v374_v45 = vadd.f32 %v3041_v18, %v262_v32  ;;  %v6785_v32 = vld [vmem:[#allocation43_spill] sm:$0xff]  ;;  %v3057_v18 = vsel %vm438_vm4, 1.0, %v6655_v34  ;;  %vm446_vm10 = vcmp.eq.s32.totalorder %v4528_v46, %v6789_v39  ;;  %v385_v57 = vadd.f32 %v3052_v19, %v273_v1  ;;  %3484 = vmatpush3.msra.mxu1 %v2601_v59  ;;  %v2600_v1 = vld [vmem:[%s6411_s4 + $0x30] sm:$0xff] }
 0x316   :  { %vm440_vm6 = vcmp.eq.s32.totalorder %v4528_v46, %v6785_v32  ;;  %vm448_vm11 = vcmp.eq.s32.totalorder %v4528_v46, %v6790_v31  ;;  %vm550_vm12 = vcmp.eq.s32.totalorder %v4528_v46, %v6791_v25  ;;  %v3064_v19 = vsel %vm445_vm7, 1.0, %v6655_v34  ;;  %3485 = vmatprep.subr.mxu1 %v2600_v1 }
 0x317   :  { %v3059_v21 = vsel %vm440_vm6, 1.0, %v6655_v34  ;;  %v486_v30 = vadd.f32 %v3057_v18, %v374_v45  ;;  %v3066_v32 = vsel %vm447_vm8, 1.0, %v6655_v34  ;;  %v491_v59 = vadd.f32 %v3062_v36, %v379_v16  ;;  %3486 = vmatpush3.msra.mxu1 %v2600_v1 }
 0x318   :  { %1988 = vperm.xlu1 %3702, %v5419_v7   ;;  %v5614_v0 = vpop.permute.xlu1 %2079  ;;  %v3068_v45 = vsel %vm449_vm9, 1.0, %v6655_v34  ;;  %v3065_v18 = vsel %vm446_vm10, 1.0, %v6655_v34  ;;  %v488_v43 = vadd.f32 %v3059_v21, %v376_v26  ;;  %v3067_v16 = vsel %vm448_vm11, 1.0, %v6655_v34  ;;  %3487 = vmatprep.subr.mxu1 %v2599_v11  ;;  %v2598_v21 = vld [vmem:[%s6411_s4 + $0x20] sm:$0xff] }
 0x319   :  { %v3073_v36 = vsel %vm550_vm12, 1.0, %v6655_v34  ;;  %vm560_vm0 = vcmp.eq.s32.totalorder %v4528_v46, %v6794_v37  ;;  %v493_v39 = vadd.f32 %v3064_v19, %v381_v20  ;;  %v495_v1 = vadd.f32 %v3066_v32, %v383_v8  ;;  %3488 = vmatpush3.msra.mxu1 %v2599_v11  ;;  %v6796_v8 = vld [vmem:[#allocation62_spill] sm:$0xff] }
 0x31a   :  { %vm555_vm1 = vcmp.eq.s32.totalorder %v4528_v46, %v6795_v5  ;;  %v497_v31 = vadd.f32 %v3068_v45, %v385_v57  ;;  %v494_v25 = vadd.f32 %v3065_v18, %v382_v53  ;;  %v3081_v20 = vsel %vm558_vm14, 1.0, %v6655_v34  ;;  %3489 = vmatprep.subr.mxu1 %v2598_v21  ;;  %v6797_v57 = vld [vmem:[#allocation64_spill] sm:$0xff]  ;;  %v2597_v45 = vld [vmem:[%s6411_s4 + $0x18] sm:$0xff] }
 0x31b   :  { %vm557_vm15 = vcmp.eq.s32.totalorder %v4528_v46, %v6796_v8  ;;  %v496_v19 = vadd.f32 %v3067_v16, %v384_v17  ;;  %v598_v32 = vadd.f32 %v3073_v36, %v486_v30  ;;  %v3083_v53 = vsel %vm560_vm0, 1.0, %v6655_v34  ;;  %3490 = vmatpush3.msra.mxu1 %v2598_v21  ;;  %v6798_v30 = vld [vmem:[#allocation65_spill] sm:$0xff]  ;;  %v6800_v36 = vld [vmem:[#allocation68_spill] sm:$0xff]  ;;  %v6802_v21 = vld [vmem:[#allocation70_spill] sm:$0xff] }
 0x31c   :  { %3704 = vset.pattern.permute.xlu1 %v6782_v52  ;;  %vm559_vm2 = vcmp.eq.s32.totalorder %v4528_v46, %v6797_v57  ;;  %v600_v18 = vadd.f32 %v3075_v63, %v488_v43  ;;  %v3078_v17 = vsel %vm555_vm1, 1.0, %v6655_v34  ;;  %vm561_vm3 = vcmp.eq.s32.totalorder %v4528_v46, %v6798_v30  ;;  %3491 = vmatprep.subr.mxu1 %v2597_v45  ;;  %v6801_v63 = vld [vmem:[#allocation69_spill] sm:$0xff]  ;;  %v6806_v30 = vld [vmem:[#allocation76_spill] sm:$0xff] }
 0x31d   :  { %1658 = vperm.xlu1 %3704, %v5505_v44   ;;  %v5638_v51 = vpop.permute.xlu1 %1213  ;;  %vm667_vm4 = vcmp.eq.s32.totalorder %v4528_v46, %v6799_v35  ;;  %v606_v11 = vadd.f32 %v3081_v20, %v494_v25  ;;  %v3080_v16 = vsel %vm557_vm15, 1.0, %v6655_v34  ;;  %vm669_vm5 = vcmp.eq.s32.totalorder %v4528_v46, %v6800_v36  ;;  %3492 = vmatpush3.msra.mxu1 %v2597_v45  ;;  %v2596_v5 = vld [vmem:[%s6411_s4 + $0x10] sm:$0xff]  ;;  %v6803_v25 = vld [vmem:[#allocation71_spill] sm:$0xff] }
 0x31e   :  { %vm662_vm6 = vcmp.eq.s32.totalorder %v4528_v46, %v6801_v63  ;;  %v608_v43 = vadd.f32 %v3083_v53, %v496_v19  ;;  %v3082_v37 = vsel %vm559_vm2, 1.0, %v6655_v34  ;;  %vm671_vm7 = vcmp.eq.s32.totalorder %v4528_v46, %v6802_v21  ;;  %3493 = vmatprep.subr.mxu1 %v2596_v5  ;;  %v6805_v53 = vld [vmem:[#allocation72_spill] sm:$0xff]  ;;  %v6807_v36 = vld [vmem:[#allocation77_spill] sm:$0xff]  ;;  %v2594_v63 = vld [vmem:[%s6411_s4] sm:$0xff] }
 0x31f   :  { %vm664_vm8 = vcmp.eq.s32.totalorder %v4528_v46, %v6803_v25  ;;  %v603_v8 = vadd.f32 %v3078_v17, %v491_v59  ;;  %v3084_v57 = vsel %vm561_vm3, 1.0, %v6655_v34  ;;  %v3094_v19 = vsel %vm667_vm4, 1.0, %v6655_v34  ;;  %3494 = vmatpush3.msra.mxu1 %v2596_v5  ;;  %v2595_v45 = vld [vmem:[%s6411_s4 + $0x8] sm:$0xff]  ;;  %v6808_v21 = vld [vmem:[#allocation78_spill] sm:$0xff] }
 0x320   :  { %vm673_vm9 = vcmp.eq.s32.totalorder %v4528_v46, %v6805_v53  ;;  %v605_v58 = vadd.f32 %v3080_v16, %v493_v39  ;;  %v3096_v59 = vsel %vm669_vm5, 1.0, %v6655_v34  ;;  %v3089_v17 = vsel %vm662_vm6, 1.0, %v6655_v34  ;;  %3495 = vmatprep.subr.mxu1 %v2595_v45 }
 0x321   :  { %3705 = vset.pattern.permute.xlu1 %v6694_v33  ;;  %v5660_v4 = vpop.permute.xlu1 %1216  ;;  %vm774_vm10 = vcmp.eq.s32.totalorder %v4528_v46, %v6806_v30  ;;  %v607_v35 = vadd.f32 %v3082_v37, %v495_v1  ;;  %v3098_v39 = vsel %vm671_vm7, 1.0, %v6655_v34  ;;  %v3091_v16 = vsel %vm664_vm8, 1.0, %v6655_v34  ;;  %3496 = vmatpush3.msra.mxu1 %v2595_v45 }
 0x322   :  { %2091 = vperm.xlu1 %3705, %v5670_v50   ;;  %vm670_vm11 = vcmp.eq.s32.totalorder %v4528_v46, %v6807_v36  ;;  %v609_v5 = vadd.f32 %v3084_v57, %v497_v31  ;;  %v715_v1 = vadd.f32 %v3094_v19, %v603_v8  ;;  %v3100_v37 = vsel %vm673_vm9, 1.0, %v6655_v34  ;;  %3497 = vmatprep.subr.mxu1 %v2594_v63  ;;  %v6809_v31 = vld [vmem:[#allocation79_spill] sm:$0xff] }
 0x323   :  { %vm776_vm12 = vcmp.eq.s32.totalorder %v4528_v46, %v6808_v21  ;;  %v717_v25 = vadd.f32 %v3096_v59, %v605_v58  ;;  %v710_v9 = vadd.f32 %v3089_v17, %v598_v32  ;;  %v3105_v45 = vsel %vm774_vm10, 1.0, %v6655_v34  ;;  %3498 = vmatpush3.msra.mxu1 %v2594_v63  ;;  %v6810_v32 = vld [vmem:[#allocation83_spill] sm:$0xff]  ;;  %v6811_v17 = vld [vmem:[#allocation85_spill] sm:$0xff] }
 0x324   :  { %vm672_vm13 = vcmp.eq.s32.totalorder %v4528_v46, %v6809_v31  ;;  %v719_v57 = vadd.f32 %v3098_v39, %v607_v35  ;;  %v712_v19 = vadd.f32 %v3091_v16, %v600_v18  ;;  %v3097_v58 = vsel %vm670_vm11, 1.0, %v6655_v34  ;;  %3523 = vmatprep.subr.bf16.mxu1 %v6655_v34  ;;  %v6812_v18 = vld [vmem:[#allocation88_spill] sm:$0xff]  ;;  %v6813_v39 = vld [vmem:[#allocation89_spill] sm:$0xff]  ;;  %v6814_v16 = vld [vmem:[#allocation90_spill] sm:$0xff] }
 0x325   :  { %vm782_vm14 = vcmp.eq.s32.totalorder %v4528_v46, %v6810_v32  ;;  %v721_v53 = vadd.f32 %v3100_v37, %v609_v5  ;;  %v3107_v59 = vsel %vm776_vm12, 1.0, %v6655_v34  ;;  %vm784_vm0 = vcmp.eq.s32.totalorder %v4528_v46, %v6811_v17  ;;  %v6815_v5 = vld [vmem:[#allocation91_spill] sm:$0xff]  ;;  %v6816_v37 = vld [vmem:[#allocation97_spill] sm:$0xff]  ;;  %v6817_v32 = vld [vmem:[#allocation92_spill] sm:$0xff] }
 0x326   :  { %3706 = vset.pattern.permute.xlu1 %v6782_v52  ;;  %v5713_v26 = vpop.permute.xlu1 %1652  ;;  %v5727_v52 = vld [vmem:[%s6409_s0 + $0x70] sm:$0xff]  ;;  %vm779_vm1 = vcmp.eq.s32.totalorder %v4528_v46, %v6812_v18  ;;  %v822_v30 = vadd.f32 %v3105_v45, %v710_v9  ;;  %v3099_v35 = vsel %vm672_vm13, 1.0, %v6655_v34  ;;  %vm781_vm15 = vcmp.eq.s32.totalorder %v4528_v46, %v6813_v39 }
 0x327   :  { %1661 = vperm.xlu1 %3706, %v5727_v52   ;;  %vm783_vm2 = vcmp.eq.s32.totalorder %v4528_v46, %v6814_v16  ;;  %v718_v36 = vadd.f32 %v3097_v58, %v606_v11  ;;  %v3113_v63 = vsel %vm782_vm14, 1.0, %v6655_v34  ;;  %vm891_vm3 = vcmp.eq.s32.totalorder %v4528_v46, %v6815_v5  ;;  %v6818_v18 = vld [vmem:[#allocation128_spill] sm:$0xff] }
 0x328   :  { %vm886_vm4 = vcmp.eq.s32.totalorder %v4528_v46, %v6816_v37  ;;  %v824_v21 = vadd.f32 %v3107_v59, %v712_v19  ;;  %v3115_v45 = vsel %vm784_vm0, 1.0, %v6655_v34  ;;  %v3110_v31 = vsel %vm779_vm1, 1.0, %v6655_v34  ;;  %v6819_v59 = vld [vmem:[#allocation93_spill] sm:$0xff] }
 0x329   :  { %vm785_vm5 = vcmp.eq.s32.totalorder %v4528_v46, %v6817_v32  ;;  %v720_v11 = vadd.f32 %v3099_v35, %v608_v43  ;;  %v3112_v58 = vsel %vm781_vm15, 1.0, %v6655_v34  ;;  %v3114_v17 = vsel %vm783_vm2, 1.0, %v6655_v34  ;;  %v6820_v43 = vld [vmem:[#allocation95_spill] sm:$0xff] }
 0x32a   :  { %vm998_vm6 = vcmp.eq.s32.totalorder %v4528_v46, %v6818_v18  ;;  %v830_v39 = vadd.f32 %v3113_v63, %v718_v36  ;;  %v3126_v19 = vsel %vm891_vm3, 1.0, %v6655_v34  ;;  %vm893_vm7 = vcmp.eq.s32.totalorder %v4528_v46, %v6819_v59 }
 0x32b   :  { %1664 = vperm.xlu1 %3706, %v5391_v15   ;;  %v5764_v20 = vpop.permute.xlu1 %2085  ;;  %v3121_v16 = vsel %vm886_vm4, 1.0, %v6655_v34  ;;  %v832_v5 = vadd.f32 %v3115_v45, %v720_v11  ;;  %v827_v37 = vadd.f32 %v3110_v31, %v715_v1  ;;  %v3116_v32 = vsel %vm785_vm5, 1.0, %v6655_v34  ;;  %v6822_v31 = vld [vmem:[#allocation102_spill] sm:$0xff]  ;;  %v6824_v11 = vld [vmem:[#allocation144_spill] sm:$0xff] }
 0x32c   :  { %6804 = vst [vmem:[#allocation53_spill] sm:$0xff] %v5764_v20  ;;  %vm895_vm8 = vcmp.eq.s32.totalorder %v4528_v46, %v6820_v43  ;;  %v829_v35 = vadd.f32 %v3112_v58, %v717_v25  ;;  %v831_v23 = vadd.f32 %v3114_v17, %v719_v57  ;;  %vm897_vm9 = vcmp.eq.s32.totalorder %v4528_v46, %v6821_v49  ;;  %v6823_v49 = vld [vmem:[#allocation99_spill] sm:$0xff]  ;;  %v6825_v17 = vld [vmem:[#allocation105_spill] sm:$0xff] }
 0x32d   :  { %v3137_v36 = vsel %vm998_vm6, 1.0, %v6655_v34  ;;  %v5868_v18 = vadd.f32 %v3126_v19, %v827_v37  ;;  %v3128_v1 = vsel %vm893_vm7, 1.0, %v6655_v34  ;;  %v934_v45 = vadd.f32 %v3121_v16, %v822_v30  ;;  %v6826_v30 = vld [vmem:[#allocation107_spill] sm:$0xff]  ;;  %v6827_v16 = vld [vmem:[#allocation126_spill] sm:$0xff]  ;;  %v6828_v37 = vld [vmem:[#allocation148_spill] sm:$0xff] }
 0x32e   :  { %vm1110_vm10 = vcmp.eq.s32.totalorder %v4528_v46, %v6822_v31  ;;  %v833_v25 = vadd.f32 %v3116_v32, %v721_v53  ;;  %v3130_v57 = vsel %vm895_vm8, 1.0, %v6655_v34  ;;  %vm888_vm11 = vcmp.eq.s32.totalorder %v4528_v46, %v6823_v49  ;;  %v6829_v31 = vld [vmem:[#allocation110_spill] sm:$0xff] }
 0x32f   :  { %3707 = vset.pattern.permute.xlu1 %v6694_v33  ;;  %vm1005_vm12 = vcmp.eq.s32.totalorder %v4528_v46, %v6824_v11  ;;  %v3132_v58 = vsel %vm897_vm9, 1.0, %v6655_v34  ;;  %vm894_vm13 = vcmp.eq.s32.totalorder %v4528_v46, %v6825_v17  ;;  %vm896_vm14 = vcmp.eq.s32.totalorder %v4528_v46, %v6826_v30  ;;  %v6830_v11 = vld [vmem:[#allocation157_spill] sm:$0xff] }
 0x330   :  { %2100 = vperm.xlu1 %3707, %v5419_v7   ;;  %v5816_v8 = vpop.permute.xlu1 %1319  ;;  %v1046_v19 = vadd.f32 %v3137_v36, %v934_v45  ;;  %v941_v59 = vadd.f32 %v3128_v1, %v829_v35  ;;  %v3153_v53 = vsel %vm1110_vm10, 1.0, %v6655_v34  ;;  %vm1000_vm0 = vcmp.eq.s32.totalorder %v4528_v46, %v6827_v16  ;;  %v6832_v16 = vld [vmem:[#allocation19_spill] sm:$0xff] }
 0x331   :  { %vm1117_vm1 = vcmp.eq.s32.totalorder %v4528_v46, %v6828_v37  ;;  %v5889_v32 = vadd.f32 %v3130_v57, %v831_v23  ;;  %v3123_v43 = vsel %vm888_vm11, 1.0, %v6655_v34  ;;  %vm1222_vm15 = vcmp.eq.s32.totalorder %v4528_v46, %v6829_v31  ;;  %v6831_v23 = vld [vmem:[#allocation117_spill] sm:$0xff] }
 0x332   :  { %v3144_v49 = vsel %vm1005_vm12, 1.0, %v6655_v34  ;;  %v945_v36 = vadd.f32 %v3132_v58, %v833_v25  ;;  %v3129_v1 = vsel %vm894_vm13, 1.0, %v6655_v34  ;;  %v3131_v45 = vsel %vm896_vm14, 1.0, %v6655_v34 }
 0x333   :  { %vm1229_vm2 = vcmp.eq.s32.totalorder %v4528_v46, %v6830_v11  ;;  %vm1334_vm3 = vcmp.eq.s32.totalorder %v4528_v46, %v6831_v23  ;;  %v3139_v57 = vsel %vm1000_vm0, 1.0, %v6655_v34  ;;  %v1158_v17 = vadd.f32 %v3153_v53, %v1046_v19  ;;  %v6833_v11 = vld [vmem:[#allocation133_spill] sm:$0xff] }
 0x334   :  { %3709 = vset.pattern.permute.xlu1 %v6610_v38  ;;  %v5844_v9 = vpop.permute.xlu1 %1322  ;;  %v936_v30 = vadd.f32 %v3123_v43, %v824_v21  ;;  %v3169_v25 = vsel %vm1222_vm15, 1.0, %v6655_v34  ;;  %v1053_v58 = vadd.f32 %v3144_v49, %v941_v59  ;;  %vm1341_vm4 = vcmp.eq.s32.totalorder %v4528_v46, %v6832_v16  ;;  %v6834_v59 = vld [vmem:[#allocation131_spill] sm:$0xff]  ;;  %v6836_v49 = vld [vmem:[#allocation132_spill] sm:$0xff] }
 0x335   :  { %1770 = vperm.xlu1 %3709, %v5505_v44   ;;  %v942_v37 = vadd.f32 %v3129_v1, %v830_v39  ;;  %v5910_v31 = vadd.f32 %v3131_v45, %v832_v5  ;;  %vm1112_vm5 = vcmp.eq.s32.totalorder %v4528_v46, %v6833_v11  ;;  %v3176_v23 = vsel %vm1229_vm2, 1.0, %v6655_v34  ;;  %v6835_v39 = vld [vmem:[#allocation135_spill] sm:$0xff] }
 0x336   :  { %v3185_v13 = vsel %vm1334_vm3, 1.0, %v6655_v34  ;;  %v1048_v19 = vadd.f32 %v3139_v57, %v936_v30  ;;  %vm1453_vm6 = vcmp.eq.s32.totalorder %v4528_v46, %v5441_v3  ;;  %vm1006_vm7 = vcmp.eq.s32.totalorder %v4528_v46, %v6834_v59  ;;  %v6837_v3 = vld [vmem:[#allocation138_spill] sm:$0xff]  ;;  %v6838_v57 = vld [vmem:[#allocation140_spill] sm:$0xff]  ;;  %v6840_v30 = vld [vmem:[#allocation125_spill] sm:$0xff] }
 0x337   :  { %vm1224_vm8 = vcmp.eq.s32.totalorder %v4528_v46, %v6835_v39  ;;  %v1270_v5 = vadd.f32 %v3169_v25, %v1158_v17  ;;  %v3192_v43 = vsel %vm1341_vm4, 1.0, %v6655_v34  ;;  %vm1009_vm9 = vcmp.eq.s32.totalorder %v4528_v46, %v6836_v49 }
 0x338   :  { %v3155_v1 = vsel %vm1112_vm5, 1.0, %v6655_v34  ;;  %vm1565_vm10 = vcmp.eq.s32.totalorder %v4528_v46, %v5543_v62  ;;  %vm1336_vm11 = vcmp.eq.s32.totalorder %v4528_v46, %v6837_v3  ;;  %vm1003_vm12 = vcmp.eq.s32.totalorder %v4528_v46, %v6838_v57  ;;  %v6841_v57 = vld [vmem:[#allocation146_spill] sm:$0xff] }
 0x339   :  { %3710 = vset.pattern.permute.xlu1 %v6730_v28  ;;  %v5866_v63 = vpop.permute.xlu1 %1758  ;;  %v3208_v17 = vsel %vm1453_vm6, 1.0, %v6655_v34  ;;  %vm1451_vm14 = vcmp.eq.s32.totalorder %v4528_v46, %v6840_v30  ;;  %v3171_v25 = vsel %vm1224_vm8, 1.0, %v6655_v34  ;;  %vm1677_vm0 = vcmp.eq.s32.totalorder %v4528_v46, %v5713_v26  ;;  %v6843_v30 = vld [vmem:[#allocation153_spill] sm:$0xff] }
 0x33a   :  { %2203 = vperm.xlu1 %3710, %v5670_v50   ;;  %v3145_v16 = vsel %vm1006_vm7, 1.0, %v6655_v34  ;;  %v3148_v11 = vsel %vm1009_vm9, 1.0, %v6655_v34  ;;  %v3187_v39 = vsel %vm1336_vm11, 1.0, %v6655_v34  ;;  %v3142_v26 = vsel %vm1003_vm12, 1.0, %v6655_v34 }
 0x33b   :  { %v1382_v3 = vadd.f32 %v3185_v13, %v1270_v5  ;;  %v3240_v59 = vsel %vm1677_vm0, 1.0, %v6655_v34  ;;  %v5967_v20 = vadd.f32 %v3148_v11, %v945_v36  ;;  %v1051_v13 = vadd.f32 %v3142_v26, %v5868_v18  ;;  %v6844_v18 = vld [vmem:[#allocation155_spill] sm:$0xff]  ;;  %v6845_v11 = vld [vmem:[#allocation17_spill] sm:$0xff] }
 0x33c   :  { %vm1118_vm2 = vcmp.eq.s32.totalorder %v4528_v46, %v5516_v2  ;;  %vm1227_vm4 = vcmp.eq.s32.totalorder %v4528_v46, %v6843_v30  ;;  %vm1670_vm5 = vcmp.eq.s32.totalorder %v4528_v46, %v6844_v18  ;;  %vm2007_vm6 = vcmp.eq.s32.totalorder %v4528_v46, %v6845_v11 }
 0x33d   :  { %vm1007_vm7 = vcmp.eq.s32.totalorder %v4528_v46, %v5234_v42  ;;  %vm1230_vm8 = vcmp.eq.s32.totalorder %v4528_v46, %v5549_v40  ;;  %v3233_v26 = vsel %vm1670_vm5, 1.0, %v6655_v34  ;;  %vm1119_vm11 = vcmp.eq.s32.totalorder %v4528_v46, %v5524_v47 }
 0x33e   :  { %3711 = vset.pattern.permute.xlu1 %v6610_v38  ;;  %v5896_v35 = vpop.permute.xlu1 %2191  ;;  %v3160_v38 = vsel %vm1117_vm1, 1.0, %v6655_v34  ;;  %vm1115_vm1 = vcmp.eq.s32.totalorder %v4528_v46, %v6841_v57  ;;  %vm1342_vm12 = vcmp.eq.s32.totalorder %v4528_v46, %v5816_v8  ;;  %vm1343_vm0 = vcmp.eq.s32.totalorder %v4528_v46, %v5844_v9 }
 0x33f   :  { %1773 = vperm.xlu1 %3711, %v5727_v52   ;;  %v1165_v53 = vadd.f32 %v3160_v38, %v1053_v58  ;;  %v6839_v38 = vld [vmem:[#allocation141_spill] sm:$0xff]  ;;  %vm1787_vm5 = vcmp.eq.s32.totalorder %v4528_v46, %v5866_v63 }
 0x340   :  { %vm1446_vm13 = vcmp.eq.s32.totalorder %v4528_v46, %v6839_v38  ;;  %v6842_v38 = vld [vmem:[#allocation147_spill] sm:$0xff] }
 0x341   :  { %v1277_v45 = vadd.f32 %v3176_v23, %v1165_v53  ;;  %v1160_v23 = vadd.f32 %v3155_v1, %v1048_v19  ;;  %v3224_v53 = vsel %vm1565_vm10, 1.0, %v6655_v34  ;;  %v5963_v19 = vsel %vm1451_vm14, 1.0, %v6655_v34 }
 0x342   :  { %v1054_v1 = vadd.f32 %v3145_v16, %v942_v37  ;;  %vm1558_vm15 = vcmp.eq.s32.totalorder %v4528_v46, %v6842_v38  ;;  %vm1895_vm10 = vcmp.eq.s32.totalorder %v4528_v46, %v5337_v10  ;;  %v3146_v10 = vsel %vm1007_vm7, 1.0, %v6655_v34 }
 0x343   :  { %1776 = vperm.xlu1 %3711, %v5391_v15   ;;  %v5919_v21 = vpop.permute.xlu1 %1325  ;;  %v1389_v58 = vadd.f32 %v3192_v43, %v1277_v45  ;;  %v3201_v43 = vsel %vm1446_vm13, 1.0, %v6655_v34  ;;  %v1272_v45 = vadd.f32 %v3171_v25, %v1160_v23  ;;  %v3217_v36 = vsel %vm1558_vm15, 1.0, %v6655_v34  ;;  %v6846_v23 = vld [vmem:[#allocation3_spill] sm:$0xff] }
 0x344   :  { %v1494_v5 = vadd.f32 %v3201_v43, %v1382_v3  ;;  %vm1339_vm9 = vcmp.eq.s32.totalorder %v4528_v46, %v6846_v23  ;;  %v3282_v43 = vsel %vm2007_vm6, 1.0, %v6655_v34  ;;  %v3266_v47 = vsel %vm1895_vm10, 1.0, %v6655_v34 }
 0x345   :  { %v1501_v49 = vadd.f32 %v3208_v17, %v1389_v58  ;;  %v5969_v17 = vadd.f32 %v3187_v39, %v1272_v45  ;;  %v3158_v58 = vsel %vm1115_vm1, 1.0, %v6655_v34  ;;  %v3174_v39 = vsel %vm1227_vm4, 1.0, %v6655_v34 }
 0x346   :  { %v1163_v2 = vadd.f32 %v3158_v58, %v1051_v13  ;;  %v1606_v40 = vadd.f32 %v3217_v36, %v1494_v5  ;;  %v3190_v45 = vsel %vm1339_vm9, 1.0, %v6655_v34  ;;  %vm1231_vm13 = vcmp.eq.s32.totalorder %v4528_v46, %v5554_v48 }
 0x347   :  { %3712 = vset.pattern.permute.xlu1 %v6730_v28  ;;  %v5944_v62 = vpop.permute.xlu1 %1328  ;;  %v1613_v28 = vadd.f32 %v3224_v53, %v1501_v49  ;;  %v3161_v53 = vsel %vm1118_vm2, 1.0, %v6655_v34  ;;  %v3177_v49 = vsel %vm1230_vm8, 1.0, %v6655_v34  ;;  %v3193_v38 = vsel %vm1342_vm12, 1.0, %v6655_v34 }
 0x348   :  { %2212 = vperm.xlu1 %3712, %v5419_v7   ;;  %v1166_v3 = vadd.f32 %v3161_v53, %v1054_v1  ;;  %v1275_v8 = vadd.f32 %v3174_v39, %v1163_v2  ;;  %v1718_v57 = vadd.f32 %v3233_v26, %v1606_v40  ;;  %v1055_v13 = vadd.f32 %v3146_v10, %v5889_v32  ;;  %v6847_v1 = vld [vmem:[#allocation142_spill] sm:$0xff]  ;;  %v6849_v40 = vld [vmem:[#allocation145_spill] sm:$0xff] }
 0x349   :  { %v1725_v37 = vadd.f32 %v3240_v59, %v1613_v28  ;;  %v3162_v59 = vsel %vm1119_vm11, 1.0, %v6655_v34  ;;  %vm2119_vm14 = vcmp.eq.s32.totalorder %v4528_v46, %v5264_v56  ;;  %vm1563_vm1 = vcmp.eq.s32.totalorder %v4528_v46, %v5528_v61 }
 0x34a   :  { %v1387_v5 = vadd.f32 %v3190_v45, %v1275_v8  ;;  %v3178_v48 = vsel %vm1231_vm13, 1.0, %v6655_v34  ;;  %v1167_v32 = vadd.f32 %v3162_v59, %v1055_v13  ;;  %v3298_v9 = vsel %vm2119_vm14, 1.0, %v6655_v34 }
 0x34b   :  { %v3194_v61 = vsel %vm1343_vm0, 1.0, %v6655_v34  ;;  %vm1894_vm4 = vcmp.eq.s32.totalorder %v4528_v46, %v5298_v41  ;;  %vm2006_vm6 = vcmp.eq.s32.totalorder %v4528_v46, %v5532_v14  ;;  %vm2231_vm8 = vcmp.eq.s32.totalorder %v4528_v46, %v5447_v6 }
 0x34c   :  { %3714 = vset.pattern.permute.xlu1 %v6752_v29  ;;  %v1765_v25 = vpop.permute.xlu1 %1764  ;;  %v1279_v30 = vadd.f32 %v3178_v48, %v1167_v32  ;;  %v1499_v2 = vadd.f32 %v5963_v19, %v1387_v5  ;;  %v3265_v53 = vsel %vm1894_vm4, 1.0, %v6655_v34  ;;  %vm2118_vm9 = vcmp.eq.s32.totalorder %v4528_v46, %v5614_v0 }
 0x34d   :  { %vm1789_vm3 = vcmp.eq.s32.totalorder %v4528_v46, %v1765_v25  ;;  %1882 = vperm.xlu1 %3714, %v5505_v44   ;;  %v1943_v25 = vadd.f32 %v3266_v47, %v6847_v1  ;;  %v3254_v14 = vsel %vm1787_vm5, 1.0, %v6655_v34  ;;  %vm1448_vm10 = vcmp.eq.s32.totalorder %v4528_v46, %v6849_v40  ;;  %v3765_v40 = vld [vmem:[%s6409_s0 + $0x60] sm:$0xff] }
 0x34e   :  { %v3256_v16 = vsel %vm1789_vm3, 1.0, %v6655_v34  ;;  %vm1675_vm3 = vcmp.eq.s32.totalorder %v4528_v46, %v5584_v54  ;;  %v1391_v41 = vadd.f32 %v3194_v61, %v1279_v30  ;;  %vm1008_vm11 = vcmp.eq.s32.totalorder %v4528_v46, %v5394_v12  ;;  %v6850_v12 = vld [vmem:[#allocation160_spill] sm:$0xff]  ;;  %v6853_v61 = vld [vmem:[#allocation25_spill] sm:$0xff] }
 0x34f   :  { %v5990_v28 = vadd.f32 %v3256_v16, %v1725_v37  ;;  %v6848_v37 = vld [vmem:[#allocation7_spill] sm:$0xff]  ;;  %v2055_v11 = vadd.f32 %v3282_v43, %v1943_v25  ;;  %v3238_v23 = vsel %vm1675_vm3, 1.0, %v6655_v34  ;;  %vm2230_vm12 = vcmp.eq.s32.totalorder %v4528_v46, %v5896_v35 }
 0x350   :  { %vm1782_vm15 = vcmp.eq.s32.totalorder %v4528_v46, %v6848_v37  ;;  %vm1120_vm13 = vcmp.eq.s32.totalorder %v4528_v46, %v5536_v22  ;;  %v3297_v45 = vsel %vm2118_vm9, 1.0, %v6655_v34  ;;  %vm2343_vm0 = vcmp.eq.s32.totalorder %v4528_v46, %v6850_v12  ;;  %v6852_v37 = vld [vmem:[#allocation159_spill] sm:$0xff] }
 0x351   :  { %3715 = vset.pattern.permute.xlu1 %v6755_v60  ;;  %v6004_v42 = vpop.permute.xlu1 %2197  ;;  %v3249_v16 = vsel %vm1782_vm15, 1.0, %v6655_v34  ;;  %v2167_v10 = vadd.f32 %v3298_v9, %v2055_v11  ;;  %vm1232_vm15 = vcmp.eq.s32.totalorder %v4528_v46, %v5638_v51  ;;  %v3313_v22 = vsel %vm2230_vm12, 1.0, %v6655_v34 }
 0x352   :  { %2315 = vperm.xlu1 %3715, %v5670_v50   ;;  %v1278_v50 = vadd.f32 %v3177_v49, %v1166_v3  ;;  %v1830_v63 = vadd.f32 %v3249_v16, %v1718_v57  ;;  %v3314_v49 = vsel %vm2231_vm8, 1.0, %v6655_v34  ;;  %v3147_v3 = vsel %vm1008_vm11, 1.0, %v6655_v34  ;;  %v6851_v57 = vld [vmem:[#allocation150_spill] sm:$0xff] }
 0x353   :  { %v3163_v13 = vsel %vm1120_vm13, 1.0, %v6655_v34  ;;  %v3330_v5 = vsel %vm2343_vm0, 1.0, %v6655_v34  ;;  %v1056_v1 = vadd.f32 %v3147_v3, %v5910_v31  ;;  %vm1344_vm3 = vcmp.eq.s32.totalorder %v4528_v46, %v5919_v21 }
 0x354   :  { %v1390_v56 = vadd.f32 %v3193_v38, %v1278_v50  ;;  %v1942_v43 = vadd.f32 %v3265_v53, %v1830_v63  ;;  %v2279_v38 = vadd.f32 %v3314_v49, %v2167_v10  ;;  %v3179_v48 = vsel %vm1232_vm15, 1.0, %v6655_v34 }
 0x355   :  { %vm1672_vm5 = vcmp.eq.s32.totalorder %v4528_v46, %v6852_v37  ;;  %v1168_v31 = vadd.f32 %v3163_v13, %v1056_v1  ;;  %v3195_v32 = vsel %vm1344_vm3, 1.0, %v6655_v34  ;;  %vm1345_vm8 = vcmp.eq.s32.totalorder %v4528_v46, %v5944_v62  ;;  %v6858_v1 = vld [vmem:[#allocation50_spill] sm:$0xff]  ;;  %v6861_v37 = vld [vmem:[#allocation156_spill] sm:$0xff] }
 0x356   :  { %3716 = vset.pattern.permute.xlu1 %v6752_v29  ;;  %v1432_v58 = vpop.permute.xlu1 %1431  ;;  %v3222_v29 = vsel %vm1563_vm1, 1.0, %v6655_v34  ;;  %vm1560_vm1 = vcmp.eq.s32.totalorder %v4528_v46, %v6851_v57  ;;  %vm2008_vm12 = vcmp.eq.s32.totalorder %v4528_v46, %v5546_v24  ;;  %vm2232_vm0 = vcmp.eq.s32.totalorder %v4528_v46, %v6004_v42  ;;  %v3766_v42 = vld [vmem:[%s6409_s0 + $0x78] sm:$0xff] }
 0x357   :  { %vm1454_vm2 = vcmp.eq.s32.totalorder %v4528_v46, %v1432_v58  ;;  %1885 = vperm.xlu1 %3716, %v5727_v52   ;;  %v1611_v19 = vadd.f32 %v3222_v29, %v1499_v2  ;;  %v3219_v25 = vsel %vm1560_vm1, 1.0, %v6655_v34  ;;  %v3283_v24 = vsel %vm2008_vm12, 1.0, %v6655_v34 }
 0x358   :  { %v3209_v36 = vsel %vm1454_vm2, 1.0, %v6655_v34  ;;  %vm1121_vm2 = vcmp.eq.s32.totalorder %v4528_v46, %v5539_v55 }
 0x359   :  { %v6038_v18 = vadd.f32 %v3209_v36, %v1390_v56  ;;  %v1723_v6 = vadd.f32 %v3238_v23, %v1611_v19  ;;  %v3164_v21 = vsel %vm1121_vm2, 1.0, %v6655_v34  ;;  %v3235_v36 = vsel %vm1672_vm5, 1.0, %v6655_v34  ;;  %v6854_v23 = vld [vmem:[#allocation151_spill] sm:$0xff] }
 0x35a   :  { %v1435_v54 = vpop.permute.xlu1 %1434  ;;  %v1169_v11 = vadd.f32 %v3164_v21, %v5967_v20  ;;  %vm1902_vm5 = vcmp.eq.s32.totalorder %v4528_v46, %v6861_v37  ;;  %v6862_v21 = vld [vmem:[#allocation26_spill] sm:$0xff] }
 0x35b   :  { %vm1455_vm7 = vcmp.eq.s32.totalorder %v4528_v46, %v1435_v54  ;;  %1888 = vperm.xlu1 %3716, %v5391_v15   ;;  %v3281_v15 = vsel %vm2006_vm6, 1.0, %v6655_v34  ;;  %v1835_v47 = vadd.f32 %v3254_v14, %v1723_v6  ;;  %vm1233_vm6 = vcmp.eq.s32.totalorder %v4528_v46, %v5660_v4 }
 0x35c   :  { %v3210_v39 = vsel %vm1455_vm7, 1.0, %v6655_v34  ;;  %v2054_v8 = vadd.f32 %v3281_v15, %v1942_v43  ;;  %vm1784_vm7 = vcmp.eq.s32.totalorder %v4528_v46, %v6853_v61  ;;  %v3180_v4 = vsel %vm1233_vm6, 1.0, %v6655_v34  ;;  %v6856_v43 = vld [vmem:[#allocation53_spill] sm:$0xff] }
 0x35d   :  { %v6056_v26 = vadd.f32 %v3210_v39, %v1391_v41  ;;  %v3251_v2 = vsel %vm1784_vm7, 1.0, %v6655_v34  ;;  %v3196_v54 = vsel %vm1345_vm8, 1.0, %v6655_v34  ;;  %v1281_v53 = vadd.f32 %v3180_v4, %v1169_v11  ;;  %v6855_v39 = vld [vmem:[#allocation136_spill] sm:$0xff] }
 0x35e   :  { %v2166_v50 = vadd.f32 %v3297_v45, %v2054_v8  ;;  %vm1569_vm11 = vcmp.eq.s32.totalorder %v4528_v46, %v6855_v39  ;;  %v3315_v8 = vsel %vm2232_vm0, 1.0, %v6655_v34  ;;  %vm2014_vm6 = vcmp.eq.s32.totalorder %v4528_v46, %v6862_v21 }
 0x35f   :  { %3718 = vset.pattern.permute.xlu1 %v6755_v60  ;;  %v1871_v0 = vpop.permute.xlu1 %1870  ;;  %v1393_v14 = vadd.f32 %v3196_v54, %v1281_v53  ;;  %v3228_v10 = vsel %vm1569_vm11, 1.0, %v6655_v34  ;;  %v3289_v4 = vsel %vm2014_vm6, 1.0, %v6655_v34 }
 0x360   :  { %vm1899_vm14 = vcmp.eq.s32.totalorder %v4528_v46, %v1871_v0  ;;  %2324 = vperm.xlu1 %3718, %v5419_v7   ;;  %v3203_v7 = vsel %vm1448_vm10, 1.0, %v6655_v34  ;;  %v2278_v58 = vadd.f32 %v3313_v22, %v2166_v50  ;;  %vm1896_vm10 = vcmp.eq.s32.totalorder %v4528_v46, %v6854_v23 }
 0x361   :  { %v3270_v35 = vsel %vm1899_vm14, 1.0, %v6655_v34  ;;  %v1496_v9 = vadd.f32 %v3203_v7, %v5969_v17  ;;  %v3267_v15 = vsel %vm1896_vm10, 1.0, %v6655_v34  ;;  %vm2120_vm14 = vcmp.eq.s32.totalorder %v4528_v46, %v6856_v43  ;;  %v6866_v43 = vld [vmem:[#allocation9_spill] sm:$0xff] }
 0x362   :  { %v6081_v59 = vadd.f32 %v3270_v35, %v1835_v47  ;;  %v3299_v47 = vsel %vm2120_vm14, 1.0, %v6655_v34  ;;  %v6857_v50 = vmov 19  }
 0x363   :  { %v1608_v16 = vadd.f32 %v3219_v25, %v1496_v9  ;;  %v6859_v25 = vld [vmem:[#allocation139_spill] sm:$0xff]  ;;  %v3273_v9 = vsel %vm1902_vm5, 1.0, %v6655_v34 }
 0x364   :  { %3719 = vset.pattern.permute.xlu1 %v6757_v27  ;;  %v2304_v51 = vpop.permute.xlu1 %2303  ;;  %v2391_v27 = vadd.f32 %v3330_v5, %v2279_v38  ;;  %vm1678_vm2 = vcmp.eq.s32.totalorder %v4528_v46, %v6859_v25 }
 0x365   :  { %vm2342_vm4 = vcmp.eq.s32.totalorder %v4528_v46, %v2304_v51  ;;  %1994 = vperm.xlu1 %3719, %v5505_v44   ;;  %v1280_v44 = vadd.f32 %v3179_v48, %v1168_v31  ;;  %v1720_v41 = vadd.f32 %v3235_v36, %v1608_v16  ;;  %v2207_v36 = vpop.permute.xlu0 %2206 }
 0x366   :  { %v3329_v55 = vsel %vm2342_vm4, 1.0, %v6655_v34  ;;  %vm2235_vm10 = vcmp.eq.s32.totalorder %v4528_v46, %v2207_v36 }
 0x367   :  { %v2390_v56 = vadd.f32 %v3329_v55, %v2278_v58  ;;  %v1392_v17 = vadd.f32 %v3195_v32, %v1280_v44  ;;  %v1832_v63 = vadd.f32 %v3251_v2, %v1720_v41  ;;  %v6860_v58 = vld [vmem:[#allocation149_spill] sm:$0xff]  ;;  %v3241_v55 = vsel %vm1678_vm2, 1.0, %v6655_v34 }
 0x368   :  { %vm1790_vm4 = vcmp.eq.s32.totalorder %v4528_v46, %v6860_v58 }
 0x369   :  { %1997 = vperm.xlu1 %3719, %v5727_v52   ;;  %v1438_v29 = vpop.permute.xlu1 %1437  ;;  %v6114_v30 = vpack.c.bf16 %v2391_v27, %v2390_v56  ;;  %v1944_v49 = vadd.f32 %v3267_v15, %v1832_v63  ;;  %v3257_v56 = vsel %vm1790_vm4, 1.0, %v6655_v34  ;;  %vm2609_vm4 = vcmask 523264  }
 0x36a   :  { %vm1456_vm9 = vcmp.eq.s32.totalorder %v4528_v46, %v1438_v29  ;;  %v6863_v29 = vld [vmem:[#allocation30_spill] sm:$0xff] }
 0x36b   :  { %v3211_v62 = vsel %vm1456_vm9, 1.0, %v6655_v34  ;;  %3471 = vmatprep.mubr.bf16.mxu0 %v6114_v30  ;;  %v2056_v12 = vadd.f32 %v3283_v24, %v1944_v49  ;;  %vm2123_vm8 = vcmp.eq.s32.totalorder %v4528_v46, %v6863_v29 }
 0x36c   :  { %v6124_v19 = vadd.f32 %v3211_v62, %v1392_v17  ;;  %v3302_v17 = vsel %vm2123_vm8, 1.0, %v6655_v34  ;;  %v3318_v62 = vsel %vm2235_vm10, 1.0, %v6655_v34 }
 0x36d   :  { %3721 = vset.pattern.permute.xlu1 %v6694_v33  ;;  %v1441_v20 = vpop.permute.xlu1 %1440  ;;  %v2168_v57 = vadd.f32 %v3299_v47, %v2056_v12 }
 0x36e   :  { %vm1457_vm13 = vcmp.eq.s32.totalorder %v4528_v46, %v1441_v20  ;;  %2103 = vperm.xlu1 %3721, %v3765_v40  }
 0x36f   :  { %v3212_v6 = vsel %vm1457_vm13, 1.0, %v6655_v34  ;;  %v2280_v7 = vadd.f32 %v3315_v8, %v2168_v57 }
 0x370   :  { %v1505_v33 = vadd.f32 %v3212_v6, %v1393_v14  ;;  %v2210_v14 = vpop.permute.xlu0 %2209 }
 0x371   :  { %vm2236_vm0 = vcmp.eq.s32.totalorder %v4528_v46, %v2210_v14 }
 0x372   :  { %2109 = vperm.xlu1 %3721, %v5727_v52   ;;  %v1877_v0 = vpop.permute.xlu1 %1876  ;;  %v6144_v45 = vadd.f32 %v3228_v10, %v1505_v33  ;;  %v6867_v33 = vld [vmem:[#allocation45_spill] sm:$0xff]  ;;  %v3319_v24 = vsel %vm2236_vm0, 1.0, %v6655_v34 }
 0x373   :  { %vm1901_vm1 = vcmp.eq.s32.totalorder %v4528_v46, %v1877_v0 }
 0x374   :  { %v3272_v3 = vsel %vm1901_vm1, 1.0, %v6655_v34  ;;  %vm2348_vm1 = vcmp.eq.s32.totalorder %v4528_v46, %v6866_v43 }
 0x375   :  { %v6151_v35 = vadd.f32 %v3272_v3, %v5990_v28  ;;  %v3767_v28 = vld [vmem:[%s6409_s0 + $0x68] sm:$0xff]  ;;  %v3335_v0 = vsel %vm2348_vm1, 1.0, %v6655_v34 }
 0x376   :  { %2112 = vperm.xlu1 %3721, %v3766_v42  }
 0x377   :  { %v2310_v22 = vpop.permute.xlu1 %2309 }
 0x378   :  { %vm2344_vm15 = vcmp.eq.s32.totalorder %v4528_v46, %v2310_v22 }
 0x379   :  { %v3331_v38 = vsel %vm2344_vm15, 1.0, %v6655_v34 }
 0x37a   :  { %v2392_v13 = vadd.f32 %v3331_v38, %v2280_v7  ;;  %3723 = vset.pattern.permute.xlu1 %v6857_v50 }
 0x37b   :  { %2218 = vperm.xlu1 %3723, %v3767_v28  }
 0x37c   :  { %v1544_v5 = vpop.permute.xlu1 %1543  ;;  %v6163_v51 = vpack.c.bf16 %v6858_v1, %v2392_v13 }
 0x37d   :  { %vm1566_vm3 = vcmp.eq.s32.totalorder %v4528_v46, %v1544_v5  ;;  %v6229_v5 = vld [vmem:[%s6412_s2] ss:$0 sm:$0xff] }
 0x37e   :  { %v3225_v48 = vsel %vm1566_vm3, 1.0, %v6655_v34  ;;  %3472 = vmatmul.mubr.bf16.gmra.mxu0 %v6163_v51 }
 0x37f   :  { %v1614_v31 = vadd.f32 %v3225_v48, %v6038_v18  ;;  %2221 = vperm.xlu1 %3723, %v5727_v52  }
 0x380   :  { %v1547_v27 = vpop.permute.xlu1 %1546 }
 0x381   :  { %v1726_v32 = vadd.f32 %v3241_v55, %v1614_v31  ;;  %vm1567_vm7 = vcmp.eq.s32.totalorder %v4528_v46, %v1547_v27 }
 0x382   :  { %v3226_v61 = vsel %vm1567_vm7, 1.0, %v6655_v34 }
 0x383   :  { %v1838_v44 = vadd.f32 %v3257_v56, %v1726_v32  ;;  %v1615_v18 = vadd.f32 %v3226_v61, %v6056_v26  ;;  %3724 = vset.pattern.permute.xlu1 %v6755_v60  ;;  %v6864_v60 = vld [vmem:[#allocation14_spill] sm:$0xff] }
 0x384   :  { %2327 = vperm.xlu1 %3724, %v3765_v40   ;;  %vm2347_vm11 = vcmp.eq.s32.totalorder %v4528_v46, %v6864_v60  ;;  %v6865_v40 = vld [vmem:[#allocation37_spill] sm:$0xff] }
 0x385   :  { %v1983_v16 = vpop.permute.xlu1 %1982  ;;  %v1950_v11 = vadd.f32 %v3273_v9, %v1838_v44  ;;  %v3334_v53 = vsel %vm2347_vm11, 1.0, %v6655_v34  ;;  %vm2124_vm13 = vcmp.eq.s32.totalorder %v4528_v46, %v6865_v40 }
 0x386   :  { %vm2011_vm9 = vcmp.eq.s32.totalorder %v4528_v46, %v1983_v16  ;;  %v3303_v15 = vsel %vm2124_vm13, 1.0, %v6655_v34 }
 0x387   :  { %v3286_v2 = vsel %vm2011_vm9, 1.0, %v6655_v34  ;;  %v6192_v26 = vadd.f32 %v3289_v4, %v1950_v11 }
 0x388   :  { %v2059_v54 = vadd.f32 %v3286_v2, %v6081_v59  ;;  %2333 = vperm.xlu1 %3724, %v5727_v52  }
 0x38a   :  { %v2171_v23 = vadd.f32 %v3302_v17, %v2059_v54  ;;  %v1550_v41 = vpop.permute.xlu1 %1549 }
 0x38b   :  { %vm1568_vm12 = vcmp.eq.s32.totalorder %v4528_v46, %v1550_v41 }
 0x38c   :  { %v2283_v39 = vadd.f32 %v3318_v62, %v2171_v23  ;;  %v3227_v20 = vsel %vm1568_vm12, 1.0, %v6655_v34  ;;  %2336 = vperm.xlu1 %3724, %v3766_v42   ;;  %v6868_v62 = vld [vmem:[#allocation31_spill] sm:$0xff] }
 0x38d   :  { %v1616_v63 = vadd.f32 %v3227_v20, %v6124_v19 }
 0x38e   :  { %v6205_v59 = vadd.f32 %v3334_v53, %v2283_v39 }
 0x38f   :  { %v1986_v52 = vpop.permute.xlu1 %1985 }
 0x390   :  { %vm2012_vm14 = vcmp.eq.s32.totalorder %v4528_v46, %v1986_v52 }
 0x391   :  { %v3287_v6 = vsel %vm2012_vm14, 1.0, %v6655_v34 }
 0x392   :  { %v2060_v19 = vadd.f32 %v3287_v6, %v6867_v33  ;;  %v6869_v6 = vld [vmem:[#allocation28_spill] sm:$0xff] }
 0x393   :  { %v6214_v10 = vpop.permute.xlu1 %1988  ;;  %vm2017_vm14 = vcmp.eq.s32.totalorder %v4528_v46, %v6869_v6 }
 0x394   :  { %v2172_v49 = vadd.f32 %v3303_v15, %v2060_v19  ;;  %vm2013_vm11 = vcmp.eq.s32.totalorder %v4528_v46, %v6214_v10 }
 0x395   :  { %v3288_v52 = vsel %vm2013_vm11, 1.0, %v6655_v34 }
 0x396   :  { %v2284_v47 = vadd.f32 %v3319_v24, %v2172_v49  ;;  %v3292_v49 = vsel %vm2017_vm14, 1.0, %v6655_v34 }
 0x398   :  { %v6218_v12 = vadd.f32 %v3335_v0, %v2284_v47  ;;  %v1659_v3 = vpop.permute.xlu1 %1658 }
 0x399   :  { %vm1679_vm15 = vcmp.eq.s32.totalorder %v4528_v46, %v1659_v3 }
 0x39a   :  { %v3242_v8 = vsel %vm1679_vm15, 1.0, %v6655_v34 }
 0x39b   :  { %v1727_v57 = vadd.f32 %v3242_v8, %v1615_v18 }
 0x39d   :  { %v2092_v42 = vpop.permute.xlu1 %2091 }
 0x39e   :  { %vm2122_vm7 = vcmp.eq.s32.totalorder %v4528_v46, %v2092_v42 }
 0x39f   :  { %v3301_v60 = vsel %vm2122_vm7, 1.0, %v6655_v34 }
 0x3a0   :  { %v2170_v23 = vadd.f32 %v3301_v60, %v6868_v62 }
 0x3a2   :  { %v1662_v22 = vpop.permute.xlu1 %1661 }
 0x3a3   :  { %vm1680_vm2 = vcmp.eq.s32.totalorder %v4528_v46, %v1662_v22 }
 0x3a4   :  { %v3243_v7 = vsel %vm1680_vm2, 1.0, %v6655_v34 }
 0x3a5   :  { %v1728_v38 = vadd.f32 %v3243_v7, %v1616_v63 }
 0x3a6   :  { %v1665_v13 = vpop.permute.xlu1 %1664  ;;  %v3469_v50 = vpop.f32.mrf.mxu0 }
 0x3a7   :  { %vm1681_vm3 = vcmp.eq.s32.totalorder %v4528_v46, %v1665_v13  ;;  %v2524_v55 = vadd.f32 %v3469_v50, %v6229_v5 }
 0x3a8   :  { %v3244_v28 = vsel %vm1681_vm3, 1.0, %v6655_v34  ;;  %v2515_v1 = vpop.f32.mrf.mxu0 }
 0x3a9   :  { %v1729_v25 = vadd.f32 %v3244_v28, %v6144_v45  ;;  %v2516_v48 = vadd.f32 %v6229_v5, %v2515_v1  ;;  %v2580_v9 = vmax.f32 %v2524_v55, 0.0 }
 0x3aa   :  { %v3470_v58 = vpop.f32.mrf.mxu0 }
 0x3ab   :  { %v2578_v37 = vmax.f32 %v2516_v48, 0.0  ;;  %v2101_v31 = vpop.permute.xlu1 %2100  ;;  %v2527_v32 = vadd.f32 %v3470_v58, %v6229_v5 }
 0x3ac   :  { %v2518_v27 = vpop.f32.mrf.mxu0  ;;  %vm2125_vm12 = vcmp.eq.s32.totalorder %v4528_v46, %v2101_v31  ;;  %v2216_v31 = vpop.permute.xlu0 %2215 }
 0x3ad   :  { %v2519_v21 = vadd.f32 %v6229_v5, %v2518_v27  ;;  %3499 = vmatprep.mubr.msk.f32.mxu1 %vm2609_vm4, %v2578_v37  ;;  %v2581_v44 = vmax.f32 %v2527_v32, 0.0  ;;  %v3304_v43 = vsel %vm2125_vm12, 1.0, %v6655_v34  ;;  %vm2238_vm7 = vcmp.eq.s32.totalorder %v4528_v46, %v2216_v31 }
 0x3af   :  { %v2579_v56 = vmax.f32 %v2519_v21, 0.0 }
 0x3b0   :  { %v1771_v61 = vpop.permute.xlu1 %1770  ;;  %v2225_v55 = vpop.permute.xlu0 %2224 }
 0x3b1   :  { %vm1791_vm5 = vcmp.eq.s32.totalorder %v4528_v46, %v1771_v61  ;;  %3500 = vmatmul.mubr.msk.f32.vlgmr.msra.gmra.mxu1 %vm2609_vm4, %v2579_v56 }
 0x3b2   :  { %v3258_v45 = vsel %vm1791_vm5, 1.0, %v6655_v34  ;;  %3502 = vmatprep.mubr.msk.f32.mxu1 %vm2609_vm4, %v2580_v9 }
 0x3b3   :  { %v1839_v18 = vadd.f32 %v3258_v45, %v1727_v57  ;;  %v3321_v45 = vsel %vm2238_vm7, 1.0, %v6655_v34 }
 0x3b4   :  { %v2331_v32 = vpop.permute.xlu0 %2330 }
 0x3b5   :  { %v2204_v36 = vpop.permute.xlu1 %2203  ;;  %3503 = vmatmul.mubr.msk.f32.gmra.mxu1 %vm2609_vm4, %v2581_v44 }
 0x3b6   :  { %vm2234_vm8 = vcmp.eq.s32.totalorder %v4528_v46, %v2204_v36 }
 0x3b7   :  { %v3317_v54 = vsel %vm2234_vm8, 1.0, %v6655_v34 }
 0x3b8   :  { %v2282_v53 = vadd.f32 %v3317_v54, %v2170_v23 }
 0x3ba   :  { %v1774_v4 = vpop.permute.xlu1 %1773 }
 0x3bb   :  { %vm1792_vm6 = vcmp.eq.s32.totalorder %v4528_v46, %v1774_v4 }
 0x3bc   :  { %v3259_v29 = vsel %vm1792_vm6, 1.0, %v6655_v34 }
 0x3bd   :  { %v6244_v16 = vadd.f32 %v3259_v29, %v1728_v38  ;;  %v6870_v38 = vld [vmem:[#allocation40_spill] sm:$0xff] }
 0x3be   :  { %v1777_v11 = vpop.permute.xlu1 %1776  ;;  %vm2127_vm2 = vcmp.eq.s32.totalorder %v4528_v46, %v6870_v38 }
 0x3bf   :  { %vm1793_vm10 = vcmp.eq.s32.totalorder %v4528_v46, %v1777_v11  ;;  %v3306_v1 = vsel %vm2127_vm2, 1.0, %v6655_v34  ;;  %vm3790_vm2 = vmmov 0  }
 0x3c0   :  { %v3260_v40 = vsel %vm1793_vm10, 1.0, %v6655_v34 }
 0x3c1   :  { %v1841_v33 = vadd.f32 %v3260_v40, %v1729_v25 }
 0x3c3   :  { %v2213_v17 = vpop.permute.xlu1 %2212 }
 0x3c4   :  { %vm2237_vm13 = vcmp.eq.s32.totalorder %v4528_v46, %v2213_v17 }
 0x3c5   :  { %v3320_v10 = vsel %vm2237_vm13, 1.0, %v6655_v34 }
 0x3c8   :  { %v1883_v2 = vpop.permute.xlu1 %1882 }
 0x3c9   :  { %vm1903_vm1 = vcmp.eq.s32.totalorder %v4528_v46, %v1883_v2 }
 0x3ca   :  { %v3274_v42 = vsel %vm1903_vm1, 1.0, %v6655_v34 }
 0x3cb   :  { %v1951_v13 = vadd.f32 %v3274_v42, %v1839_v18 }
 0x3cd   :  { %v2316_v41 = vpop.permute.xlu1 %2315 }
 0x3ce   :  { %vm2346_vm9 = vcmp.eq.s32.totalorder %v4528_v46, %v2316_v41 }
 0x3cf   :  { %v3333_v39 = vsel %vm2346_vm9, 1.0, %v6655_v34  ;;  %vm2351_vm9 = vcmp.eq.s32.totalorder %v4528_v46, %v2331_v32 }
 0x3d0   :  { %v2394_v20 = vadd.f32 %v3333_v39, %v2282_v53  ;;  %v3338_v36 = vsel %vm2351_vm9, 1.0, %v6655_v34 }
 0x3d2   :  { %v1886_v63 = vpop.permute.xlu1 %1885  ;;  %v6257_v14 = vpack.c.bf16 %v6205_v59, %v2394_v20  ;;  %v2061_v59 = vadd.f32 %v3288_v52, %v6151_v35 }
 0x3d3   :  { %vm1904_vm8 = vcmp.eq.s32.totalorder %v4528_v46, %v1886_v63 }
 0x3d4   :  { %3475 = vmatprep.mubr.bf16.mxu0 %v6257_v14  ;;  %v2173_v0 = vadd.f32 %v3304_v43, %v2061_v59  ;;  %v3275_v18 = vsel %vm1904_vm8, 1.0, %v6655_v34 }
 0x3d5   :  { %v1952_v2 = vadd.f32 %v3275_v18, %v6244_v16 }
 0x3d6   :  { %v1889_v15 = vpop.permute.xlu1 %1888  ;;  %v2285_v8 = vadd.f32 %v3320_v10, %v2173_v0  ;;  %v6871_v10 = vld [vmem:[#allocation47_spill] sm:$0xff] }
 0x3d7   :  { %vm1905_vm0 = vcmp.eq.s32.totalorder %v4528_v46, %v1889_v15 }
 0x3d8   :  { %v3276_v19 = vsel %vm1905_vm0, 1.0, %v6655_v34  ;;  %vm2241_vm0 = vcmp.eq.s32.totalorder %v4528_v46, %v2225_v55 }
 0x3d9   :  { %v1953_v24 = vadd.f32 %v3276_v19, %v1841_v33  ;;  %v3324_v16 = vsel %vm2241_vm0, 1.0, %v6655_v34 }
 0x3db   :  { %v2325_v47 = vpop.permute.xlu1 %2324  ;;  %v2065_v3 = vadd.f32 %v3292_v49, %v1953_v24 }
 0x3dc   :  { %vm2349_vm15 = vcmp.eq.s32.totalorder %v4528_v46, %v2325_v47 }
 0x3dd   :  { %v3336_v57 = vsel %vm2349_vm15, 1.0, %v6655_v34 }
 0x3de   :  { %v2397_v35 = vadd.f32 %v3336_v57, %v2285_v8 }
 0x3e0   :  { %v1995_v22 = vpop.permute.xlu1 %1994  ;;  %v6277_v7 = vpack.c.bf16 %v2397_v35, %v6218_v12 }
 0x3e1   :  { %vm2015_vm3 = vcmp.eq.s32.totalorder %v4528_v46, %v1995_v22 }
 0x3e2   :  { %v3290_v50 = vsel %vm2015_vm3, 1.0, %v6655_v34  ;;  %3476 = vmatmul.mubr.bf16.gmra.mxu0 %v6277_v7 }
 0x3e3   :  { %v2063_v28 = vadd.f32 %v3290_v50, %v1951_v13 }
 0x3e4   :  { %v1998_v25 = vpop.permute.xlu1 %1997 }
 0x3e5   :  { %v2175_v48 = vadd.f32 %v3306_v1, %v2063_v28  ;;  %vm2016_vm10 = vcmp.eq.s32.totalorder %v4528_v46, %v1998_v25 }
 0x3e9   :  { %v2104_v58 = vpop.permute.xlu1 %2103 }
 0x3ea   :  { %vm2126_vm5 = vcmp.eq.s32.totalorder %v4528_v46, %v2104_v58 }
 0x3eb   :  { %v3305_v21 = vsel %vm2126_vm5, 1.0, %v6655_v34 }
 0x3ec   :  { %v2174_v61 = vadd.f32 %v3305_v21, %v6192_v26  ;;  %v3291_v26 = vsel %vm2016_vm10, 1.0, %v6655_v34 }
 0x3ed   :  { %v2110_v37 = vpop.permute.xlu1 %2109  ;;  %v2064_v41 = vadd.f32 %v3291_v26, %v1952_v2 }
 0x3ee   :  { %v2286_v29 = vadd.f32 %v3321_v45, %v2174_v61  ;;  %vm2128_vm12 = vcmp.eq.s32.totalorder %v4528_v46, %v2110_v37 }
 0x3ef   :  { %v3307_v62 = vsel %vm2128_vm12, 1.0, %v6655_v34 }
 0x3f0   :  { %v2176_v63 = vadd.f32 %v3307_v62, %v2064_v41 }
 0x3f1   :  { %v2113_v12 = vpop.permute.xlu1 %2112 }
 0x3f2   :  { %vm2129_vm11 = vcmp.eq.s32.totalorder %v4528_v46, %v2113_v12 }
 0x3f3   :  { %v3308_v11 = vsel %vm2129_vm11, 1.0, %v6655_v34 }
 0x3f4   :  { %v2177_v53 = vadd.f32 %v3308_v11, %v2065_v3 }
 0x3f6   :  { %v2219_v27 = vpop.permute.xlu1 %2218  ;;  %v2289_v6 = vadd.f32 %v3324_v16, %v2177_v53 }
 0x3f7   :  { %vm2239_vm6 = vcmp.eq.s32.totalorder %v4528_v46, %v2219_v27 }
 0x3f8   :  { %v3322_v9 = vsel %vm2239_vm6, 1.0, %v6655_v34 }
 0x3f9   :  { %v2287_v44 = vadd.f32 %v3322_v9, %v2175_v48 }
 0x3fa   :  { %v2222_v56 = vpop.permute.xlu1 %2221 }
 0x3fb   :  { %v2399_v60 = vadd.f32 %v3338_v36, %v2287_v44  ;;  %vm2240_vm14 = vcmp.eq.s32.totalorder %v4528_v46, %v2222_v56 }
 0x3fc   :  { %v3323_v20 = vsel %vm2240_vm14, 1.0, %v6655_v34 }
 0x3fd   :  { %v2288_v15 = vadd.f32 %v3323_v20, %v2176_v63 }
 0x3ff   :  { %v2328_v4 = vpop.permute.xlu1 %2327 }
 0x400   :  { %vm2350_vm13 = vcmp.eq.s32.totalorder %v4528_v46, %v2328_v4  ;;  %v2820_v4 = vld [vmem:[%s6413_s3] sm:$0x1] }
 0x401   :  { %v3337_v17 = vsel %vm2350_vm13, 1.0, %v6655_v34 }
 0x402   :  { %v2398_v54 = vadd.f32 %v3337_v17, %v2286_v29 }
 0x403   :  { %v2334_v23 = vpop.permute.xlu1 %2333 }
 0x404   :  { %vm2352_vm1 = vcmp.eq.s32.totalorder %v4528_v46, %v2334_v23  ;;  %v2408_v39 = vpack.c.bf16 %v2399_v60, %v2398_v54 }
 0x405   :  { %v3339_v40 = vsel %vm2352_vm1, 1.0, %v6655_v34 }
 0x406   :  { %3479 = vmatprep.mubr.bf16.mxu0 %v2408_v39  ;;  %v2400_v33 = vadd.f32 %v3339_v40, %v2288_v15  ;;  %v3350_v40 = vld [vmem:[%s6415_s5] ss:$0 sm:$0xff] }
 0x407   :  { %v2337_v52 = vpop.permute.xlu1 %2336 }
 0x408   :  { %vm2353_vm15 = vcmp.eq.s32.totalorder %v4528_v46, %v2337_v52 }
 0x409   :  { %v3340_v43 = vsel %vm2353_vm15, 1.0, %v6655_v34 }
 0x40a   :  { %v2401_v59 = vadd.f32 %v3340_v43, %v2289_v6 }
 0x40c   :  { %v2409_v19 = vpack.c.bf16 %v2401_v59, %v2400_v33 }
 0x40e   :  { %3480 = vmatmul.mubr.bf16.gmra.mxu0 %v2409_v19  ;;  %3524 = vmatpush3.bf16.xpose.msra.mxu1 %v2409_v19 }
 0x40f   :  { %3525 = vmatprep.subr.bf16.mxu1 %v6655_v34  ;;  %3575 = vmatprep.mubr.msk.f32.mxu0 %vm3790_vm2, %v6655_v34 }
 0x416   :  { %3526 = vmatpush3.bf16.xpose.msra.mxu1 %v2408_v39 }
 0x417   :  { %3527 = vmatprep.subr.bf16.mxu1 %v6655_v34 }
 0x41e   :  { %3528 = vmatpush3.bf16.xpose.msra.mxu1 %v6277_v7 }
 0x41f   :  { %3529 = vmatprep.subr.bf16.mxu1 %v6655_v34 }
 0x426   :  { %3530 = vmatpush3.bf16.xpose.msra.mxu1 %v6257_v14 }
 0x427   :  { %3531 = vmatprep.subr.bf16.mxu1 %v6655_v34 }
 0x42e   :  { %3532 = vmatpush3.bf16.xpose.msra.mxu1 %v6163_v51 }
 0x42f   :  { %3533 = vmatprep.subr.bf16.mxu1 %v6655_v34 }
 0x436   :  { %3534 = vmatpush3.bf16.xpose.msra.mxu1 %v6114_v30  ;;  %v6872_v30 = vld [vmem:[#allocation39_spill] sm:$0xff] }
 0x437   :  { %3535 = vmatprep.subr.bf16.mxu1 %v6655_v34 }
 0x43e   :  { %v3473_v46 = vpop.f32.mrf.mxu0  ;;  %3536 = vmatpush3.bf16.xpose.msra.mxu1 %v6871_v10 }
 0x43f   :  { %3537 = vmatprep.subr.bf16.mxu1 %v6655_v34  ;;  %v2540_v47 = vadd.f32 %v3473_v46, %v6229_v5 }
 0x440   :  { %v2531_v24 = vpop.f32.mrf.mxu0 }
 0x441   :  { %v2532_v49 = vadd.f32 %v6229_v5, %v2531_v24  ;;  %v2584_v42 = vmax.f32 %v2540_v47, 0.0 }
 0x442   :  { %v3474_v0 = vpop.f32.mrf.mxu0 }
 0x443   :  { %v2582_v14 = vmax.f32 %v2532_v49, 0.0  ;;  %v2543_v8 = vadd.f32 %v3474_v0, %v6229_v5 }
 0x444   :  { %v2534_v3 = vpop.f32.mrf.mxu0 }
 0x445   :  { %v2535_v51 = vadd.f32 %v6229_v5, %v2534_v3  ;;  %3505 = vmatprep.mubr.msk.f32.mxu1 %vm2609_vm4, %v2582_v14  ;;  %v2585_v35 = vmax.f32 %v2543_v8, 0.0 }
 0x446   :  { %3538 = vmatpush3.bf16.xpose.msra.mxu1 %v6872_v30 }
 0x447   :  { %v2583_v57 = vmax.f32 %v2535_v51, 0.0 }
 0x449   :  { %3506 = vmatmul.mubr.msk.f32.gmra.mxu1 %vm2609_vm4, %v2583_v57 }
 0x44a   :  { %3508 = vmatprep.mubr.msk.f32.mxu1 %vm2609_vm4, %v2584_v42 }
 0x44d   :  { %3509 = vmatmul.mubr.msk.f32.gmra.mxu1 %vm2609_vm4, %v2585_v35 }
 0x471   :  { %v6358_v26 = vpop.f32.mrf.mxu1 }
 0x473   :  { %v6360_v11 = vpop.f32.mrf.mxu1 }
 0x475   :  { %v3504_v17 = vpop.f32.mrf.mxu1 }
 0x477   :  { %v6362_v2 = vpop.f32.mrf.mxu1 }
 0x4a2   :  { %v3477_v22 = vpop.f32.mrf.mxu0 }
 0x4a3   :  { %v2556_v28 = vadd.f32 %v3477_v22, %v6229_v5 }
 0x4a4   :  { %v2547_v7 = vpop.f32.mrf.mxu0 }
 0x4a5   :  { %v2548_v38 = vadd.f32 %v6229_v5, %v2547_v7  ;;  %v2588_v37 = vmax.f32 %v2556_v28, 0.0 }
 0x4a6   :  { %v3478_v13 = vpop.f32.mrf.mxu0 }
 0x4a7   :  { %v2586_v50 = vmax.f32 %v2548_v38, 0.0  ;;  %v2559_v48 = vadd.f32 %v3478_v13, %v6229_v5 }
 0x4a8   :  { %v2550_v1 = vpop.f32.mrf.mxu0 }
 0x4a9   :  { %v2551_v25 = vadd.f32 %v6229_v5, %v2550_v1  ;;  %3511 = vmatprep.mubr.msk.f32.mxu1 %vm2609_vm4, %v2586_v50  ;;  %v2589_v31 = vmax.f32 %v2559_v48, 0.0  ;;  %v2740_v50 = vadd.f32 %v3504_v17, %v3350_v40  ;;  %v2730_v48 = vadd.f32 %v6358_v26, %v3350_v40 }
 0x4ab   :  { %v2587_v58 = vmax.f32 %v2551_v25, 0.0  ;;  %v2806_v1 = vmax.f32 %v2740_v50, 0.0  ;;  %v2735_v25 = vadd.f32 %v3350_v40, %v6362_v2 }
 0x4ad   :  { %3512 = vmatmul.mubr.msk.f32.gmra.mxu1 %vm2609_vm4, %v2587_v58  ;;  %v2805_v58 = vmax.f32 %v2735_v25, 0.0 }
 0x4ae   :  { %3514 = vmatprep.mubr.msk.f32.mxu1 %vm2609_vm4, %v2588_v37  ;;  %v2804_v37 = vmax.f32 %v2730_v48, 0.0 }
 0x4b1   :  { %3515 = vmatmul.mubr.msk.f32.gmra.mxu1 %vm2609_vm4, %v2589_v31  ;;  %v2725_v31 = vadd.f32 %v3350_v40, %v6360_v11 }
 0x4ce   :  { %v3481_v12 = vpop.f32.mrf.mxu0 }
 0x4cf   :  { %v2572_v56 = vadd.f32 %v3481_v12, %v6229_v5  ;;  %v2803_v12 = vmax.f32 %v2725_v31, 0.0 }
 0x4d0   :  { %v2563_v55 = vpop.f32.mrf.mxu0 }
 0x4d1   :  { %v2564_v27 = vadd.f32 %v6229_v5, %v2563_v55  ;;  %v2592_v18 = vmax.f32 %v2572_v56, 0.0  ;;  %v2819_v55 = vld [vmem:[%s6416_s6] sm:$0x1] }
 0x4d2   :  { %v3482_v21 = vpop.f32.mrf.mxu0 }
 0x4d3   :  { %v2590_v32 = vmax.f32 %v2564_v27, 0.0  ;;  %v2575_v45 = vadd.f32 %v3482_v21, %v6229_v5 }
 0x4d4   :  { %v2566_v9 = vpop.f32.mrf.mxu0 }
 0x4d5   :  { %v2567_v61 = vadd.f32 %v6229_v5, %v2566_v9  ;;  %3517 = vmatprep.mubr.msk.f32.mxu1 %vm2609_vm4, %v2590_v32  ;;  %v2593_v36 = vmax.f32 %v2575_v45, 0.0  ;;  %v13_v5 = vstv %s6414_s7  ;;  %v6873_v9 = vlaneseq }
 0x4d6   :  { %14 = vst [vmem:[#allocation2] sm:$0x1] %v13_v5 }
 0x4d7   :  { %v2591_v44 = vmax.f32 %v2567_v61, 0.0  ;;  %v2990_v61 = vshrl.u32 %v6873_v9, 7 }
 0x4d9   :  { %3518 = vmatmul.mubr.msk.f32.gmra.mxu1 %vm2609_vm4, %v2591_v44  ;;  %v2991_v45 = vsub.s32 0, %v2990_v61 }
 0x4da   :  { %3520 = vmatprep.mubr.msk.f32.mxu1 %vm2609_vm4, %v2592_v18 }
 0x4dd   :  { %3521 = vmatmul.mubr.msk.f32.gmra.mxu1 %vm2609_vm4, %v2593_v36  ;;  %v2983_v29 = vld [vmem:[#allocation2] sm:$0x1]  ;;  %vm2861_vm4 = vcmask 261120  }
 0x4de   :  { %3539 = vmatprep.mubr.msk.bf16.mxu1 %vm3790_vm2, %v6655_v34  ;;  %2986 = vperm.xlu0 %3726, %v2983_v29  }
 0x4e1   :  { %3540 = vmatmul.mubr.bf16.vlgmr.msra.gmra.mxu1 %v2820_v4 }
 0x509   :  { %v3507_v60 = vpop.f32.mrf.mxu1 }
 0x50a   :  { %v2750_v22 = vadd.f32 %v3507_v60, %v3350_v40 }
 0x50b   :  { %v2744_v54 = vpop.f32.mrf.mxu1 }
 0x50c   :  { %v2808_v38 = vmax.f32 %v2750_v22, 0.0  ;;  %v2745_v13 = vadd.f32 %v3350_v40, %v2744_v54 }
 0x50d   :  { %v3510_v62 = vpop.f32.mrf.mxu1 }
 0x50e   :  { %v2760_v8 = vadd.f32 %v3510_v62, %v3350_v40  ;;  %v2807_v28 = vmax.f32 %v2745_v13, 0.0 }
 0x50f   :  { %v2754_v23 = vpop.f32.mrf.mxu1 }
 0x510   :  { %v2810_v42 = vmax.f32 %v2760_v8, 0.0  ;;  %v2755_v35 = vadd.f32 %v3350_v40, %v2754_v23 }
 0x512   :  { %v2809_v7 = vmax.f32 %v2755_v35, 0.0 }
 0x559   :  { %v2987_v44 = vpop.permute.xlu0 %2986 }
 0x55a   :  { %v2992_v18 = vrot.slane %v2987_v44, %v2991_v45 }
 0x56d   :  { %v3513_v41 = vpop.f32.mrf.mxu1 }
 0x56e   :  { %v2770_v47 = vadd.f32 %v3513_v41, %v3350_v40 }
 0x56f   :  { %v2764_v53 = vpop.f32.mrf.mxu1 }
 0x570   :  { %v2812_v51 = vmax.f32 %v2770_v47, 0.0  ;;  %v2765_v30 = vadd.f32 %v3350_v40, %v2764_v53 }
 0x571   :  { %v3516_v39 = vpop.f32.mrf.mxu1 }
 0x572   :  { %v2780_v24 = vadd.f32 %v3516_v39, %v3350_v40  ;;  %v2811_v57 = vmax.f32 %v2765_v30, 0.0 }
 0x573   :  { %v2774_v20 = vpop.f32.mrf.mxu1 }
 0x574   :  { %v2814_v0 = vmax.f32 %v2780_v24, 0.0  ;;  %v2775_v14 = vadd.f32 %v3350_v40, %v2774_v20 }
 0x576   :  { %v2813_v3 = vmax.f32 %v2775_v14, 0.0 }
 0x599   :  { %v3519_v63 = vpop.f32.mrf.mxu1 }
 0x59a   :  { %v2790_v59 = vadd.f32 %v3519_v63, %v3350_v40 }
 0x59b   :  { %v2784_v16 = vpop.f32.mrf.mxu1 }
 0x59c   :  { %v2816_v46 = vmax.f32 %v2790_v59, 0.0  ;;  %v2785_v10 = vadd.f32 %v3350_v40, %v2784_v16 }
 0x59d   :  { %v3522_v52 = vpop.f32.mrf.mxu1 }
 0x59e   :  { %v2800_v15 = vadd.f32 %v3522_v52, %v3350_v40  ;;  %v2815_v49 = vmax.f32 %v2785_v10, 0.0 }
 0x59f   :  { %v2794_v6 = vpop.f32.mrf.mxu1 }
 0x5a0   :  { %v2818_v43 = vmax.f32 %v2800_v15, 0.0  ;;  %v2795_v33 = vadd.f32 %v3350_v40, %v2794_v6 }
 0x5a1   :  { %v2855_v27 = vpop.f32.mrf.mxu1 }
 0x5a2   :  { %3544 = vmatpush3.xpose.msk.msra.mxu0 %vm2861_vm4, %v2818_v43  ;;  %v2817_v19 = vmax.f32 %v2795_v33, 0.0 }
 0x5a3   :  { %3545 = vmatprep.subr.mxu0 %v6655_v34  ;;  %v3541_v21 = vpop.f32.mrf.mxu1 }
 0x5a5   :  { %v2858_v32 = vpop.f32.mrf.mxu1 }
 0x5a6   :  { %3546 = vmatpush3.xpose.msk.msra.mxu0 %vm2861_vm4, %v2817_v19 }
 0x5a7   :  { %3547 = vmatprep.subr.mxu0 %v6655_v34  ;;  %v3542_v56 = vpop.f32.mrf.mxu1 }
 0x5aa   :  { %3548 = vmatpush3.xpose.msk.msra.mxu0 %vm2861_vm4, %v2816_v46 }
 0x5ab   :  { %3549 = vmatprep.subr.mxu0 %v6655_v34 }
 0x5ae   :  { %3550 = vmatpush3.xpose.msk.msra.mxu0 %vm2861_vm4, %v2815_v49 }
 0x5af   :  { %3551 = vmatprep.subr.mxu0 %v6655_v34 }
 0x5b2   :  { %3552 = vmatpush3.xpose.msk.msra.mxu0 %vm2861_vm4, %v2814_v0 }
 0x5b3   :  { %3553 = vmatprep.subr.mxu0 %v6655_v34 }
 0x5b6   :  { %3554 = vmatpush3.xpose.msk.msra.mxu0 %vm2861_vm4, %v2813_v3 }
 0x5b7   :  { %3555 = vmatprep.subr.mxu0 %v6655_v34 }
 0x5ba   :  { %3556 = vmatpush3.xpose.msk.msra.mxu0 %vm2861_vm4, %v2812_v51 }
 0x5bb   :  { %3557 = vmatprep.subr.mxu0 %v6655_v34 }
 0x5be   :  { %3558 = vmatpush3.xpose.msk.msra.mxu0 %vm2861_vm4, %v2811_v57 }
 0x5bf   :  { %3559 = vmatprep.subr.mxu0 %v6655_v34 }
 0x5c2   :  { %3560 = vmatpush3.xpose.msk.msra.mxu0 %vm2861_vm4, %v2810_v42 }
 0x5c3   :  { %3561 = vmatprep.subr.mxu0 %v6655_v34 }
 0x5c6   :  { %3562 = vmatpush3.xpose.msk.msra.mxu0 %vm2861_vm4, %v2809_v7 }
 0x5c7   :  { %3563 = vmatprep.subr.mxu0 %v6655_v34 }
 0x5ca   :  { %3564 = vmatpush3.xpose.msk.msra.mxu0 %vm2861_vm4, %v2808_v38 }
 0x5cb   :  { %3565 = vmatprep.subr.mxu0 %v6655_v34 }
 0x5ce   :  { %3566 = vmatpush3.xpose.msk.msra.mxu0 %vm2861_vm4, %v2807_v28 }
 0x5cf   :  { %3567 = vmatprep.subr.mxu0 %v6655_v34 }
 0x5d2   :  { %3568 = vmatpush3.xpose.msk.msra.mxu0 %vm2861_vm4, %v2806_v1 }
 0x5d3   :  { %3569 = vmatprep.subr.mxu0 %v6655_v34 }
 0x5d6   :  { %3570 = vmatpush3.xpose.msk.msra.mxu0 %vm2861_vm4, %v2805_v58 }
 0x5d7   :  { %3571 = vmatprep.subr.mxu0 %v6655_v34 }
 0x5da   :  { %3572 = vmatpush3.xpose.msk.msra.mxu0 %vm2861_vm4, %v2804_v37 }
 0x5db   :  { %3573 = vmatprep.subr.mxu0 %v6655_v34 }
 0x5de   :  { %3574 = vmatpush3.xpose.msk.msra.mxu0 %vm2861_vm4, %v2803_v12 }
 0x5e1   :  { %3576 = vmatmul.mubr.msk.f32.vlgmr.msra.gmra.mxu0 %vm2861_vm4, %v2819_v55 }
 0x6a1   :  { %v2979_v36 = vpop.f32.mrf.mxu0 }
 0x6a2   :  { %v2980_v34 = vadd.f32 %v2979_v36, %v2855_v27 }
 0x6a3   :  { %v3577_v4 = vpop.f32.mrf.mxu0 }
 0x6a4   :  { %v2993_v5 = vadd.f32 %v2992_v18, %v2980_v34 }
 0x6a6   :  { %v3384_v29 = vmul.f32 -1.442695, %v2993_v5 }
 0x6a8   :  { %3735 = vpow2.f32 %v3384_v29 }
 0x6b5   :  { %v3736_v26 = vpop.eup %3735 }
 0x6b6   :  { %v2997_v11 = vadd.f32 1.0, %v3736_v26 }
 0x6b8   :  { %3737 = vrcp.f32 %v2997_v11 }
 0x6c5   :  { %v3738_v17 = vpop.eup %3737 }
 0x6c6   :  { %3000 = vst [vmem:[%s6417_s8] sm:$0x1] %v3738_v17 }

</bundles_post_ra>
